<compile_context>
chip_gen: v6e
topology: v6e:2x2x1
jax: 0.10.0
libtpu: 0.0.40
codegen_flags: <defaults>
</compile_context>

<pallas_src>
import jax
import jax.numpy as jnp
from jax import lax
from jax.experimental import pallas as pl
from jax.experimental.pallas import tpu as pltpu

# ---- shrunk module constants (small, (8,128)-aligned) ----
SOURCE_MAX_LEN = 128     # S  (original: 360)
VISUAL_DIM     = 128     # Dv (original: 768)
VISUAL_MAX_LEN = 1       # Lv (kernel relies on Lv == 1, as the module fixes)
DIM_MODEL      = 128     # D
BATCH          = 2
LN_EPS         = 1e-5


def maf_kernel(
    # per-batch tensors
    text_ref, vis_ref,
    # packed parameters
    wt_ref,       # (S, 1)   f32 : visual_context_transform weight column
    w_ukuv_ref,   # (Dv, 2D) bf16: [u_k | u_v]
    w_qgt_ref,    # (D, 2D)  bf16: [w_q | w_gate_text_half]
    w1kv_ref,     # (D, 2)   bf16: [w1_k | w1_v]
    w_dd_ref,     # (4, D, D) bf16: [w_k, w_v, w_o, w_gate_video_half]
    rows_ref,     # (9, D)   f32 : bq, bk, bv, bo, bg, ln_w, ln_b, w2_k, w2_v
    # output
    out_ref,
):
    D = out_ref.shape[-1]

    text = text_ref[0]                                  # (S, D) f32
    text_bf = text.astype(jnp.bfloat16)
    vis_bf = vis_ref[0].astype(jnp.bfloat16)            # (1, Dv)
    wt = wt_ref[...]                                    # (S, 1) f32

    rows = rows_ref[...]                                # (9, D) f32
    bq, bk, bv = rows[0:1], rows[1:2], rows[2:3]
    bo, bg = rows[3:4], rows[4:5]
    ln_w, ln_b = rows[5:6], rows[6:7]
    w2k_row, w2v_row = rows[7:8], rows[8:9]

    # --- rank-1 visual context (Lv == 1): ctx = wt (S,1) ⊗ vis (1,Dv)
    vkv = jnp.dot(vis_bf, w_ukuv_ref[...],
                  preferred_element_type=jnp.float32)   # (1, 2D)
    vk, vv = vkv[:, :D], vkv[:, D:]
    s_k = jnp.sum(vk * w2k_row, axis=-1, keepdims=True)  # (1, 1): (vis@uk)@w2k
    s_v = jnp.sum(vv * w2v_row, axis=-1, keepdims=True)
    key_ctx = wt * vk                                    # (S, D)
    val_ctx = wt * vv

    # --- fused text projections: text @ [w_q | w_gate_text]
    qgt = jnp.dot(text_bf, w_qgt_ref[...],
                  preferred_element_type=jnp.float32)    # (S, 2D)
    q = qgt[:, :D] + bq
    tg = qgt[:, D:]                                      # text @ w_gate_text

    # --- context-aware lambda gates: text @ [w1_k | w1_v] + rank-1 context term
    tkv = jnp.dot(text_bf, w1kv_ref[...],
                  preferred_element_type=jnp.float32)    # (S, 2)
    lam_k = jax.nn.sigmoid(tkv[:, 0:1] + wt * s_k)       # (S, 1)
    lam_v = jax.nn.sigmoid(tkv[:, 1:2] + wt * s_v)

    k_cap = text + lam_k * (key_ctx - text)              # (1-l)*text + l*ctx
    v_cap = text + lam_v * (val_ctx - text)

    wk, wv_, wo, wg_v = w_dd_ref[0], w_dd_ref[1], w_dd_ref[2], w_dd_ref[3]
    k = jnp.dot(k_cap.astype(jnp.bfloat16), wk,
                preferred_element_type=jnp.float32) + bk
    v = jnp.dot(v_cap.astype(jnp.bfloat16), wv_,
                preferred_element_type=jnp.float32) + bv

    # --- single-head attention; contract last dims (no explicit k.T temp)
    scores = lax.dot_general(
        q.astype(jnp.bfloat16), k.astype(jnp.bfloat16),
        dimension_numbers=(((1,), (1,)), ((), ())),
        preferred_element_type=jnp.float32) * (D ** -0.5)   # (S, S)
    m = jnp.max(scores, axis=-1, keepdims=True)
    p = jnp.exp(scores - m)
    denom = jnp.sum(p, axis=-1, keepdims=True)
    attn_ctx = jnp.dot(p.astype(jnp.bfloat16), v.astype(jnp.bfloat16),
                       preferred_element_type=jnp.float32)  # (S, D)
    attn_ctx = attn_ctx * pl.reciprocal(denom, approx=True)  # normalize after

    video_out = jnp.dot(attn_ctx.astype(jnp.bfloat16), wo,
                        preferred_element_type=jnp.float32) + bo

    # --- gated fusion: sigmoid(Linear(cat(video_out, text)))
    gate = jax.nn.sigmoid(
        jnp.dot(video_out.astype(jnp.bfloat16), wg_v,
                preferred_element_type=jnp.float32) + tg + bg)

    y = text + gate * video_out

    # --- final LayerNorm over the model dim (all f32)
    mu = jnp.mean(y, axis=-1, keepdims=True)
    yc = y - mu
    var = jnp.mean(yc * yc, axis=-1, keepdims=True)
    out_ref[0] = yc * lax.rsqrt(var + LN_EPS) * ln_w + ln_b


def pack_params(p):
    """Fuse / stack the 21 raw parameters into 6 packed kernel arguments."""
    bf16 = lambda x: x.astype(jnp.bfloat16)
    wt = p["wt"].astype(jnp.float32)                                # (S, 1)
    w_ukuv = bf16(jnp.concatenate([p["uk"], p["uv"]], axis=1))      # (Dv, 2D)
    w_qgt = bf16(jnp.concatenate([p["wq"], p["wg_t"]], axis=1))     # (D, 2D)
    w1kv = bf16(jnp.concatenate([p["w1k"], p["w1v"]], axis=1))      # (D, 2)
    w_dd = bf16(jnp.stack([p["wk"], p["wv"], p["wo"], p["wg_v"]]))  # (4, D, D)
    rows = jnp.concatenate(
        [p["bq"], p["bk"], p["bv"], p["bo"], p["bg"],
         p["ln_w"], p["ln_b"], p["w2k"].T, p["w2v"].T],
        axis=0).astype(jnp.float32)                                 # (9, D)
    return wt, w_ukuv, w_qgt, w1kv, w_dd, rows


def maf_forward(text, visual, params):
    B, S, D = text.shape
    _, Lv, Dv = visual.shape
    # Rank-1 rewrite of visual_context_transform is only valid for Lv == 1
    # (which the original module hard-codes via VISUAL_MAX_LEN = 1).
    assert Lv == 1, "MAF kernel requires VISUAL_MAX_LEN == 1"

    packed = pack_params(params)

    def const_spec(arr):
        nd = arr.ndim
        return pl.BlockSpec(arr.shape, lambda b, _nd=nd: (0,) * _nd)

    in_specs = [
        pl.BlockSpec((1, S, D), lambda b: (b, 0, 0)),     # text
        pl.BlockSpec((1, Lv, Dv), lambda b: (b, 0, 0)),   # visual
    ] + [const_spec(w) for w in packed]

    return pl.pallas_call(
        maf_kernel,
        out_shape=jax.ShapeDtypeStruct((B, S, D), jnp.float32),
        grid=(B,),
        in_specs=in_specs,
        out_specs=pl.BlockSpec((1, S, D), lambda b: (b, 0, 0)),
        compiler_params=pltpu.CompilerParams(
            dimension_semantics=("parallel",)),
    )(text, visual, *packed)


def maf_reference(text, visual, p):
    """Pure-JAX f32 reference mirroring the PyTorch forward."""
    B, S, D = text.shape
    ctx = p["wt"][None] * visual                               # (B,S,Dv)
    key_ctx = ctx @ p["uk"]
    val_ctx = ctx @ p["uv"]
    lam_k = jax.nn.sigmoid(text @ p["w1k"] + key_ctx @ p["w2k"])
    lam_v = jax.nn.sigmoid(text @ p["w1v"] + val_ctx @ p["w2v"])
    k_cap = (1 - lam_k) * text + lam_k * key_ctx
    v_cap = (1 - lam_v) * text + lam_v * val_ctx
    q = text @ p["wq"] + p["bq"]
    k = k_cap @ p["wk"] + p["bk"]
    v = v_cap @ p["wv"] + p["bv"]
    scores = jnp.einsum("bqd,bkd->bqk", q, k) / jnp.sqrt(jnp.float32(D))
    attn = jax.nn.softmax(scores, axis=-1)
    video_out = jnp.einsum("bqk,bkd->bqd", attn, v) @ p["wo"] + p["bo"]
    gate = jax.nn.sigmoid(video_out @ p["wg_v"] + text @ p["wg_t"] + p["bg"])
    y = text + gate * video_out
    mu = jnp.mean(y, axis=-1, keepdims=True)
    var = jnp.mean((y - mu) ** 2, axis=-1, keepdims=True)
    return (y - mu) * lax.rsqrt(var + LN_EPS) * p["ln_w"] + p["ln_b"]


def init_params(key, S, D, Dv):
    keys = jax.random.split(key, 16)
    n = lambda k, shape, s=0.02: (s * jax.random.normal(k, shape)).astype(jnp.float32)
    return {
        "wt":   n(keys[0], (S, 1)),
        "uk":   n(keys[1], (Dv, D)),
        "uv":   n(keys[2], (Dv, D)),
        "w1k":  n(keys[3], (D, 1)),
        "w2k":  n(keys[4], (D, 1)),
        "w1v":  n(keys[5], (D, 1)),
        "w2v":  n(keys[6], (D, 1)),
        "wq":   n(keys[7], (D, D)),
        "wk":   n(keys[8], (D, D)),
        "wv":   n(keys[9], (D, D)),
        "bq":   n(keys[10], (1, D)),
        "bk":   n(keys[11], (1, D)),
        "bv":   n(keys[12], (1, D)),
        "wo":   n(keys[13], (D, D)),
        "bo":   n(keys[14], (1, D)),
        "wg_v": n(keys[15], (D, D)),
        "wg_t": n(jax.random.fold_in(key, 100), (D, D)),
        "bg":   n(jax.random.fold_in(key, 101), (1, D)),
        "ln_w": jnp.ones((1, D), jnp.float32),
        "ln_b": jnp.zeros((1, D), jnp.float32),
    }


if __name__ == "__main__":
    key = jax.random.PRNGKey(0)
    k_text, k_vis, k_params = jax.random.split(key, 3)

    text = jax.random.normal(
        k_text, (BATCH, SOURCE_MAX_LEN, DIM_MODEL), dtype=jnp.float32)
    visual = jax.random.normal(
        k_vis, (BATCH, VISUAL_MAX_LEN, VISUAL_DIM), dtype=jnp.float32)
    params = init_params(k_params, SOURCE_MAX_LEN, DIM_MODEL, VISUAL_DIM)

    out = jax.block_until_ready(maf_forward(text, visual, params))
    ref = jax.block_until_ready(maf_reference(text, visual, params))

    assert out.shape == (BATCH, SOURCE_MAX_LEN, DIM_MODEL)
    # bf16 MXU operands (f32 accumulation) + approx reciprocal -> ~1e-3 level
    assert jnp.allclose(out, ref, atol=5e-3, rtol=5e-3), "mismatch vs reference"
    print("KERNEL_OK")
</pallas_src>

<mosaic_0001>
module attributes {stable_mosaic.version = 11 : i64} {
  func.func @maf_kernel(%arg0: i32, %arg1: memref<1x128x128xf32, #tpu.memory_space<vmem>>, %arg2: memref<1x1x128xf32, #tpu.memory_space<vmem>>, %arg3: memref<128x1xf32, #tpu.memory_space<vmem>>, %arg4: memref<128x256xbf16, #tpu.memory_space<vmem>>, %arg5: memref<128x256xbf16, #tpu.memory_space<vmem>>, %arg6: memref<128x2xbf16, #tpu.memory_space<vmem>>, %arg7: memref<4x128x128xbf16, #tpu.memory_space<vmem>>, %arg8: memref<9x128xf32, #tpu.memory_space<vmem>>, %arg9: memref<1x128x128xf32, #tpu.memory_space<vmem>>) attributes {dimension_semantics = [#tpu.dimension_semantics<parallel>], iteration_bounds = array<i64: 2>, scalar_prefetch = 0 : i64, scratch_operands = 0 : i64, tpu.core_type = #tpu.core_type<tc>, window_params = [{transform_indices = @transform_0, window_bounds = array<i64: 1, 128, 128>}, {transform_indices = @transform_1, window_bounds = array<i64: 1, 1, 128>}, {pipeline_mode = #tpu.pipeline_mode<synchronous>, transform_indices = @transform_2, window_bounds = array<i64: 128, 1>}, {pipeline_mode = #tpu.pipeline_mode<synchronous>, transform_indices = @transform_3, window_bounds = array<i64: 128, 256>}, {pipeline_mode = #tpu.pipeline_mode<synchronous>, transform_indices = @transform_4, window_bounds = array<i64: 128, 256>}, {pipeline_mode = #tpu.pipeline_mode<synchronous>, transform_indices = @transform_5, window_bounds = array<i64: 128, 2>}, {pipeline_mode = #tpu.pipeline_mode<synchronous>, transform_indices = @transform_6, window_bounds = array<i64: 4, 128, 128>}, {pipeline_mode = #tpu.pipeline_mode<synchronous>, transform_indices = @transform_7, window_bounds = array<i64: 9, 128>}, {transform_indices = @transform_8, window_bounds = array<i64: 1, 128, 128>}]} {
    %c0 = arith.constant 0 : index
    %c0_0 = arith.constant 0 : index
    %c0_1 = arith.constant 0 : index
    %0 = vector.load %arg1[%c0, %c0_0, %c0_1] : memref<1x128x128xf32, #tpu.memory_space<vmem>>, vector<1x128x128xf32>
    %1 = vector.shape_cast %0 : vector<1x128x128xf32> to vector<128x128xf32>
    %2 = arith.truncf %1 : vector<128x128xf32> to vector<128x128xbf16>
    %c0_2 = arith.constant 0 : index
    %c0_3 = arith.constant 0 : index
    %c0_4 = arith.constant 0 : index
    %3 = vector.load %arg2[%c0_2, %c0_3, %c0_4] : memref<1x1x128xf32, #tpu.memory_space<vmem>>, vector<1x1x128xf32>
    %4 = vector.shape_cast %3 : vector<1x1x128xf32> to vector<1x128xf32>
    %5 = arith.truncf %4 : vector<1x128xf32> to vector<1x128xbf16>
    %c0_5 = arith.constant 0 : index
    %c0_6 = arith.constant 0 : index
    %6 = vector.load %arg3[%c0_5, %c0_6] : memref<128x1xf32, #tpu.memory_space<vmem>>, vector<128x1xf32>
    %c0_7 = arith.constant 0 : index
    %c0_8 = arith.constant 0 : index
    %7 = vector.load %arg8[%c0_7, %c0_8] : memref<9x128xf32, #tpu.memory_space<vmem>>, vector<9x128xf32>
    %8 = vector.extract_strided_slice %7 {offsets = [0, 0], sizes = [1, 128], strides = [1, 1]} : vector<9x128xf32> to vector<1x128xf32>
    %9 = vector.extract_strided_slice %7 {offsets = [1, 0], sizes = [1, 128], strides = [1, 1]} : vector<9x128xf32> to vector<1x128xf32>
    %10 = vector.extract_strided_slice %7 {offsets = [2, 0], sizes = [1, 128], strides = [1, 1]} : vector<9x128xf32> to vector<1x128xf32>
    %11 = vector.extract_strided_slice %7 {offsets = [3, 0], sizes = [1, 128], strides = [1, 1]} : vector<9x128xf32> to vector<1x128xf32>
    %12 = vector.extract_strided_slice %7 {offsets = [4, 0], sizes = [1, 128], strides = [1, 1]} : vector<9x128xf32> to vector<1x128xf32>
    %13 = vector.extract_strided_slice %7 {offsets = [5, 0], sizes = [1, 128], strides = [1, 1]} : vector<9x128xf32> to vector<1x128xf32>
    %14 = vector.extract_strided_slice %7 {offsets = [6, 0], sizes = [1, 128], strides = [1, 1]} : vector<9x128xf32> to vector<1x128xf32>
    %15 = vector.extract_strided_slice %7 {offsets = [7, 0], sizes = [1, 128], strides = [1, 1]} : vector<9x128xf32> to vector<1x128xf32>
    %16 = vector.extract_strided_slice %7 {offsets = [8, 0], sizes = [1, 128], strides = [1, 1]} : vector<9x128xf32> to vector<1x128xf32>
    %c0_9 = arith.constant 0 : index
    %c0_10 = arith.constant 0 : index
    %17 = vector.load %arg4[%c0_9, %c0_10] : memref<128x256xbf16, #tpu.memory_space<vmem>>, vector<128x256xbf16>
    %cst = arith.constant dense<0.000000e+00> : vector<1x256xf32>
    %18 = tpu.matmul %5, %17, %cst {dimension_numbers = #tpu.dot_dimension_numbers<[1], [0], [0], [1], [0, 0, 1, 1], [], []>} : vector<1x128xbf16>, vector<128x256xbf16>, vector<1x256xf32> -> vector<1x256xf32>
    %19 = vector.extract_strided_slice %18 {offsets = [0, 0], sizes = [1, 128], strides = [1, 1]} : vector<1x256xf32> to vector<1x128xf32>
    %20 = vector.extract_strided_slice %18 {offsets = [0, 128], sizes = [1, 128], strides = [1, 1]} : vector<1x256xf32> to vector<1x128xf32>
    %21 = arith.mulf %19, %15 : vector<1x128xf32>
    %cst_11 = arith.constant dense<0.000000e+00> : vector<1xf32>
    %22 = vector.multi_reduction <add>, %21, %cst_11 [1] : vector<1x128xf32> to vector<1xf32>
    %23 = vector.shape_cast %22 : vector<1xf32> to vector<1x1xf32>
    %24 = arith.mulf %20, %16 : vector<1x128xf32>
    %cst_12 = arith.constant dense<0.000000e+00> : vector<1xf32>
    %25 = vector.multi_reduction <add>, %24, %cst_12 [1] : vector<1x128xf32> to vector<1xf32>
    %26 = vector.shape_cast %25 : vector<1xf32> to vector<1x1xf32>
    %27 = vector.broadcast %6 : vector<128x1xf32> to vector<128x128xf32>
    %28 = vector.broadcast %19 : vector<1x128xf32> to vector<128x128xf32>
    %29 = arith.mulf %27, %28 : vector<128x128xf32>
    %30 = vector.broadcast %6 : vector<128x1xf32> to vector<128x128xf32>
    %31 = vector.broadcast %20 : vector<1x128xf32> to vector<128x128xf32>
    %32 = arith.mulf %30, %31 : vector<128x128xf32>
    %c0_13 = arith.constant 0 : index
    %c0_14 = arith.constant 0 : index
    %33 = vector.load %arg5[%c0_13, %c0_14] : memref<128x256xbf16, #tpu.memory_space<vmem>>, vector<128x256xbf16>
    %cst_15 = arith.constant dense<0.000000e+00> : vector<128x256xf32>
    %34 = tpu.matmul %2, %33, %cst_15 {dimension_numbers = #tpu.dot_dimension_numbers<[1], [0], [0], [1], [0, 0, 1, 1], [], []>} : vector<128x128xbf16>, vector<128x256xbf16>, vector<128x256xf32> -> vector<128x256xf32>
    %35 = vector.extract_strided_slice %34 {offsets = [0, 0], sizes = [128, 128], strides = [1, 1]} : vector<128x256xf32> to vector<128x128xf32>
    %36 = vector.broadcast %8 : vector<1x128xf32> to vector<128x128xf32>
    %37 = arith.addf %35, %36 : vector<128x128xf32>
    %38 = vector.extract_strided_slice %34 {offsets = [0, 128], sizes = [128, 128], strides = [1, 1]} : vector<128x256xf32> to vector<128x128xf32>
    %c0_16 = arith.constant 0 : index
    %c0_17 = arith.constant 0 : index
    %39 = vector.load %arg6[%c0_16, %c0_17] : memref<128x2xbf16, #tpu.memory_space<vmem>>, vector<128x2xbf16>
    %cst_18 = arith.constant dense<0.000000e+00> : vector<128x2xf32>
    %40 = tpu.matmul %2, %39, %cst_18 {dimension_numbers = #tpu.dot_dimension_numbers<[1], [0], [0], [1], [0, 0, 1, 1], [], []>} : vector<128x128xbf16>, vector<128x2xbf16>, vector<128x2xf32> -> vector<128x2xf32>
    %41 = vector.extract_strided_slice %40 {offsets = [0, 0], sizes = [128, 1], strides = [1, 1]} : vector<128x2xf32> to vector<128x1xf32>
    %42 = vector.broadcast %23 : vector<1x1xf32> to vector<128x1xf32>
    %43 = arith.mulf %6, %42 : vector<128x1xf32>
    %44 = arith.addf %41, %43 : vector<128x1xf32>
    %45 = arith.negf %44 : vector<128x1xf32>
    %46 = math.exp %45 : vector<128x1xf32>
    %cst_19 = arith.constant 1.000000e+00 : f32
    %47 = vector.broadcast %cst_19 : f32 to vector<128x1xf32>
    %48 = arith.addf %47, %46 : vector<128x1xf32>
    %49 = arith.divf %47, %48 : vector<128x1xf32>
    %50 = vector.extract_strided_slice %40 {offsets = [0, 1], sizes = [128, 1], strides = [1, 1]} : vector<128x2xf32> to vector<128x1xf32>
    %51 = vector.broadcast %26 : vector<1x1xf32> to vector<128x1xf32>
    %52 = arith.mulf %6, %51 : vector<128x1xf32>
    %53 = arith.addf %50, %52 : vector<128x1xf32>
    %54 = arith.negf %53 : vector<128x1xf32>
    %55 = math.exp %54 : vector<128x1xf32>
    %cst_20 = arith.constant 1.000000e+00 : f32
    %56 = vector.broadcast %cst_20 : f32 to vector<128x1xf32>
    %57 = arith.addf %56, %55 : vector<128x1xf32>
    %58 = arith.divf %56, %57 : vector<128x1xf32>
    %59 = arith.subf %29, %1 : vector<128x128xf32>
    %60 = vector.broadcast %49 : vector<128x1xf32> to vector<128x128xf32>
    %61 = arith.mulf %60, %59 : vector<128x128xf32>
    %62 = arith.addf %1, %61 : vector<128x128xf32>
    %63 = arith.subf %32, %1 : vector<128x128xf32>
    %64 = vector.broadcast %58 : vector<128x1xf32> to vector<128x128xf32>
    %65 = arith.mulf %64, %63 : vector<128x128xf32>
    %66 = arith.addf %1, %65 : vector<128x128xf32>
    %c0_21 = arith.constant 0 : index
    %c0_22 = arith.constant 0 : index
    %c0_23 = arith.constant 0 : index
    %67 = vector.load %arg7[%c0_21, %c0_22, %c0_23] : memref<4x128x128xbf16, #tpu.memory_space<vmem>>, vector<1x128x128xbf16>
    %68 = vector.shape_cast %67 : vector<1x128x128xbf16> to vector<128x128xbf16>
    %c1 = arith.constant 1 : index
    %c0_24 = arith.constant 0 : index
    %c0_25 = arith.constant 0 : index
    %69 = vector.load %arg7[%c1, %c0_24, %c0_25] : memref<4x128x128xbf16, #tpu.memory_space<vmem>>, vector<1x128x128xbf16>
    %70 = vector.shape_cast %69 : vector<1x128x128xbf16> to vector<128x128xbf16>
    %c2 = arith.constant 2 : index
    %c0_26 = arith.constant 0 : index
    %c0_27 = arith.constant 0 : index
    %71 = vector.load %arg7[%c2, %c0_26, %c0_27] : memref<4x128x128xbf16, #tpu.memory_space<vmem>>, vector<1x128x128xbf16>
    %72 = vector.shape_cast %71 : vector<1x128x128xbf16> to vector<128x128xbf16>
    %c3 = arith.constant 3 : index
    %c0_28 = arith.constant 0 : index
    %c0_29 = arith.constant 0 : index
    %73 = vector.load %arg7[%c3, %c0_28, %c0_29] : memref<4x128x128xbf16, #tpu.memory_space<vmem>>, vector<1x128x128xbf16>
    %74 = vector.shape_cast %73 : vector<1x128x128xbf16> to vector<128x128xbf16>
    %75 = arith.truncf %62 : vector<128x128xf32> to vector<128x128xbf16>
    %cst_30 = arith.constant dense<0.000000e+00> : vector<128x128xf32>
    %76 = tpu.matmul %75, %68, %cst_30 {dimension_numbers = #tpu.dot_dimension_numbers<[1], [0], [0], [1], [0, 0, 1, 1], [], []>} : vector<128x128xbf16>, vector<128x128xbf16>, vector<128x128xf32> -> vector<128x128xf32>
    %77 = vector.broadcast %9 : vector<1x128xf32> to vector<128x128xf32>
    %78 = arith.addf %76, %77 : vector<128x128xf32>
    %79 = arith.truncf %66 : vector<128x128xf32> to vector<128x128xbf16>
    %cst_31 = arith.constant dense<0.000000e+00> : vector<128x128xf32>
    %80 = tpu.matmul %79, %70, %cst_31 {dimension_numbers = #tpu.dot_dimension_numbers<[1], [0], [0], [1], [0, 0, 1, 1], [], []>} : vector<128x128xbf16>, vector<128x128xbf16>, vector<128x128xf32> -> vector<128x128xf32>
    %81 = vector.broadcast %10 : vector<1x128xf32> to vector<128x128xf32>
    %82 = arith.addf %80, %81 : vector<128x128xf32>
    %83 = arith.truncf %37 : vector<128x128xf32> to vector<128x128xbf16>
    %84 = arith.truncf %78 : vector<128x128xf32> to vector<128x128xbf16>
    %cst_32 = arith.constant dense<0.000000e+00> : vector<128x128xf32>
    %85 = tpu.matmul %83, %84, %cst_32 {dimension_numbers = #tpu.dot_dimension_numbers<[1], [1], [0], [0], [0, 0, 1, 0], [], []>} : vector<128x128xbf16>, vector<128x128xbf16>, vector<128x128xf32> -> vector<128x128xf32>
    %cst_33 = arith.constant 0.0883883461 : f32
    %86 = vector.broadcast %cst_33 : f32 to vector<128x128xf32>
    %87 = arith.mulf %85, %86 : vector<128x128xf32>
    %cst_34 = arith.constant dense<0xFF800000> : vector<128xf32>
    %88 = vector.multi_reduction <maximumf>, %87, %cst_34 [1] : vector<128x128xf32> to vector<128xf32>
    %89 = vector.shape_cast %88 : vector<128xf32> to vector<128x1xf32>
    %90 = vector.broadcast %89 : vector<128x1xf32> to vector<128x128xf32>
    %91 = arith.subf %87, %90 : vector<128x128xf32>
    %92 = math.exp %91 : vector<128x128xf32>
    %cst_35 = arith.constant dense<0.000000e+00> : vector<128xf32>
    %93 = vector.multi_reduction <add>, %92, %cst_35 [1] : vector<128x128xf32> to vector<128xf32>
    %94 = vector.shape_cast %93 : vector<128xf32> to vector<128x1xf32>
    %95 = arith.truncf %92 : vector<128x128xf32> to vector<128x128xbf16>
    %96 = arith.truncf %82 : vector<128x128xf32> to vector<128x128xbf16>
    %cst_36 = arith.constant dense<0.000000e+00> : vector<128x128xf32>
    %97 = tpu.matmul %95, %96, %cst_36 {dimension_numbers = #tpu.dot_dimension_numbers<[1], [0], [0], [1], [0, 0, 1, 1], [], []>} : vector<128x128xbf16>, vector<128x128xbf16>, vector<128x128xf32> -> vector<128x128xf32>
    %98 = tpu.reciprocal %94 {approx = true} : vector<128x1xf32> -> vector<128x1xf32>
    %99 = vector.broadcast %98 : vector<128x1xf32> to vector<128x128xf32>
    %100 = arith.mulf %97, %99 : vector<128x128xf32>
    %101 = arith.truncf %100 : vector<128x128xf32> to vector<128x128xbf16>
    %cst_37 = arith.constant dense<0.000000e+00> : vector<128x128xf32>
    %102 = tpu.matmul %101, %72, %cst_37 {dimension_numbers = #tpu.dot_dimension_numbers<[1], [0], [0], [1], [0, 0, 1, 1], [], []>} : vector<128x128xbf16>, vector<128x128xbf16>, vector<128x128xf32> -> vector<128x128xf32>
    %103 = vector.broadcast %11 : vector<1x128xf32> to vector<128x128xf32>
    %104 = arith.addf %102, %103 : vector<128x128xf32>
    %105 = arith.truncf %104 : vector<128x128xf32> to vector<128x128xbf16>
    %cst_38 = arith.constant dense<0.000000e+00> : vector<128x128xf32>
    %106 = tpu.matmul %105, %74, %cst_38 {dimension_numbers = #tpu.dot_dimension_numbers<[1], [0], [0], [1], [0, 0, 1, 1], [], []>} : vector<128x128xbf16>, vector<128x128xbf16>, vector<128x128xf32> -> vector<128x128xf32>
    %107 = arith.addf %106, %38 : vector<128x128xf32>
    %108 = vector.broadcast %12 : vector<1x128xf32> to vector<128x128xf32>
    %109 = arith.addf %107, %108 : vector<128x128xf32>
    %110 = arith.negf %109 : vector<128x128xf32>
    %111 = math.exp %110 : vector<128x128xf32>
    %cst_39 = arith.constant 1.000000e+00 : f32
    %112 = vector.broadcast %cst_39 : f32 to vector<128x128xf32>
    %113 = arith.addf %112, %111 : vector<128x128xf32>
    %114 = arith.divf %112, %113 : vector<128x128xf32>
    %115 = arith.mulf %114, %104 : vector<128x128xf32>
    %116 = arith.addf %1, %115 : vector<128x128xf32>
    %cst_40 = arith.constant dense<0.000000e+00> : vector<128xf32>
    %117 = vector.multi_reduction <add>, %116, %cst_40 [1] : vector<128x128xf32> to vector<128xf32>
    %118 = vector.shape_cast %117 : vector<128xf32> to vector<128x1xf32>
    %cst_41 = arith.constant 1.280000e+02 : f32
    %119 = vector.broadcast %cst_41 : f32 to vector<128x1xf32>
    %120 = arith.divf %118, %119 : vector<128x1xf32>
    %121 = vector.broadcast %120 : vector<128x1xf32> to vector<128x128xf32>
    %122 = arith.subf %116, %121 : vector<128x128xf32>
    %123 = arith.mulf %122, %122 : vector<128x128xf32>
    %cst_42 = arith.constant dense<0.000000e+00> : vector<128xf32>
    %124 = vector.multi_reduction <add>, %123, %cst_42 [1] : vector<128x128xf32> to vector<128xf32>
    %125 = vector.shape_cast %124 : vector<128xf32> to vector<128x1xf32>
    %cst_43 = arith.constant 1.280000e+02 : f32
    %126 = vector.broadcast %cst_43 : f32 to vector<128x1xf32>
    %127 = arith.divf %125, %126 : vector<128x1xf32>
    %cst_44 = arith.constant 9.99999974E-6 : f32
    %128 = vector.broadcast %cst_44 : f32 to vector<128x1xf32>
    %129 = arith.addf %127, %128 : vector<128x1xf32>
    %130 = math.rsqrt %129 : vector<128x1xf32>
    %131 = vector.broadcast %130 : vector<128x1xf32> to vector<128x128xf32>
    %132 = arith.mulf %122, %131 : vector<128x128xf32>
    %133 = vector.broadcast %13 : vector<1x128xf32> to vector<128x128xf32>
    %134 = arith.mulf %132, %133 : vector<128x128xf32>
    %135 = vector.broadcast %14 : vector<1x128xf32> to vector<128x128xf32>
    %136 = arith.addf %134, %135 : vector<128x128xf32>
    %c0_45 = arith.constant 0 : index
    %c0_46 = arith.constant 0 : index
    %c0_47 = arith.constant 0 : index
    %137 = vector.load %arg9[%c0_45, %c0_46, %c0_47] : memref<1x128x128xf32, #tpu.memory_space<vmem>>, vector<1x128x128xf32>
    %138 = vector.shape_cast %137 : vector<1x128x128xf32> to vector<128x128xf32>
    %139 = vector.shape_cast %136 : vector<128x128xf32> to vector<1x128x128xf32>
    tpu.vector_store %arg9[%c0_45, %c0_46, %c0_47], %139 {strides = array<i32>} : memref<1x128x128xf32, #tpu.memory_space<vmem>>, vector<1x128x128xf32>,
    return
  }
  func.func @transform_0(%arg0: i32) -> (i32, i32, i32) {
    %c0_i32 = arith.constant 0 : i32
    %c0_i32_0 = arith.constant 0 : i32
    %c0_i32_1 = arith.constant 0 : i32
    return %arg0, %c0_i32, %c0_i32_0 : i32, i32, i32
  }
  func.func @transform_1(%arg0: i32) -> (i32, i32, i32) {
    %c0_i32 = arith.constant 0 : i32
    %c0_i32_0 = arith.constant 0 : i32
    %c0_i32_1 = arith.constant 0 : i32
    return %arg0, %c0_i32, %c0_i32_0 : i32, i32, i32
  }
  func.func @transform_2(%arg0: i32) -> (i32, i32) {
    %c0_i32 = arith.constant 0 : i32
    %c0_i32_0 = arith.constant 0 : i32
    %c0_i32_1 = arith.constant 0 : i32
    return %c0_i32, %c0_i32_0 : i32, i32
  }
  func.func @transform_3(%arg0: i32) -> (i32, i32) {
    %c0_i32 = arith.constant 0 : i32
    %c0_i32_0 = arith.constant 0 : i32
    %c0_i32_1 = arith.constant 0 : i32
    return %c0_i32, %c0_i32_0 : i32, i32
  }
  func.func @transform_4(%arg0: i32) -> (i32, i32) {
    %c0_i32 = arith.constant 0 : i32
    %c0_i32_0 = arith.constant 0 : i32
    %c0_i32_1 = arith.constant 0 : i32
    return %c0_i32, %c0_i32_0 : i32, i32
  }
  func.func @transform_5(%arg0: i32) -> (i32, i32) {
    %c0_i32 = arith.constant 0 : i32
    %c0_i32_0 = arith.constant 0 : i32
    %c0_i32_1 = arith.constant 0 : i32
    return %c0_i32, %c0_i32_0 : i32, i32
  }
  func.func @transform_6(%arg0: i32) -> (i32, i32, i32) {
    %c0_i32 = arith.constant 0 : i32
    %c0_i32_0 = arith.constant 0 : i32
    %c0_i32_1 = arith.constant 0 : i32
    %c0_i32_2 = arith.constant 0 : i32
    return %c0_i32, %c0_i32_0, %c0_i32_1 : i32, i32, i32
  }
  func.func @transform_7(%arg0: i32) -> (i32, i32) {
    %c0_i32 = arith.constant 0 : i32
    %c0_i32_0 = arith.constant 0 : i32
    %c0_i32_1 = arith.constant 0 : i32
    return %c0_i32, %c0_i32_0 : i32, i32
  }
  func.func @transform_8(%arg0: i32) -> (i32, i32, i32) {
    %c0_i32 = arith.constant 0 : i32
    %c0_i32_0 = arith.constant 0 : i32
    %c0_i32_1 = arith.constant 0 : i32
    return %arg0, %c0_i32, %c0_i32_0 : i32, i32, i32
  }
}

</mosaic_0001>

<bundles_post_ra>
// kernel: tpu_custom_call.1
= control target key start
LH: loop header
LB: loop body
LE: loop exit
PB: predicated region body
PF: predicated region fallthrough
CT: control target
= control target key end

     0   :  { %s5774_s0 = inlined_call_operand.hbm [shape: f32[2,128,128], index: 0, kind: input, shape index: {}]   ;;  %s5775_s1 = inlined_call_operand.vmem [shape: f32[2,1,128], index: 1, kind: input, shape index: {}]   ;;  %s5776_s2 = inlined_call_operand.vmem [shape: f32[128,1], index: 2, kind: input, shape index: {}]   ;;  %s5777_s3 = inlined_call_operand.vmem [shape: bf16[128,256], index: 3, kind: input, shape index: {}]   ;;  %s5778_s4 = inlined_call_operand.hbm [shape: bf16[128,256], index: 4, kind: input, shape index: {}]   ;;  %s5779_s5 = inlined_call_operand.vmem [shape: bf16[128,2], index: 5, kind: input, shape index: {}]   ;;  %s5780_s6 = inlined_call_operand.hbm [shape: bf16[4,128,128], index: 6, kind: input, shape index: {}]   ;;  %s5781_s7 = inlined_call_operand.vmem [shape: f32[9,128], index: 7, kind: input, shape index: {}]   ;;  %s5782_s8 = inlined_call_operand.hbm [shape: f32[2,128,128], index: 8, kind: output, shape index: {}]  }
   0x1   :  { %5813 = sst [smem:[#allocation28_spill]] %s5778_s4 }
   0x2   :  { %5814 = sst [smem:[#allocation29_spill]] %s5780_s6 }
   0x3   :  { %13 = vsyncpa [#allocation3], 0 }
   0x4   :  { %15 = vsyncpa [#allocation3 + $0x1], 0 }
   0x5   :  { %16 = vsyncpa [#allocation6], 0 }
   0x6   :  { %17 = vsyncpa [#allocation4], 0 }
   0x7   :  { %19 = vsyncpa [#allocation4 + $0x1], 0  ;;  %s4426_s27 = smov 0   ;;  %s4428_s28 = smov 0  }
   0x8   :  { %s4430_s29 = smov 0   ;;  %s4432_s30 = smov 0  }
   0x9 LB: > { %s4447_s9 = sadd.s32 4294967295, %s4366_s30   ;;  %s3228_s10 = sadd.s32 4294967294, %s4366_s30   ;;  %s4366_s30 = sphi %s4432_s30, %s5868_s30   ;;  %s4362_s29 = sphi %s4430_s29, %s5867_s29   ;;  %s4358_s28 = sphi %s4428_s28, %s5866_s28   ;;  %s4354_s27 = sphi %s4426_s27, %s5865_s27  }
   0xa   : > { %p45_p0 = scmp.ne.s32.totalorder %s4358_s28, %s4354_s27  ;;  %p5785_p1 = scmp.eq.s32.totalorder %s4447_s9, 0 }
   0xb   : > { %p221_p2 = scmp.eq.s32.totalorder %s4447_s9, 1  ;;  %p227_p3 = scmp.eq.s32.totalorder %s3228_s10, 1 }
   0xc   : > { %p4456_p4 = por %p5785_p1, %p45_p0  ;;  %p3229_p5 = scmp.ge.s32.totalorder %s4366_s30, 1 }
   0xd   : > { %p4461_p6 = por %p227_p3, %p45_p0  ;;  %p234_p7 = scmp.lt.s32.totalorder %s4366_s30, 3 }
   0xe   : > { %s5815_s11 = scalar_select %p4456_p4, 1, 0 }
   0xf   : > { %s5816_s12 = scalar_select %p4461_p6, 1, 0 }
  0x10   : > { %p4466_p8 = pnand %p3229_p5, %p234_p7  ;;  %s4368_s14 = smov [#allocation5]  }
  0x11   : > { %s252_s15 = sshll.u32 %s4368_s14, 4  ;;  %s4369_s17 = smov [#allocation7]   ;;  %s253_s15 = int_to_ptr.vmem [resolvable:$true] %s252_s15 }
  0x12   : > { %s5817_s13 = scalar_select %p4466_p8, 1, 0 }
  0x13   : > { %p3732_p9 = pneg %p4466_p8  ;;  %s268_s18 = sshll.u32 %s4369_s17, 4  ;;  %s269_s18 = int_to_ptr.vmem [resolvable:$true] %s268_s18 }
  0x14   : > { %s4229_s19 = scalar_lea.vmem %s253_s15, 2048  ;;  %p4237_p5 = scmp.lt.s32.totalorder %s253_s15, %s253_s15 }
  0x15   : > { %p4475_p11 = pnand %p3732_p9, %p5785_p1  ;;  %p4230_p13 = scmp.ne.s32.totalorder %s253_s15, %s4229_s19 }
  0x16   : > { %p4238_p7 = scmp.lt.s32.totalorder %s4229_s19, %s4229_s19 }
  0x17   : > { %p4220_p12 = pneg %p4475_p11 }
  0x18   : > { %p4239_p10 = por %p4238_p7, %p4237_p5 }
  0x19   : > { %p4232_p0 = pnand %p4230_p13, %p4220_p12 }
  0x1b   : > { %p4233_p3 = pneg %p4232_p0 }
  0x1d   : > { %p4240_p9 = pnand %p4239_p10, %p4233_p3 }
  0x1f   : > { %4243 = shalt.err (!%p4240_p9)
}
  0x20   : > { %s5783_s20 = smov 128   ;;  %s5784_s21 = smov 8  }
  0x21   : > { %s5819_s4 = sld [smem:[#allocation28_spill]]  ;;  %s4255_s24 = scalar_lea.vmem %s269_s18, 4096 }
  0x22   : > { %p4256_p13 = scmp.ne.s32.totalorder %s269_s18, %s4255_s24  ;;  %p4263_p10 = scmp.lt.s32.totalorder %s269_s18, %s269_s18 }
  0x23   : > { %p4264_p3 = scmp.lt.s32.totalorder %s4255_s24, %s4255_s24 }
  0x24   : > { %p4258_p0 = pnand %p4256_p13, %p4220_p12 }
  0x25   : > { %p4265_p7 = por %p4264_p3, %p4263_p10 }
  0x26   : > { %p4259_p5 = pneg %p4258_p0 }
  0x27   : > { %3735 = dma.hbm_to_vmem [thread:$0]  (!%p4475_p11), %s5819_s4, 2048, %s253_s15, [#allocation6], %s5783_s20, %s5783_s20, %s5784_s21  }
  0x28   : > { %p4266_p9 = pnand %p4265_p7, %p4259_p5 }
  0x2a   : > { %4269 = shalt.err (!%p4266_p9)
}
  0x2b   : > { %s4372_s25 = smov 64   ;;  %s4373_s26 = smov 4  }
  0x2c   : > { %s5820_s6 = sld [smem:[#allocation29_spill]]  ;;  %s4501_s15 = sadd.s32 1, %s4366_s30  }
  0x2d   : > { %s29_s17 = ssub.s32 %s4366_s30, %s4501_s15  ;;  %s32_s19 = sadd.s32 1, %s4362_s29 }
  0x2e   : > { %p30_p12 = scmp.eq.s32.totalorder %s29_s17, 0  ;;  %p39_p13 = scmp.ne.s32.totalorder %s4362_s29, %s4358_s28 }
  0x2f   : > { %p40_p0 = scmp.eq.s32.totalorder %s4366_s30, 0  ;;  %p3749_p3 = scmp.lt.s32.totalorder %s4366_s30, 2 }
  0x30   : > { %s4510_s22 = scalar_select %p30_p12, %s4362_s29, %s32_s19  }
  0x31   : > { %p41_p5 = por %p40_p0, %p39_p13  ;;  %p4514_p10 = por %p221_p2, %p39_p13 }
  0x32   : > { %3738 = dma.hbm_to_vmem [thread:$0]  (!%p4475_p11), %s5820_s6, 4096, %s269_s18, [#allocation6], %s4372_s25, %s4372_s25, %s4373_s26  }
  0x33   : > { %s5821_s23 = scalar_select %p4514_p10, 1, 0 }
  0x34   : > { %s285_s16 = sand.u32 1, %s4362_s29   ;;  %s3366_s18 = sshll.u32 %s4366_s30, 11 }
  0x35   : > { %s3233_s24 = sshll.u32 %s285_s16, 7  ;;  %s4524_s10 = scalar_lea.hbm %s5774_s0, %s3366_s18 }
  0x36   : > { %s289_s14 = scalar_lea.vmem [#allocation2], %s3233_s24  ;;  %p4528_p2 = pnand %p3749_p3, %p41_p5 }
  0x37   : > { %s296_s17 = sshll.u32 %s289_s14, 4  ;;  %s4532_s20 = scalar_lea.sflag [#allocation3], %s285_s16  ;;  %s4526_s17 = int_to_ptr.vmem [resolvable:$true] %s296_s17 }
  0x38   : > { %s4270_s21 = scalar_lea.hbm %s4524_s10, 2048  ;;  %p4272_p7 = pneg %p4528_p2 }
  0x39   : > { %p4271_p11 = scmp.ne.s32.totalorder %s4524_s10, %s4270_s21  ;;  %s4275_s24 = scalar_lea.hbm %s5774_s0, 4096 }
  0x3a   : > { %p4276_p13 = scmp.lt.s32.totalorder %s4524_s10, %s5774_s0  ;;  %p4277_p0 = scmp.lt.s32.totalorder %s4275_s24, %s4270_s21 }
  0x3b   : > { %p4273_p9 = pnand %p4272_p7, %p4271_p11 }
  0x3c   : > { %p4278_p5 = por %p4277_p0, %p4276_p13 }
  0x3d   : > { %p4274_p12 = pneg %p4273_p9 }
  0x3f   : > { %p4279_p3 = pnand %p4278_p5, %p4274_p12 }
  0x41   : > { %4282 = shalt.err (!%p4279_p3)
}
  0x42   : > { %s4283_s16 = scalar_lea.vmem %s4526_s17, 2048  ;;  %s4374_s4 = smov [#allocation2]  }
  0x43   : > { %p4284_p1 = scmp.ne.s32.totalorder %s4526_s17, %s4283_s16  ;;  %s4288_s6 = sshll.u32 %s4374_s4, 4  ;;  %s4289_s6 = int_to_ptr.vmem [resolvable:$false] %s4288_s6 }
  0x44   : > { %s4290_s18 = scalar_lea.vmem %s4289_s6, 4096  ;;  %p4291_p9 = scmp.lt.s32.totalorder %s4526_s17, %s4289_s6 }
  0x45   : > { %p4286_p6 = pnand %p4284_p1, %p4272_p7  ;;  %p4292_p10 = scmp.lt.s32.totalorder %s4290_s18, %s4283_s16 }
  0x47   : > { %p4287_p11 = pneg %p4286_p6  ;;  %p4293_p4 = por %p4292_p10, %p4291_p9 }
  0x49   : > { %p4294_p8 = pnand %p4293_p4, %p4287_p11 }
  0x4b   : > { %4297 = shalt.err (!%p4294_p8)
}
  0x4c   : > { %s5823_s21 = smov 8   ;;  %s5824_s25 = smov 128  }
  0x4d   : > { %3742 = dma.hbm_to_vmem [thread:$0]  (!%p4528_p2), %s4524_s10, 2048, %s4526_s17, %s4532_s20, %s5824_s25, %s5824_s25, %s5823_s21  }
  0x4e   : > { %p5825_p1 = scmp.ne.s32.totalorder %s5817_s13, 0 }
  0x50   : > { %314 = sbr.rel (%p5825_p1) target bundleno = 2289 (0x8f1), region = 52 }
  0x55   : > { %s4559_s4 = sand.u32 1, %s4358_s28   ;;  %p5826_p4 = scmp.ne.s32.totalorder %s5815_s11, 0 }
  0x56   : > { %s3237_s6 = sshll.u32 %s4559_s4, 7  ;;  %s317_s24 = scalar_lea.sflag [#allocation3], %s4559_s4 }
  0x57   : > { %s4565_s19 = scalar_lea.vmem [#allocation2], %s3237_s6 }
  0x58   : > { %4341 = dma.done.wait (%p5826_p4), %s317_s24, 2048  }
  0x59   : > { %4343 = vsyncadd (%p5826_p4), %s317_s24, 4294965248  ;;  %p5827_p6 = scmp.eq.s32.totalorder %s4447_s9, 0 }
  0x5b   : > { %4345 = dma.done.wait (%p5827_p6), [#allocation6], 6144   ;;  %p5828_p8 = pmov %p5827_p6 }
  0x5c   : > { %v5789_v0 = vmov 0   ;;  %v3800_v1 = vld [vmem:[%s5777_s3 + $0x74] ss:$8 sps:$4 sm:$0xff]   ;;  %v3802_v2 = vld [vmem:[%s5777_s3 + $0x70] ss:$8 sps:$4 sm:$0xff]   ;;  %v4606_v9 = vld [vmem:[%s5776_s2 + $0x8] sm:$0xff] }
  0x5d   : > { %4347 = vsyncadd (%p5828_p8), [#allocation6], 4294961152  ;;  %540 = vmatprep.mubr.bf16.mxu0 %v5789_v0  ;;  %3797 = vset.pattern.permute.xlu1 %v5789_v0  ;;  %v3803_v3 = vld [vmem:[%s5777_s3 + $0x64] ss:$8 sps:$4 sm:$0xff]   ;;  %v3805_v4 = vld [vmem:[%s5777_s3 + $0x60] ss:$8 sps:$4 sm:$0xff]  }
  0x5e   : > { %3796 = vset.pattern.permute.xlu0 %v5789_v0  ;;  %809 = vmatprep.mubr.bf16.mxu1 %v5789_v0  ;;  %v3806_v5 = vld [vmem:[%s5777_s3 + $0x54] ss:$8 sps:$4 sm:$0xff]   ;;  %v3808_v6 = vld [vmem:[%s5777_s3 + $0x50] ss:$8 sps:$4 sm:$0xff]   ;;  %v3809_v7 = vld [vmem:[%s5777_s3 + $0x44] ss:$8 sps:$4 sm:$0xff]  }
  0x5f   : > { %508 = vmatprep.subr.bf16.mxu0 %v3800_v1  ;;  %v3811_v8 = vld [vmem:[%s5777_s3 + $0x40] ss:$8 sps:$4 sm:$0xff]   ;;  %v3812_v10 = vld [vmem:[%s5777_s3 + $0x34] ss:$8 sps:$4 sm:$0xff]   ;;  %568 = vperm.xlu1 %3797, %v4606_v9   ;;  %p364_p10 = scmp.lt.s32.totalorder %s4447_s9, 1  ;;  %vm553_vm0 = vcmask 1040384  }
  0x60   : > { %509 = vmatpush1.bf16.msra.mxu0 %v3802_v2  ;;  %v4615_v11 = vld [vmem:[%s5776_s2 + $0x10] sm:$0xff]  ;;  %v3815_v13 = vld [vmem:[%s5777_s3 + $0x24] ss:$8 sps:$4 sm:$0xff]   ;;  %v4628_v14 = vld [vmem:[%s5776_s2 + $0x18] sm:$0xff]  ;;  %s4376_s26 = smov 1   ;;  %s5663_s13 = scalar_lea.vmem [#allocation8], %s3237_s6 }
  0x61   : > { %510 = vmatprep.subr.bf16.mxu0 %v3803_v3  ;;  %v3814_v12 = vld [vmem:[%s5777_s3 + $0x30] ss:$8 sps:$4 sm:$0xff]   ;;  %s365_s17 = scalar_select %p364_p10, %s4447_s9, 1  ;;  %v3817_v15 = vld [vmem:[%s5777_s3 + $0x20] ss:$8 sps:$4 sm:$0xff]  }
  0x62   : > { %v3818_v16 = vld [vmem:[%s5777_s3 + $0x14] ss:$8 sps:$4 sm:$0xff]   ;;  %v4641_v17 = vld [vmem:[%s5776_s2 + $0x20] sm:$0xff]  ;;  %v3820_v18 = vld [vmem:[%s5777_s3 + $0x10] ss:$8 sps:$4 sm:$0xff]   ;;  %s3367_s6 = sshll.u32 %s4447_s9, 11 }
  0x63   : > { %573 = vperm.xlu1 %3797, %v4615_v11   ;;  %s366_s10 = scalar_lea.vmem %s5775_s1, %s365_s17  ;;  %v3821_v19 = vld [vmem:[%s5777_s3 + $0x4] ss:$8 sps:$4 sm:$0xff]   ;;  %v3823_v21 = vld [vmem:[%s5777_s3] ss:$8 sps:$4 sm:$0xff]   ;;  %v4664_v23 = vld [vmem:[%s5776_s2 + $0x30] sm:$0xff]  ;;  %s3127_s20 = sshll.u32 %s5663_s13, 4  ;;  %s5729_s20 = int_to_ptr.vmem [resolvable:$true] %s3127_s20 }
  0x64   : > { %511 = vmatpush1.bf16.msra.mxu0 %v3805_v4  ;;  %v4656_v20 = vld [vmem:[%s5776_s2 + $0x28] sm:$0xff]  ;;  %v392_v22 = vld [vmem:[%s366_s10] sm:$0x1]  ;;  %v3824_v24 = vld [vmem:[%s5779_s5 + $0x38] sm:$0xff]   ;;  %s5727_s14 = scalar_lea.hbm %s5782_s8, %s3367_s6  ;;  %s3114_s9 = scalar_lea.sflag [#allocation4], %s4559_s4 }
  0x65   : > { %512 = vmatprep.subr.bf16.mxu0 %v3806_v5  ;;  %v4670_v25 = vld [vmem:[%s4565_s19] sm:$0xff]  ;;  %v4673_v26 = vld [vmem:[%s4565_s19 + $0x8] sm:$0xff]  ;;  %v393_v27 = vpack.c.bf16 %v392_v22, %v392_v22  ;;  %v3825_v28 = vld [vmem:[%s5779_s5 + $0x30] sm:$0xff]   ;;  %s4298_s16 = scalar_lea.vmem %s5729_s20, 2048  ;;  %p5862_p7 = scmp.ne.s32.totalorder %s5821_s23, 0 }
  0x66   : > { %v4682_v29 = vld [vmem:[%s5776_s2 + $0x38] sm:$0xff]  ;;  %v4686_v30 = vpack.c.bf16 %v4673_v26, %v4670_v25  ;;  %v3826_v31 = vld [vmem:[%s5779_s5 + $0x28] sm:$0xff]   ;;  %v4695_v32 = vld [vmem:[%s5776_s2 + $0x40] sm:$0xff]  ;;  %p4299_p2 = scmp.ne.s32.totalorder %s5729_s20, %s4298_s16  ;;  %s4378_s18 = smov [#allocation8]  }
  0x67   : > { %578 = vperm.xlu1 %3797, %v4628_v14   ;;  %v3827_v33 = vld [vmem:[%s5779_s5 + $0x20] sm:$0xff]   ;;  %v4705_v34 = vld [vmem:[%s5776_s2 + $0x50] sm:$0xff]  ;;  %v3828_v35 = vld [vmem:[%s5779_s5 + $0x18] sm:$0xff]   ;;  %s4302_s21 = sshll.u32 %s4378_s18, 4  ;;  %s4303_s21 = int_to_ptr.vmem [resolvable:$false] %s4302_s21 }
  0x68   : > { %513 = vmatpush1.bf16.msra.mxu0 %v3808_v6  ;;  %v4714_v36 = vld [vmem:[%s5776_s2 + $0x60] sm:$0xff]  ;;  %v3829_v37 = vld [vmem:[%s5779_s5 + $0x10] sm:$0xff]   ;;  %v3830_v39 = vld [vmem:[%s5779_s5 + $0x8] sm:$0xff]   ;;  %p4300_p12 = pnand %p4299_p2, %p5862_p7  ;;  %s4304_s25 = scalar_lea.vmem %s4303_s21, 4096 }
  0x69   : > { %514 = vmatprep.subr.bf16.mxu0 %v3809_v7  ;;  %v4723_v38 = vld [vmem:[%s5776_s2 + $0x70] sm:$0xff]  ;;  %v3831_v40 = vld [vmem:[%s5779_s5] sm:$0xff]   ;;  %v4737_v42 = vld [vmem:[%s4565_s19 + $0x18] sm:$0xff]  ;;  %p4305_p0 = scmp.lt.s32.totalorder %s5729_s20, %s4303_s21  ;;  %p4306_p5 = scmp.lt.s32.totalorder %s4304_s25, %s4298_s16 }
  0x6a   : > { %v4734_v41 = vld [vmem:[%s4565_s19 + $0x10] sm:$0xff]  ;;  %v4740_v43 = vld [vmem:[%s4565_s19 + $0x20] sm:$0xff]  ;;  %v4743_v44 = vld [vmem:[%s4565_s19 + $0x28] sm:$0xff]  ;;  %p4301_p13 = pneg %p4300_p12 }
  0x6b   : > { %583 = vperm.xlu1 %3797, %v4641_v17   ;;  %v4747_v45 = vpack.c.bf16 %v4737_v42, %v4734_v41  ;;  %v4751_v46 = vpack.c.bf16 %v4743_v44, %v4740_v43  ;;  %v4756_v47 = vld [vmem:[%s4565_s19 + $0x30] sm:$0xff]  ;;  %v4759_v48 = vld [vmem:[%s4565_s19 + $0x38] sm:$0xff]  ;;  %v4762_v49 = vld [vmem:[%s4565_s19 + $0x40] sm:$0xff]  ;;  %p4307_p3 = por %p4306_p5, %p4305_p0 }
  0x6c   : > { %515 = vmatpush1.bf16.msra.mxu0 %v3811_v8  ;;  %v4765_v50 = vld [vmem:[%s4565_s19 + $0x48] sm:$0xff]  ;;  %v4769_v51 = vpack.c.bf16 %v4759_v48, %v4756_v47  ;;  %v4778_v53 = vld [vmem:[%s4565_s19 + $0x50] sm:$0xff]  ;;  %v4781_v54 = vld [vmem:[%s4565_s19 + $0x58] sm:$0xff] }
  0x6d   : > { %516 = vmatprep.subr.bf16.mxu0 %v3812_v10  ;;  %v4773_v52 = vpack.c.bf16 %v4765_v50, %v4762_v49  ;;  %v4784_v55 = vld [vmem:[%s4565_s19 + $0x60] sm:$0xff]  ;;  %v4787_v56 = vld [vmem:[%s4565_s19 + $0x68] sm:$0xff]  ;;  %v4791_v57 = vpack.c.bf16 %v4781_v54, %v4778_v53  ;;  %v4800_v59 = vld [vmem:[%s4565_s19 + $0x70] sm:$0xff]  ;;  %p4308_p11 = pnand %p4307_p3, %p4301_p13 }
  0x6e   : > { %5829 = vst [vmem:[#allocation12_spill] sm:$0xff] %v4784_v55  ;;  %5830 = vst [vmem:[#allocation13_spill] sm:$0xff] %v4787_v56  ;;  %v4795_v58 = vpack.c.bf16 %v4787_v56, %v4784_v55  ;;  %v4803_v60 = vld [vmem:[%s4565_s19 + $0x78] sm:$0xff]  ;;  %v4813_v62 = vld [vmem:[%s5781_s7] sm:$0xff] }
  0x6f   : > { %588 = vperm.xlu1 %3797, %v4656_v20   ;;  %5831 = vst [vmem:[#allocation14_spill] sm:$0xff] %v4800_v59  ;;  %5832 = vst [vmem:[#allocation15_spill] sm:$0xff] %v4803_v60  ;;  %v4807_v61 = vpack.c.bf16 %v4803_v60, %v4800_v59  ;;  %v550_v63 = vrot.slane %v4813_v62, 7  ;;  %v411_v2 = vld [vmem:[%s5781_s7 + $0x8] sm:$0x1] }
  0x70   : > { %517 = vmatpush1.bf16.msra.mxu0 %v3814_v12  ;;  %5833 = vst [vmem:[#allocation16_spill] sm:$0xff] %v4813_v62  ;;  %v4830_v12 = vld [vmem:[%s5776_s2] sm:$0xff] }
  0x71   : > { %518 = vmatprep.subr.bf16.mxu0 %v3815_v13  ;;  %5835 = vst [vmem:[#allocation18_spill] sm:$0xff] %v4830_v12  ;;  %v4836_v13 = vld [vmem:[%s5776_s2 + $0x48] sm:$0xff] }
  0x73   : > { %593 = vperm.xlu1 %3797, %v4664_v23  }
  0x74   : > { %519 = vmatpush1.bf16.msra.mxu0 %v3817_v15  ;;  %v4842_v15 = vld [vmem:[%s5776_s2 + $0x58] sm:$0xff] }
  0x75   : > { %520 = vmatprep.subr.bf16.mxu0 %v3818_v16  ;;  %v4848_v16 = vld [vmem:[%s5776_s2 + $0x68] sm:$0xff] }
  0x77   : > { %598 = vperm.xlu1 %3797, %v4682_v29  }
  0x78   : > { %521 = vmatpush1.bf16.msra.mxu0 %v3820_v18  ;;  %v4854_v18 = vld [vmem:[%s5776_s2 + $0x78] sm:$0xff] }
  0x79   : > { %522 = vmatprep.subr.bf16.mxu0 %v3821_v19 }
  0x7b   : > { %603 = vperm.xlu1 %3797, %v4695_v32  }
  0x7c   : > { %523 = vmatpush1.bf16.msra.mxu0 %v3823_v21 }
  0x7d   : > { %3480 = vmatprep.subr.bf16.mxu0 %v3824_v24 }
  0x7f   : > { %541 = vmatmul.mubr.bf16.vlgmr.msra.gmra.mxu0 %v393_v27  ;;  %613 = vperm.xlu1 %3797, %v4705_v34  }
  0x80   : > { %3481 = vmatpush3.bf16.msra.mxu0 %v3824_v24  ;;  %3496 = vmatprep.mubr.bf16.mxu0 %v4686_v30 }
  0x81   : > { %3482 = vmatprep.subr.bf16.mxu0 %v3825_v28 }
  0x83   : > { %623 = vperm.xlu1 %3797, %v4714_v36  }
  0x84   : > { %3483 = vmatpush3.bf16.msra.mxu0 %v3825_v28 }
  0x85   : > { %3484 = vmatprep.subr.bf16.mxu0 %v3826_v31 }
  0x87   : > { %633 = vperm.xlu1 %3797, %v4723_v38  }
  0x88   : > { %3485 = vmatpush3.bf16.msra.mxu0 %v3826_v31 }
  0x89   : > { %3486 = vmatprep.subr.bf16.mxu0 %v3827_v33 }
  0x8c   : > { %3487 = vmatpush3.bf16.msra.mxu0 %v3827_v33 }
  0x8d   : > { %3488 = vmatprep.subr.bf16.mxu0 %v3828_v35 }
  0x90   : > { %3489 = vmatpush3.bf16.msra.mxu0 %v3828_v35 }
  0x91   : > { %3490 = vmatprep.subr.bf16.mxu0 %v3829_v37 }
  0x94   : > { %3491 = vmatpush3.bf16.msra.mxu0 %v3829_v37  ;;  %v3832_v37 = vld [vmem:[#allocation7 + $0x38] sm:$0xff]  }
  0x95   : > { %3492 = vmatprep.subr.bf16.mxu0 %v3830_v39 }
  0x98   : > { %3493 = vmatpush3.bf16.msra.mxu0 %v3830_v39  ;;  %v3833_v39 = vld [vmem:[#allocation7 + $0x30] sm:$0xff]  }
  0x99   : > { %3494 = vmatprep.subr.bf16.mxu0 %v3831_v40 }
  0x9c   : > { %3495 = vmatpush3.bf16.msra.mxu0 %v3831_v40 }
  0x9d   : > { %3512 = vmatprep.subr.bf16.mxu0 %v3832_v37 }
  0x9f   : > { %3497 = vmatmul.mubr.bf16.vlgmr.msra.gmra.mxu0 %v4747_v45 }
  0xa0   : > { %3500 = vmatprep.mubr.bf16.mxu0 %v4751_v46  ;;  %3513 = vmatpush3.bf16.msra.mxu0 %v3832_v37 }
  0xa1   : > { %3514 = vmatprep.subr.bf16.mxu0 %v3833_v39 }
  0xa4   : > { %3515 = vmatpush3.bf16.msra.mxu0 %v3833_v39 }
  0xa7   : > { %3501 = vmatmul.mubr.bf16.gmra.mxu0 %v4769_v51 }
  0xa8   : > { %3504 = vmatprep.mubr.bf16.mxu0 %v4773_v52 }
  0xaf   : > { %3505 = vmatmul.mubr.bf16.gmra.mxu0 %v4791_v57 }
  0xb0   : > { %3508 = vmatprep.mubr.bf16.mxu0 %v4795_v58 }
  0xb7   : > { %3509 = vmatmul.mubr.bf16.gmra.mxu0 %v4807_v61 }
 0x13f   : > { %v4816_v1 = vpop.f32.mrf.mxu0 }
 0x140   : > { %v552_v3 = vmul.f32 %v550_v63, %v4816_v1  ;;  %v3834_v63 = vld [vmem:[#allocation7 + $0x28] sm:$0xff]  }
 0x141   : > { %v4822_v4 = vpop.f32.mrf.mxu0  ;;  %3516 = vmatprep.subr.bf16.mxu0 %v3834_v63 }
 0x142   : > { %5834 = vst [vmem:[#allocation17_spill] sm:$0xff] %v4822_v4  ;;  %v557_v5 = vmul.f32 %v4822_v4, %v411_v2  ;;  %v554_v6 = vsel %vm553_vm0, %v552_v3, 0.0  ;;  %v641_v2 = vlaneseq  ;;  %3517 = vmatpush3.bf16.msra.mxu0 %v3834_v63 }
 0x143   : > { %555 = vadd.xlane.f32.xlu0 %v554_v6  ;;  %v546_v7 = vpop.f32.mrf.mxu0 }
 0x144   : > { %v4825_v8 = vsel %vm553_vm0, %v557_v5, 0.0  ;;  %v3835_v5 = vld [vmem:[#allocation7 + $0x20] sm:$0xff]   ;;  %v4879_v6 = vshrl.u32 %v641_v2, 7 }
 0x145   : > { %v547_v10 = vpop.f32.mrf.mxu0  ;;  %3518 = vmatprep.subr.bf16.mxu0 %v3835_v5 }
 0x146   : > { %5838 = vst [vmem:[#allocation21_spill] sm:$0xff] %v4879_v6  ;;  %v4884_v10 = vsub.s32 0, %v4879_v6  ;;  %3519 = vmatpush3.bf16.msra.mxu0 %v3835_v5 }
 0x159   : > { %563 = vperm.xlu0 %3796, %v4830_v12  }
 0x15d   : > { %608 = vperm.xlu0 %3796, %v4836_v13  }
 0x15f   : > { %v4857_v19 = vpop.f32.mrf.mxu0 }
 0x161   : > { %618 = vperm.xlu0 %3796, %v4842_v15   ;;  %v4859_v21 = vpop.f32.mrf.mxu0 }
 0x162   : > { %5836 = vst [vmem:[#allocation19_spill] sm:$0xff] %v4859_v21 }
 0x163   : > { %v4861_v22 = vpop.f32.mrf.mxu0 }
 0x165   : > { %628 = vperm.xlu0 %3796, %v4848_v16   ;;  %v4863_v24 = vpop.f32.mrf.mxu0 }
 0x167   : > { %v4865_v27 = vpop.f32.mrf.mxu0 }
 0x169   : > { %638 = vperm.xlu0 %3796, %v4854_v18   ;;  %v4867_v28 = vpop.f32.mrf.mxu0 }
 0x16b   : > { %v4869_v31 = vpop.f32.mrf.mxu0 }
 0x16c   : > { %5837 = vst [vmem:[#allocation20_spill] sm:$0xff] %v4869_v31 }
 0x16d   : > { %v4871_v33 = vpop.f32.mrf.mxu0 }
 0x16f   : > { %v4873_v35 = vpop.f32.mrf.mxu0 }
 0x171   : > { %v4875_v40 = vpop.f32.mrf.mxu0 }
 0x173   : > { %v4877_v3 = vpop.f32.mrf.mxu0 }
 0x175   : > { %v4881_v7 = vpop.f32.mrf.mxu0 }
 0x177   : > { %v4889_v4 = vpop.f32.mrf.mxu0 }
 0x179   : > { %v4902_v5 = vpop.f32.mrf.mxu0 }
 0x17b   : > { %v4912_v56 = vpop.f32.mrf.mxu0 }
 0x1cc   : > { %v556_v37 = vpop.xlane.xlu0 %555 }
 0x1cd   : > { %v4887_v0 = vrot.slane %v556_v37, %v4884_v10 }
 0x1cf   : > { %v1075_v39 = vmul.f32 %v4887_v0, %v4830_v12  ;;  %v1080_v2 = vmul.f32 %v4887_v0, %v4656_v20  ;;  %v1076_v63 = vmul.f32 %v4887_v0, %v4606_v9  ;;  %v1082_v6 = vmul.f32 %v4887_v0, %v4682_v29 }
 0x1d0   : > { %v1077_v62 = vmul.f32 %v4887_v0, %v4615_v11  ;;  %v1084_v20 = vmul.f32 %v4887_v0, %v4836_v13  ;;  %v1078_v29 = vmul.f32 %v4887_v0, %v4628_v14  ;;  %v1088_v14 = vmul.f32 %v4887_v0, %v4848_v16 }
 0x1d1   : > { %v1091_v37 = vadd.f32 %v1075_v39, %v4859_v21  ;;  %v1096_v59 = vadd.f32 %v1080_v2, %v4871_v33  ;;  %v1092_v12 = vadd.f32 %v1076_v63, %v4863_v24  ;;  %v1098_v60 = vadd.f32 %v4869_v31, %v1082_v6 }
 0x1d2   : > { %v1093_v55 = vadd.f32 %v4857_v19, %v1077_v62  ;;  %v1100_v21 = vadd.f32 %v1084_v20, %v4881_v7  ;;  %v1086_v63 = vmul.f32 %v4887_v0, %v4842_v15  ;;  %v1094_v31 = vadd.f32 %v4861_v22, %v1078_v29 }
 0x1d3   : > { %v3281_v9 = vmul.f32 -1.442695, %v1091_v37  ;;  %v3286_v11 = vmul.f32 -1.442695, %v1096_v59  ;;  %v3282_v39 = vmul.f32 -1.442695, %v1092_v12  ;;  %v1079_v62 = vmul.f32 %v4887_v0, %v4641_v17  ;;  %v4925_v37 = vpop.f32.mrf.mxu0 }
 0x1d4   : > { %v3288_v2 = vmul.f32 -1.442695, %v1098_v60  ;;  %v3283_v6 = vmul.f32 -1.442695, %v1093_v55  ;;  %v3290_v59 = vmul.f32 -1.442695, %v1100_v21  ;;  %v1102_v12 = vadd.f32 %v4877_v3, %v1086_v63 }
 0x1d5   : > { %3888 = vpow2.f32 %v3281_v9  ;;  %v1090_v60 = vmul.f32 %v4887_v0, %v4854_v18  ;;  %v1081_v55 = vmul.f32 %v4887_v0, %v4664_v23  ;;  %v3284_v20 = vmul.f32 -1.442695, %v1094_v31 }
 0x1d6   : > { %3890 = vpow2.f32 %v3286_v11  ;;  %v1095_v17 = vadd.f32 %v1079_v62, %v4867_v28  ;;  %v1104_v9 = vadd.f32 %v1088_v14, %v4925_v37  ;;  %v3292_v21 = vmul.f32 -1.442695, %v1102_v12 }
 0x1d7   : > { %3892 = vpow2.f32 %v3282_v39  ;;  %v1106_v29 = vadd.f32 %v4912_v56, %v1090_v60  ;;  %v1097_v11 = vadd.f32 %v4865_v27, %v1081_v55  ;;  %v1083_v63 = vmul.f32 %v4887_v0, %v4695_v32 }
 0x1d8   : > { %3894 = vpow2.f32 %v3288_v2  ;;  %v3285_v39 = vmul.f32 -1.442695, %v1095_v17  ;;  %v3294_v2 = vmul.f32 -1.442695, %v1104_v9  ;;  %v1085_v62 = vmul.f32 %v4887_v0, %v4705_v34 }
 0x1d9   : > { %3896 = vpow2.f32 %v3283_v6  ;;  %v3296_v23 = vmul.f32 -1.442695, %v1106_v29  ;;  %v3287_v6 = vmul.f32 -1.442695, %v1097_v11  ;;  %v1099_v31 = vadd.f32 %v1083_v63, %v4875_v40 }
 0x1da   : > { %3898 = vpow2.f32 %v3290_v59  ;;  %v1087_v12 = vmul.f32 %v4887_v0, %v4714_v36  ;;  %v1101_v17 = vadd.f32 %v4873_v35, %v1085_v62 }
 0x1db   : > { %3900 = vpow2.f32 %v3284_v20  ;;  %v3289_v20 = vmul.f32 -1.442695, %v1099_v31 }
 0x1dc   : > { %3902 = vpow2.f32 %v3292_v21 }
 0x1dd   : > { %3904 = vpow2.f32 %v3285_v39  ;;  %v1103_v39 = vadd.f32 %v1087_v12, %v4902_v5 }
 0x1de   : > { %3906 = vpow2.f32 %v3294_v2  ;;  %v3291_v2 = vmul.f32 -1.442695, %v1101_v17 }
 0x1df   : > { %3908 = vpow2.f32 %v3296_v23  ;;  %v1089_v23 = vmul.f32 %v4887_v0, %v4723_v38 }
 0x1e0   : > { %3910 = vpow2.f32 %v3287_v6 }
 0x1e2   : > { %v3889_v14 = vpop.eup %3888 }
 0x1e3   : > { %v3891_v59 = vpop.eup %3890  ;;  %v1155_v32 = vadd.f32 1.0, %v3889_v14 }
 0x1e4   : > { %v3893_v60 = vpop.eup %3892  ;;  %v1160_v55 = vadd.f32 1.0, %v3891_v59  ;;  %v3293_v59 = vmul.f32 -1.442695, %v1103_v39 }
 0x1e5   : > { %v3895_v9 = vpop.eup %3894  ;;  %3912 = vrcp.f32 %v1155_v32  ;;  %v1156_v21 = vadd.f32 1.0, %v3893_v60  ;;  %v1105_v32 = vadd.f32 %v4889_v4, %v1089_v23 }
 0x1e6   : > { %v3897_v29 = vpop.eup %3896  ;;  %3914 = vrcp.f32 %v1160_v55  ;;  %v1162_v11 = vadd.f32 1.0, %v3895_v9 }
 0x1e7   : > { %v3899_v63 = vpop.eup %3898  ;;  %3916 = vpow2.f32 %v3289_v20  ;;  %v1157_v14 = vadd.f32 1.0, %v3897_v29  ;;  %v3295_v9 = vmul.f32 -1.442695, %v1105_v32 }
 0x1e8   : > { %3918 = vrcp.f32 %v1156_v21  ;;  %v3901_v6 = vpop.eup %3900  ;;  %v1164_v31 = vadd.f32 1.0, %v3899_v63  ;;  %v3836_v63 = vld [vmem:[#allocation7 + $0x18] sm:$0xff]  }
 0x1e9   : > { %3920 = vrcp.f32 %v1162_v11  ;;  %v3903_v62 = vpop.eup %3902  ;;  %v1158_v60 = vadd.f32 1.0, %v3901_v6  ;;  %3520 = vmatprep.subr.bf16.mxu0 %v3836_v63 }
 0x1ea   : > { %3922 = vpow2.f32 %v3291_v2  ;;  %v3905_v55 = vpop.eup %3904  ;;  %v1166_v12 = vadd.f32 1.0, %v3903_v62  ;;  %3521 = vmatpush3.bf16.msra.mxu0 %v3836_v63 }
 0x1eb   : > { %3924 = vrcp.f32 %v1157_v14  ;;  %v3907_v20 = vpop.eup %3906  ;;  %v1159_v21 = vadd.f32 1.0, %v3905_v55  ;;  %v3838_v55 = vld [vmem:[#allocation7 + $0x8] sm:$0xff]  }
 0x1ec   : > { %3926 = vrcp.f32 %v1164_v31  ;;  %v3909_v17 = vpop.eup %3908  ;;  %v1168_v11 = vadd.f32 1.0, %v3907_v20  ;;  %v3837_v31 = vld [vmem:[#allocation7 + $0x10] sm:$0xff]  }
 0x1ed   : > { %3928 = vpow2.f32 %v3293_v59  ;;  %v3911_v0 = vpop.eup %3910  ;;  %v1170_v6 = vadd.f32 1.0, %v3909_v17  ;;  %3522 = vmatprep.subr.bf16.mxu0 %v3837_v31 }
 0x1ee   : > { %3930 = vrcp.f32 %v1158_v60  ;;  %v1161_v23 = vadd.f32 1.0, %v3911_v0  ;;  %3523 = vmatpush3.bf16.msra.mxu0 %v3837_v31 }
 0x1ef   : > { %3932 = vrcp.f32 %v1166_v12  ;;  %3524 = vmatprep.subr.bf16.mxu0 %v3838_v55 }
 0x1f0   : > { %3934 = vpow2.f32 %v3295_v9 }
 0x1f1   : > { %3936 = vrcp.f32 %v1159_v21  ;;  %v3839_v21 = vld [vmem:[#allocation7] sm:$0xff]  }
 0x1f2   : > { %v3913_v29 = vpop.eup %3912  ;;  %3938 = vrcp.f32 %v1168_v11  ;;  %3525 = vmatpush3.bf16.msra.mxu0 %v3838_v55 }
 0x1f3   : > { %v3915_v39 = vpop.eup %3914  ;;  %1417 = vperm.xlu1 %3797, %v3913_v29   ;;  %3940 = vrcp.f32 %v1161_v23  ;;  %3526 = vmatprep.subr.bf16.mxu0 %v3839_v21 }
 0x1f4   : > { %1442 = vperm.xlu0 %3796, %v3915_v39   ;;  %v3917_v2 = vpop.eup %3916  ;;  %3942 = vrcp.f32 %v1170_v6 }
 0x1f5   : > { %v3919_v14 = vpop.eup %3918  ;;  %v1163_v32 = vadd.f32 1.0, %v3917_v2 }
 0x1f6   : > { %v3921_v62 = vpop.eup %3920  ;;  %3527 = vmatpush3.bf16.msra.mxu0 %v3839_v21  ;;  %v3852_v21 = vld [vmem:[#allocation5 + $0x34] ss:$8 sps:$4 sm:$0xff]  }
 0x1f7   : > { %1422 = vperm.xlu1 %3797, %v3919_v14   ;;  %v3923_v59 = vpop.eup %3922  ;;  %3944 = vrcp.f32 %v1163_v32  ;;  %v3842_v32 = vld [vmem:[#allocation5 + $0x70] ss:$8 sps:$4 sm:$0xff]  }
 0x1f8   : > { %1452 = vperm.xlu0 %3796, %v3921_v62   ;;  %v3925_v60 = vpop.eup %3924  ;;  %v1165_v17 = vadd.f32 1.0, %v3923_v59  ;;  %v3840_v59 = vld [vmem:[#allocation5 + $0x74] ss:$8 sps:$4 sm:$0xff]  }
 0x1f9   : > { %v3927_v12 = vpop.eup %3926  ;;  %777 = vmatprep.subr.bf16.mxu1 %v3840_v59 }
 0x1fa   : > { %v3929_v20 = vpop.eup %3928  ;;  %3946 = vrcp.f32 %v1165_v17  ;;  %778 = vmatpush1.bf16.msra.mxu1 %v3842_v32  ;;  %v3848_v17 = vld [vmem:[#allocation5 + $0x50] ss:$8 sps:$4 sm:$0xff]  }
 0x1fb   : > { %1427 = vperm.xlu1 %3797, %v3925_v60   ;;  %v3931_v9 = vpop.eup %3930  ;;  %v1167_v11 = vadd.f32 1.0, %v3929_v20  ;;  %v3843_v60 = vld [vmem:[#allocation5 + $0x64] ss:$8 sps:$4 sm:$0xff]   ;;  %v3846_v20 = vld [vmem:[#allocation5 + $0x54] ss:$8 sps:$4 sm:$0xff]  }
 0x1fc   : > { %1462 = vperm.xlu0 %3796, %v3927_v12   ;;  %v3933_v0 = vpop.eup %3932  ;;  %v3845_v12 = vld [vmem:[#allocation5 + $0x60] ss:$8 sps:$4 sm:$0xff]   ;;  %779 = vmatprep.subr.bf16.mxu1 %v3843_v60 }
 0x1fd   : > { %v3935_v29 = vpop.eup %3934  ;;  %3948 = vrcp.f32 %v1167_v11  ;;  %v3855_v11 = vld [vmem:[#allocation5 + $0x24] ss:$8 sps:$4 sm:$0xff]  }
 0x1fe   : > { %v3937_v63 = vpop.eup %3936  ;;  %v1169_v2 = vadd.f32 1.0, %v3935_v29  ;;  %780 = vmatpush1.bf16.msra.mxu1 %v3845_v12  ;;  %v3854_v29 = vld [vmem:[#allocation5 + $0x30] ss:$8 sps:$4 sm:$0xff]  }
 0x1ff   : > { %1432 = vperm.xlu1 %3797, %v3931_v9   ;;  %v3939_v39 = vpop.eup %3938  ;;  %781 = vmatprep.subr.bf16.mxu1 %v3846_v20  ;;  %v3849_v9 = vld [vmem:[#allocation5 + $0x44] ss:$8 sps:$4 sm:$0xff]  }
 0x200   : > { %1472 = vperm.xlu0 %3796, %v3933_v0   ;;  %v3941_v23 = vpop.eup %3940  ;;  %3950 = vrcp.f32 %v1169_v2  ;;  %v3851_v0 = vld [vmem:[#allocation5 + $0x40] ss:$8 sps:$4 sm:$0xff]   ;;  %v3860_v2 = vld [vmem:[#allocation5 + $0x10] ss:$8 sps:$4 sm:$0xff]  }
 0x201   : > { %v3943_v14 = vpop.eup %3942 }
 0x202   : > { %782 = vmatpush1.bf16.msra.mxu1 %v3848_v17 }
 0x203   : > { %1437 = vperm.xlu1 %3797, %v3937_v63   ;;  %783 = vmatprep.subr.bf16.mxu1 %v3849_v9  ;;  %v3857_v63 = vld [vmem:[#allocation5 + $0x20] ss:$8 sps:$4 sm:$0xff]  }
 0x204   : > { %1482 = vperm.xlu0 %3796, %v3939_v39   ;;  %v3945_v6 = vpop.eup %3944  ;;  %v3858_v39 = vld [vmem:[#allocation5 + $0x14] ss:$8 sps:$4 sm:$0xff]  }
 0x206   : > { %784 = vmatpush1.bf16.msra.mxu1 %v3851_v0 }
 0x207   : > { %1447 = vperm.xlu1 %3797, %v3941_v23   ;;  %v3947_v31 = vpop.eup %3946  ;;  %785 = vmatprep.subr.bf16.mxu1 %v3852_v21  ;;  %v3861_v23 = vld [vmem:[#allocation5 + $0x4] ss:$8 sps:$4 sm:$0xff]  }
 0x208   : > { %1492 = vperm.xlu0 %3796, %v3943_v14   ;;  %v4945_v14 = vpop.permute.xlu1 %568 }
 0x209   : > { %5839 = vst [vmem:[#allocation22_spill] sm:$0xff] %v4945_v14 }
 0x20a   : > { %v3949_v62 = vpop.eup %3948  ;;  %786 = vmatpush1.bf16.msra.mxu1 %v3854_v29 }
 0x20b   : > { %1457 = vperm.xlu1 %3797, %v3945_v6   ;;  %787 = vmatprep.subr.bf16.mxu1 %v3855_v11  ;;  %v3863_v6 = vld [vmem:[#allocation5] ss:$8 sps:$4 sm:$0xff]  }
 0x20d   : > { %v3951_v55 = vpop.eup %3950 }
 0x20e   : > { %788 = vmatpush1.bf16.msra.mxu1 %v3857_v63 }
 0x20f   : > { %1467 = vperm.xlu1 %3797, %v3947_v31   ;;  %789 = vmatprep.subr.bf16.mxu1 %v3858_v39  ;;  %v4947_v31 = vpop.permute.xlu1 %573 }
 0x212   : > { %790 = vmatpush1.bf16.msra.mxu1 %v3860_v2 }
 0x213   : > { %1477 = vperm.xlu1 %3797, %v3949_v62   ;;  %791 = vmatprep.subr.bf16.mxu1 %v3861_v23  ;;  %v5840_v62 = vmov 0   ;;  %v4951_v59 = vpop.permute.xlu1 %578 }
 0x214   : > { %5841 = vst [vmem:[#allocation23_spill] sm:$0xff] %v4951_v59 }
 0x216   : > { %792 = vmatpush1.bf16.msra.mxu1 %v3863_v6 }
 0x217   : > { %1487 = vperm.xlu1 %3797, %v3951_v55   ;;  %v4955_v32 = vpop.permute.xlu1 %583 }
 0x219   : > { %810 = vmatmul.mubr.bf16.vlgmr.msra.gmra.mxu1 %v4686_v30 }
 0x21a   : > { %819 = vmatprep.mubr.bf16.mxu1 %v5840_v62 }
 0x21b   : > { %v4958_v60 = vpop.permute.xlu1 %588 }
 0x21c   : > { %5842 = vst [vmem:[#allocation24_spill] sm:$0xff] %v4958_v60 }
 0x21f   : > { %v4962_v55 = vpop.permute.xlu1 %593 }
 0x220   : > { %5843 = vst [vmem:[#allocation25_spill] sm:$0xff] %v4962_v55 }
 0x221   : > { %820 = vmatmul.mubr.bf16.gmra.mxu1 %v4747_v45 }
 0x222   : > { %829 = vmatprep.mubr.bf16.mxu1 %v5840_v62 }
 0x223   : > { %v4966_v30 = vpop.permute.xlu1 %598 }
 0x224   : > { %5844 = vst [vmem:[#allocation26_spill] sm:$0xff] %v4966_v30 }
 0x227   : > { %v4971_v45 = vpop.permute.xlu1 %603 }
 0x229   : > { %830 = vmatmul.mubr.bf16.gmra.mxu1 %v4751_v46 }
 0x22a   : > { %839 = vmatprep.mubr.bf16.mxu1 %v5840_v62 }
 0x22b   : > { %v4976_v46 = vpop.permute.xlu1 %613 }
 0x231   : > { %840 = vmatmul.mubr.bf16.gmra.mxu1 %v4769_v51  ;;  %v4982_v51 = vpop.permute.xlu1 %623 }
 0x232   : > { %849 = vmatprep.mubr.bf16.mxu1 %v5840_v62 }
 0x235   : > { %v4992_v9 = vpop.permute.xlu1 %633 }
 0x239   : > { %850 = vmatmul.mubr.bf16.gmra.mxu1 %v4773_v52  ;;  %v4990_v52 = vrot.slane %v4816_v1, %v4884_v10 }
 0x23a   : > { %859 = vmatprep.mubr.bf16.mxu1 %v5840_v62 }
 0x23b   : > { %559 = vadd.xlane.f32.xlu1 %v4825_v8  ;;  %v4968_v8 = vpop.permute.xlu0 %563  ;;  %v646_v21 = vmul.f32 %v4990_v52, %v4945_v14  ;;  %v647_v23 = vmul.f32 %v4990_v52, %v4947_v31  ;;  %v648_v14 = vmul.f32 %v4990_v52, %v4951_v59 }
 0x23c   : > { %5845 = vst [vmem:[#allocation27_spill] sm:$0xff] %v4968_v8 }
 0x23d   : > { %v1400_v1 = vsub.f32 %v646_v21, %v4673_v26 }
 0x23f   : > { %v4974_v12 = vpop.permute.xlu0 %608 }
 0x241   : > { %860 = vmatmul.mubr.bf16.gmra.mxu1 %v4791_v57  ;;  %v645_v57 = vmul.f32 %v4990_v52, %v4968_v8 }
 0x242   : > { %869 = vmatprep.mubr.bf16.mxu1 %v5840_v62 }
 0x243   : > { %v4979_v20 = vpop.permute.xlu0 %618  ;;  %v1399_v11 = vsub.f32 %v645_v57, %v4670_v25 }
 0x247   : > { %v4984_v17 = vpop.permute.xlu0 %628 }
 0x249   : > { %870 = vmatmul.mubr.bf16.gmra.mxu1 %v4795_v58 }
 0x24a   : > { %879 = vmatprep.mubr.bf16.mxu1 %v5840_v62 }
 0x24b   : > { %v4996_v0 = vpop.permute.xlu0 %638 }
 0x251   : > { %880 = vmatmul.mubr.bf16.gmra.mxu1 %v4807_v61  ;;  %v650_v61 = vmul.f32 %v4990_v52, %v4958_v60  ;;  %v651_v60 = vmul.f32 %v4990_v52, %v4962_v55 }
 0x26e   : > { %v1418_v29 = vpop.permute.xlu1 %1417 }
 0x26f   : > { %v1443_v58 = vpop.permute.xlu0 %1442  ;;  %v1495_v63 = vmul.f32 %v1418_v29, %v1399_v11  ;;  %v1401_v29 = vsub.f32 %v647_v23, %v4734_v41 }
 0x271   : > { %v1511_v6 = vadd.f32 %v1495_v63, %v4670_v25  ;;  %v649_v25 = vmul.f32 %v4990_v52, %v4955_v32 }
 0x272   : > { %v1423_v39 = vpop.permute.xlu1 %1422 }
 0x273   : > { %v1496_v2 = vmul.f32 %v1423_v39, %v1400_v1  ;;  %v1453_v8 = vpop.permute.xlu0 %1452  ;;  %v1402_v1 = vsub.f32 %v648_v14, %v4737_v42  ;;  %v652_v39 = vmul.f32 %v4990_v52, %v4966_v30  ;;  %v1403_v14 = vsub.f32 %v649_v25, %v4740_v43 }
 0x274   : > { %v656_v25 = vmul.f32 %v4990_v52, %v4979_v20 }
 0x275   : > { %v1512_v62 = vadd.f32 %v1496_v2, %v4673_v26  ;;  %v1404_v26 = vsub.f32 %v650_v61, %v4743_v44  ;;  %v1406_v61 = vsub.f32 %v652_v39, %v4759_v48 }
 0x276   : > { %v1428_v57 = vpop.permute.xlu1 %1427 }
 0x277   : > { %v1722_v21 = vpack.c.bf16 %v1512_v62, %v1511_v6  ;;  %v1497_v11 = vmul.f32 %v1428_v57, %v1401_v29  ;;  %v1463_v59 = vpop.permute.xlu0 %1462  ;;  %v1500_v23 = vmul.f32 %v1443_v58, %v1404_v26  ;;  %v654_v29 = vmul.f32 %v4990_v52, %v4974_v12 }
 0x278   : > { %v1502_v55 = vmul.f32 %v1453_v8, %v1406_v61  ;;  %v657_v61 = vmul.f32 %v4990_v52, %v4982_v51 }
 0x279   : > { %3528 = vmatprep.mubr.bf16.mxu0 %v1722_v21  ;;  %v1513_v6 = vadd.f32 %v1497_v11, %v4734_v41  ;;  %v653_v41 = vmul.f32 %v4990_v52, %v4971_v45  ;;  %v1408_v26 = vsub.f32 %v654_v29, %v4765_v50 }
 0x27a   : > { %v1433_v63 = vpop.permute.xlu1 %1432 }
 0x27b   : > { %v1498_v2 = vmul.f32 %v1433_v63, %v1402_v1  ;;  %v1405_v1 = vsub.f32 %v651_v60, %v4756_v47  ;;  %v1516_v63 = vadd.f32 %v1500_v23, %v4743_v44  ;;  %v655_v60 = vmul.f32 %v4990_v52, %v4976_v46 }
 0x27c   : > { %v1518_v44 = vadd.f32 %v1502_v55, %v4759_v48  ;;  %v1504_v8 = vmul.f32 %v1463_v59, %v1408_v26 }
 0x27d   : > { %v1514_v62 = vadd.f32 %v1498_v2, %v4737_v42  ;;  %v1473_v42 = vpop.permute.xlu0 %1472  ;;  %v1409_v55 = vsub.f32 %v655_v60, %v4778_v53 }
 0x27e   : > { %v1438_v57 = vpop.permute.xlu1 %1437  ;;  %v1520_v48 = vadd.f32 %v1504_v8, %v4765_v50 }
 0x27f   : > { %v1723_v21 = vpack.c.bf16 %v1514_v62, %v1513_v6  ;;  %v1499_v30 = vmul.f32 %v1438_v57, %v1403_v14  ;;  %v658_v6 = vmul.f32 %v4990_v52, %v4984_v17  ;;  %v1410_v62 = vsub.f32 %v656_v25, %v4781_v54 }
 0x280   : > { %v659_v25 = vmul.f32 %v4990_v52, %v4992_v9 }
 0x281   : > { %v1515_v58 = vadd.f32 %v1499_v30, %v4740_v43  ;;  %3529 = vmatmul.mubr.bf16.vlgmr.msra.gmra.mxu0 %v1723_v21  ;;  %v1407_v30 = vsub.f32 %v653_v41, %v4762_v49  ;;  %v1483_v29 = vpop.permute.xlu0 %1482  ;;  %v1506_v59 = vmul.f32 %v1473_v42, %v1410_v62 }
 0x282   : > { %v1448_v11 = vpop.permute.xlu1 %1447 }
 0x283   : > { %v1501_v39 = vmul.f32 %v1448_v11, %v1405_v1  ;;  %v1724_v2 = vpack.c.bf16 %v1516_v63, %v1515_v58  ;;  %v660_v1 = vmul.f32 %v4990_v52, %v4996_v0  ;;  %v5846_v63 = vld [vmem:[#allocation13_spill] sm:$0xff]  ;;  %v1522_v26 = vadd.f32 %v1506_v59, %v4781_v54  ;;  %v5849_v52 = vld [vmem:[#allocation14_spill] sm:$0xff] }
 0x284   : > { %v1412_v58 = vsub.f32 %v658_v6, %v5846_v63  ;;  %v1413_v54 = vsub.f32 %v659_v25, %v5849_v52 }
 0x285   : > { %v1517_v43 = vadd.f32 %v1501_v39, %v4756_v47  ;;  %3532 = vmatprep.mubr.bf16.mxu0 %v1724_v2  ;;  %v1493_v2 = vpop.permute.xlu0 %1492 }
 0x286   : > { %v1458_v23 = vpop.permute.xlu1 %1457  ;;  %v1508_v50 = vmul.f32 %v1483_v29, %v1412_v58  ;;  %v4176_v58 = vld [vmem:[%s5776_s2 + $0x8] sm:$0xff] }
 0x287   : > { %v1503_v14 = vmul.f32 %v1458_v23, %v1407_v30  ;;  %v1725_v57 = vpack.c.bf16 %v1518_v44, %v1517_v43  ;;  %v5848_v44 = vld [vmem:[#allocation15_spill] sm:$0xff] }
 0x288   : > { %v1414_v8 = vsub.f32 %v660_v1, %v5848_v44  ;;  %v1524_v23 = vadd.f32 %v1508_v50, %v5846_v63 }
 0x289   : > { %v1519_v47 = vadd.f32 %v1503_v14, %v4762_v49  ;;  %3533 = vmatmul.mubr.bf16.gmra.mxu0 %v1725_v57  ;;  %v5847_v49 = vld [vmem:[#allocation12_spill] sm:$0xff] }
 0x28a   : > { %v1468_v21 = vpop.permute.xlu1 %1467  ;;  %v1411_v39 = vsub.f32 %v657_v61, %v5847_v49  ;;  %v1510_v6 = vmul.f32 %v1493_v2, %v1414_v8  ;;  %v4183_v8 = vld [vmem:[%s5776_s2 + $0x40] sm:$0xff] }
 0x28b   : > { %v1505_v41 = vmul.f32 %v1468_v21, %v1409_v55  ;;  %v1726_v11 = vpack.c.bf16 %v1520_v48, %v1519_v47  ;;  %v5850_v21 = vld [vmem:[#allocation18_spill] sm:$0xff] }
 0x28c   : > { %v1526_v29 = vadd.f32 %v1510_v6, %v5848_v44 }
 0x28d   : > { %v1521_v42 = vadd.f32 %v1505_v41, %v4778_v53  ;;  %3536 = vmatprep.mubr.bf16.mxu0 %v1726_v11 }
 0x28e   : > { %v1478_v60 = vpop.permute.xlu1 %1477 }
 0x28f   : > { %v1507_v43 = vmul.f32 %v1478_v60, %v1411_v39  ;;  %v1727_v30 = vpack.c.bf16 %v1522_v26, %v1521_v42  ;;  %v4179_v26 = vld [vmem:[%s5776_s2 + $0x20] sm:$0xff]  ;;  %v4180_v42 = vld [vmem:[%s5776_s2 + $0x28] sm:$0xff]  ;;  %v4181_v39 = vld [vmem:[%s5776_s2 + $0x30] sm:$0xff] }
 0x290   : > { %v4182_v60 = vld [vmem:[%s5776_s2 + $0x38] sm:$0xff] }
 0x291   : > { %v1523_v62 = vadd.f32 %v1507_v43, %v5847_v49  ;;  %3537 = vmatmul.mubr.bf16.gmra.mxu0 %v1727_v30  ;;  %v4377_v30 = vmov 1  }
 0x292   : > { %v1488_v14 = vpop.permute.xlu1 %1487  ;;  %3798 = vset.pattern.permute.xlu1 %v4377_v30  ;;  %3799 = vset.pattern.permute.xlu0 %v4377_v30 }
 0x293   : > { %v1509_v57 = vmul.f32 %v1488_v14, %v1413_v54  ;;  %v1728_v53 = vpack.c.bf16 %v1524_v23, %v1523_v62 }
 0x295   : > { %v1525_v61 = vadd.f32 %v1509_v57, %v5849_v52  ;;  %3540 = vmatprep.mubr.bf16.mxu0 %v1728_v53 }
 0x297   : > { %v1729_v48 = vpack.c.bf16 %v1526_v29, %v1525_v61 }
 0x299   : > { %3541 = vmatmul.mubr.bf16.gmra.mxu0 %v1729_v48  ;;  %v3865_v48 = vld [vmem:[#allocation7 + $0x70] sm:$0xff]  }
 0x2c4   : > { %v560_v59 = vpop.xlane.xlu1 %559 }
 0x2c5   : > { %v1206_v47 = vrot.slane %v560_v59, %v4884_v10 }
 0x2c7   : > { %v1216_v55 = vmul.f32 %v1206_v47, %v4836_v13  ;;  %v1207_v1 = vmul.f32 %v1206_v47, %v5850_v21  ;;  %v1221_v63 = vmul.f32 %v1206_v47, %v4723_v38  ;;  %v1208_v41 = vmul.f32 %v4176_v58, %v1206_v47  ;;  %v4177_v13 = vld [vmem:[%s5776_s2 + $0x10] sm:$0xff]  ;;  %v4178_v38 = vld [vmem:[%s5776_s2 + $0x18] sm:$0xff]  ;;  %v5853_v21 = vld [vmem:[#allocation21_spill] sm:$0xff] }
 0x2c8   : > { %v1209_v11 = vmul.f32 %v4177_v13, %v1206_v47  ;;  %v1210_v25 = vmul.f32 %v4178_v38, %v1206_v47  ;;  %v1211_v50 = vmul.f32 %v4179_v26, %v1206_v47  ;;  %v1212_v49 = vmul.f32 %v4180_v42, %v1206_v47 }
 0x2c9   : > { %1257 = vrot.lane.b32.xlu1 %v1216_v55, %s4376_s26  ;;  %1239 = vrot.lane.b32.xlu0 %v1207_v1, %s4376_s26  ;;  %v1213_v2 = vmul.f32 %v4181_v39, %v1206_v47  ;;  %v1214_v44 = vmul.f32 %v4182_v60, %v1206_v47  ;;  %v1215_v43 = vmul.f32 %v4183_v8, %v1206_v47  ;;  %v1732_v1 = vsub.s32 1, %v5853_v21 }
 0x2ca   : > { %v1217_v23 = vmul.f32 %v1206_v47, %v4705_v34  ;;  %v1218_v6 = vmul.f32 %v1206_v47, %v4842_v15  ;;  %v1219_v62 = vmul.f32 %v1206_v47, %v4714_v36  ;;  %v1220_v52 = vmul.f32 %v1206_v47, %v4848_v16  ;;  %v5851_v34 = vld [vmem:[#allocation16_spill] sm:$0xff]  ;;  %v3864_v16 = vld [vmem:[#allocation7 + $0x78] sm:$0xff]  }
 0x2cb   : > { %v1222_v54 = vmul.f32 %v1206_v47, %v4854_v18  ;;  %v5112_v57 = vrot.slane %v5851_v34, %v4884_v10  ;;  %v5852_v18 = vld [vmem:[#allocation19_spill] sm:$0xff]  ;;  %3544 = vmatprep.subr.bf16.mxu1 %v3864_v16  ;;  %v5122_v38 = vrot.slane %v5851_v34, %v1732_v1 }
 0x2cc   : > { %3545 = vmatpush3.bf16.msra.mxu1 %v3864_v16 }
 0x2cd   : > { %1267 = vrot.lane.b32.xlu1 %v1221_v63, %s4376_s26  ;;  %1241 = vrot.lane.b32.xlu0 %v1208_v41, %s4376_s26  ;;  %v3866_v63 = vld [vmem:[#allocation7 + $0x68] sm:$0xff]  }
 0x2ce   : > { %3546 = vmatprep.subr.bf16.mxu1 %v3865_v48 }
 0x2d0   : > { %3547 = vmatpush3.bf16.msra.mxu1 %v3865_v48 }
 0x2d1   : > { %1243 = vrot.lane.b32.xlu0 %v1209_v11, %s4376_s26  ;;  %3548 = vmatprep.subr.bf16.mxu1 %v3866_v63 }
 0x2d4   : > { %3549 = vmatpush3.bf16.msra.mxu1 %v3866_v63 }
 0x2d5   : > { %1245 = vrot.lane.b32.xlu0 %v1210_v25, %s4376_s26  ;;  %v3867_v25 = vld [vmem:[#allocation7 + $0x60] sm:$0xff]  }
 0x2d6   : > { %3550 = vmatprep.subr.bf16.mxu1 %v3867_v25 }
 0x2d8   : > { %3551 = vmatpush3.bf16.msra.mxu1 %v3867_v25 }
 0x2d9   : > { %1247 = vrot.lane.b32.xlu0 %v1211_v50, %s4376_s26  ;;  %v811_v14 = vpop.f32.mrf.mxu1 }
 0x2da   : > { %v894_v36 = vadd.f32 %v5112_v57, %v811_v14 }
 0x2db   : > { %v5114_v15 = vpop.f32.mrf.mxu1 }
 0x2dd   : > { %1249 = vrot.lane.b32.xlu0 %v1212_v49, %s4376_s26  ;;  %v815_v53 = vpop.f32.mrf.mxu1 }
 0x2de   : > { %v895_v29 = vadd.f32 %v5112_v57, %v815_v53 }
 0x2df   : > { %v5127_v60 = vpop.f32.mrf.mxu1 }
 0x2e0   : > { %v2036_v61 = vpack.c.bf16 %v895_v29, %v894_v36 }
 0x2e1   : > { %1251 = vrot.lane.b32.xlu0 %v1213_v2, %s4376_s26 }
 0x2e2   : > { %3592 = vmatprep.mubr.bf16.mxu0 %v2036_v61 }
 0x2e5   : > { %1253 = vrot.lane.b32.xlu0 %v1214_v44, %s4376_s26 }
 0x2e9   : > { %1255 = vrot.lane.b32.xlu0 %v1215_v43, %s4376_s26 }
 0x2ed   : > { %1259 = vrot.lane.b32.xlu0 %v1217_v23, %s4376_s26 }
 0x2f1   : > { %1261 = vrot.lane.b32.xlu0 %v1218_v6, %s4376_s26 }
 0x2f5   : > { %1263 = vrot.lane.b32.xlu0 %v1219_v62, %s4376_s26 }
 0x2f9   : > { %1265 = vrot.lane.b32.xlu0 %v1220_v52, %s4376_s26 }
 0x2fd   : > { %1269 = vrot.lane.b32.xlu0 %v1222_v54, %s4376_s26  ;;  %v5138_v54 = vpop.f32.mrf.mxu1 }
 0x2ff   : > { %v5145_v16 = vpop.f32.mrf.mxu1 }
 0x33b   : > { %v1240_v59 = vpop.permute.xlu0 %1239 }
 0x33c   : > { %v1287_v47 = vadd.f32 %v1240_v59, %v5852_v18  ;;  %v1258_v18 = vpop.permute.xlu1 %1257 }
 0x33e   : > { %v3297_v55 = vmul.f32 -1.442695, %v1287_v47 }
 0x33f   : > { %v1242_v58 = vpop.permute.xlu0 %1241 }
 0x340   : > { %v1288_v41 = vadd.f32 %v1242_v58, %v4863_v24  ;;  %3952 = vpow2.f32 %v3297_v55  ;;  %v1296_v58 = vadd.f32 %v1258_v18, %v4881_v7  ;;  %v5854_v7 = vld [vmem:[#allocation20_spill] sm:$0xff] }
 0x341   : > { %v3530_v13 = vpop.f32.mrf.mxu0 }
 0x342   : > { %v3298_v11 = vmul.f32 -1.442695, %v1288_v41  ;;  %v1825_v39 = vadd.f32 %v3530_v13, %v5122_v38 }
 0x343   : > { %v1816_v26 = vpop.f32.mrf.mxu0  ;;  %v1244_v50 = vpop.permute.xlu0 %1243 }
 0x344   : > { %v1289_v42 = vadd.f32 %v4857_v19, %v1244_v50  ;;  %3954 = vpow2.f32 %v3298_v11  ;;  %v1817_v44 = vadd.f32 %v1816_v26, %v5122_v38 }
 0x345   : > { %v3531_v49 = vpop.f32.mrf.mxu0 }
 0x346   : > { %v3299_v2 = vmul.f32 -1.442695, %v1289_v42  ;;  %v1828_v24 = vadd.f32 %v3531_v49, %v5122_v38 }
 0x347   : > { %v1819_v8 = vpop.f32.mrf.mxu0  ;;  %v1246_v43 = vpop.permute.xlu0 %1245 }
 0x348   : > { %3956 = vpow2.f32 %v3299_v2  ;;  %v5130_v30 = vpack.c.bf16 %v1828_v24, %v1825_v39  ;;  %v1820_v19 = vadd.f32 %v1819_v8, %v5122_v38  ;;  %v1290_v23 = vadd.f32 %v4861_v22, %v1246_v43 }
 0x349   : > { %v5134_v6 = vpop.f32.mrf.mxu0  ;;  %v3306_v39 = vmul.f32 -1.442695, %v1296_v58 }
 0x34a   : > { %v5136_v62 = vpack.c.bf16 %v1820_v19, %v1817_v44  ;;  %v3300_v52 = vmul.f32 -1.442695, %v1290_v23 }
 0x34b   : > { %v5140_v14 = vpop.f32.mrf.mxu0  ;;  %v1248_v34 = vpop.permute.xlu0 %1247 }
 0x34c   : > { %3958 = vpow2.f32 %v3300_v52  ;;  %v1291_v53 = vadd.f32 %v1248_v34, %v4867_v28  ;;  %v5152_v28 = vpop.f32.mrf.mxu1 }
 0x34d   : > { %v5143_v36 = vpop.f32.mrf.mxu0  ;;  %v3953_v29 = vpop.eup %3952 }
 0x34e   : > { %v3301_v61 = vmul.f32 -1.442695, %v1291_v53  ;;  %v1351_v22 = vadd.f32 1.0, %v3953_v29  ;;  %v5160_v49 = vpop.f32.mrf.mxu1 }
 0x34f   : > { %v5147_v48 = vpop.f32.mrf.mxu0  ;;  %v1250_v59 = vpop.permute.xlu0 %1249 }
 0x350   : > { %v1292_v47 = vadd.f32 %v1250_v59, %v4871_v33  ;;  %3960 = vrcp.f32 %v1351_v22  ;;  %v5165_v23 = vpop.f32.mrf.mxu1 }
 0x351   : > { %v5150_v55 = vpop.f32.mrf.mxu0  ;;  %v3955_v1 = vpop.eup %3954  ;;  %3962 = vpow2.f32 %v3301_v61  ;;  %v3868_v61 = vld [vmem:[#allocation7 + $0x58] sm:$0xff]  }
 0x352   : > { %v3302_v63 = vmul.f32 -1.442695, %v1292_v47  ;;  %v1352_v41 = vadd.f32 1.0, %v3955_v1  ;;  %v5170_v1 = vpop.f32.mrf.mxu1  ;;  %3552 = vmatprep.subr.bf16.mxu1 %v3868_v61 }
 0x353   : > { %v5155_v13 = vpop.f32.mrf.mxu0  ;;  %v1252_v11 = vpop.permute.xlu0 %1251  ;;  %3553 = vmatpush3.bf16.msra.mxu1 %v3868_v61 }
 0x354   : > { %v1293_v25 = vadd.f32 %v4865_v27, %v1252_v11  ;;  %3964 = vrcp.f32 %v1352_v41 }
 0x355   : > { %v3957_v26 = vpop.eup %3956  ;;  %v5158_v50 = vpop.f32.mrf.mxu0  ;;  %3966 = vpow2.f32 %v3302_v63 }
 0x356   : > { %v1353_v33 = vadd.f32 1.0, %v3957_v26  ;;  %v3303_v42 = vmul.f32 -1.442695, %v1293_v25  ;;  %v1268_v25 = vpop.permute.xlu1 %1267 }
 0x357   : > { %v5162_v2 = vpop.f32.mrf.mxu0  ;;  %v1254_v24 = vpop.permute.xlu0 %1253 }
 0x358   : > { %3968 = vrcp.f32 %v1353_v33  ;;  %v1294_v44 = vadd.f32 %v5854_v7, %v1254_v24 }
 0x359   : > { %v3959_v8 = vpop.eup %3958  ;;  %3970 = vpow2.f32 %v3303_v42  ;;  %v3542_v43 = vpop.f32.mrf.mxu0 }
 0x35a   : > { %v1354_v27 = vadd.f32 1.0, %v3959_v8  ;;  %v3304_v19 = vmul.f32 -1.442695, %v1294_v44  ;;  %3972 = vpow2.f32 %v3306_v39  ;;  %v1873_v59 = vadd.f32 %v3542_v43, %v5122_v38  ;;  %v3869_v39 = vld [vmem:[#allocation7 + $0x50] sm:$0xff]  }
 0x35b   : > { %v1864_v52 = vpop.f32.mrf.mxu0  ;;  %v1256_v34 = vpop.permute.xlu0 %1255  ;;  %v1301_v8 = vadd.f32 %v4889_v4, %v1268_v25  ;;  %3554 = vmatprep.subr.bf16.mxu1 %v3869_v39  ;;  %v1860_v4 = vadd.f32 %v5158_v50, %v5122_v38 }
 0x35c   : > { %3974 = vrcp.f32 %v1354_v27  ;;  %v1295_v53 = vadd.f32 %v1256_v34, %v4875_v40  ;;  %v1865_v58 = vadd.f32 %v1864_v52, %v5122_v38  ;;  %3555 = vmatpush3.bf16.msra.mxu1 %v3869_v39 }
 0x35d   : > { %3976 = vpow2.f32 %v3304_v19  ;;  %v3543_v29 = vpop.f32.mrf.mxu0  ;;  %v3961_v22 = vpop.eup %3960 }
 0x35e   : > { %v3305_v18 = vmul.f32 -1.442695, %v1295_v53  ;;  %v1876_v47 = vadd.f32 %v3543_v29, %v5122_v38  ;;  %v3963_v63 = vpop.eup %3962  ;;  %1545 = vperm.xlu1 %3798, %v3961_v22   ;;  %v5176_v19 = vpop.f32.mrf.mxu1  ;;  %v3311_v22 = vmul.f32 -1.442695, %v1301_v8 }
 0x35f   : > { %v1867_v41 = vpop.f32.mrf.mxu0  ;;  %v1260_v11 = vpop.permute.xlu0 %1259  ;;  %v1355_v40 = vadd.f32 1.0, %v3963_v63  ;;  %v1857_v63 = vadd.f32 %v5150_v55, %v5122_v38 }
 0x360   : > { %3978 = vpow2.f32 %v3305_v18  ;;  %v2051_v26 = vpack.c.bf16 %v1876_v47, %v1873_v59  ;;  %v1868_v33 = vadd.f32 %v1867_v41, %v5122_v38  ;;  %v1297_v42 = vadd.f32 %v4873_v35, %v1260_v11  ;;  %v3870_v35 = vld [vmem:[#allocation7 + $0x48] sm:$0xff]   ;;  %v5181_v47 = vpop.f32.mrf.mxu1 }
 0x361   : > { %v3965_v24 = vpop.eup %3964  ;;  %3980 = vrcp.f32 %v1355_v40  ;;  %3556 = vmatprep.subr.bf16.mxu1 %v3870_v35  ;;  %v2049_v50 = vpack.c.bf16 %v1860_v4, %v1857_v63  ;;  %v3871_v40 = vld [vmem:[#allocation7 + $0x40] sm:$0xff]  }
 0x362   : > { %v2050_v7 = vpack.c.bf16 %v1868_v33, %v1865_v58  ;;  %3576 = vmatprep.subr.bf16.mxu0 %v2051_v26  ;;  %v3967_v44 = vpop.eup %3966  ;;  %v3307_v43 = vmul.f32 -1.442695, %v1297_v42  ;;  %1550 = vperm.xlu0 %3799, %v3965_v24   ;;  %v5186_v39 = vpop.f32.mrf.mxu1  ;;  %v1852_v24 = vadd.f32 %v5162_v2, %v5122_v38 }
 0x363   : > { %3577 = vmatpush3.bf16.xpose.msra.mxu0 %v2051_v26  ;;  %v1262_v27 = vpop.permute.xlu0 %1261  ;;  %v1356_v52 = vadd.f32 1.0, %v3967_v44  ;;  %3557 = vmatpush3.bf16.msra.mxu1 %v3870_v35 }
 0x364   : > { %v1298_v34 = vadd.f32 %v4877_v3, %v1262_v27  ;;  %3578 = vmatprep.subr.bf16.mxu0 %v2050_v7  ;;  %3982 = vpow2.f32 %v3307_v43  ;;  %3558 = vmatprep.subr.bf16.mxu1 %v3871_v40 }
 0x365   : > { %v3969_v53 = vpop.eup %3968  ;;  %3984 = vrcp.f32 %v1356_v52  ;;  %v1849_v52 = vadd.f32 %v5155_v13, %v5122_v38  ;;  %v1844_v13 = vadd.f32 %v5143_v36, %v5122_v38 }
 0x366   : > { %v3971_v29 = vpop.eup %3970  ;;  %v3308_v61 = vmul.f32 -1.442695, %v1298_v34  ;;  %1555 = vperm.xlu1 %3798, %v3969_v53  }
 0x367   : > { %v1357_v59 = vadd.f32 1.0, %v3971_v29  ;;  %v1264_v18 = vpop.permute.xlu0 %1263  ;;  %v3973_v3 = vpop.eup %3972  ;;  %3559 = vmatpush3.bf16.msra.mxu1 %v3871_v40  ;;  %v2048_v35 = vpack.c.bf16 %v1852_v24, %v1849_v52 }
 0x368   : > { %3986 = vpow2.f32 %v3308_v61  ;;  %v1299_v58 = vadd.f32 %v1264_v18, %v4902_v5  ;;  %v1360_v26 = vadd.f32 1.0, %v3973_v3  ;;  %v1841_v3 = vadd.f32 %v5134_v6, %v5122_v38 }
 0x369   : > { %v3975_v41 = vpop.eup %3974  ;;  %3988 = vrcp.f32 %v1357_v59 }
 0x36a   : > { %v3977_v11 = vpop.eup %3976  ;;  %v3309_v25 = vmul.f32 -1.442695, %v1299_v58  ;;  %1560 = vperm.xlu1 %3798, %v3975_v41   ;;  %3990 = vpow2.f32 %v3311_v22  ;;  %v2047_v41 = vpack.c.bf16 %v1844_v13, %v1841_v3  ;;  %v898_v13 = vadd.f32 %v5112_v57, %v5165_v23 }
 0x36b   : > { %v1358_v33 = vadd.f32 1.0, %v3977_v11  ;;  %3579 = vmatpush3.bf16.xpose.msra.mxu0 %v2050_v7  ;;  %v1266_v42 = vpop.permute.xlu0 %1265  ;;  %v5191_v7 = vpop.f32.mrf.mxu1 }
 0x36c   : > { %3992 = vpow2.f32 %v3309_v25  ;;  %v1300_v55 = vadd.f32 %v1266_v42, %v4925_v37  ;;  %3580 = vmatprep.subr.bf16.mxu0 %v2049_v50 }
 0x36d   : > { %v3979_v5 = vpop.eup %3978  ;;  %3994 = vrcp.f32 %v1358_v33  ;;  %v5196_v4 = vpop.f32.mrf.mxu1  ;;  %v1836_v33 = vadd.f32 %v5147_v48, %v5122_v38 }
 0x36e   : > { %v1359_v44 = vadd.f32 1.0, %v3979_v5  ;;  %v3310_v8 = vmul.f32 -1.442695, %v1300_v55  ;;  %v3981_v43 = vpop.eup %3980  ;;  %3996 = vrcp.f32 %v1360_v26  ;;  %v1833_v55 = vadd.f32 %v5140_v14, %v5122_v38 }
 0x36f   : > { %v1270_v27 = vpop.permute.xlu0 %1269  ;;  %1565 = vperm.xlu0 %3799, %v3981_v43  }
 0x370   : > { %3998 = vrcp.f32 %v1359_v44  ;;  %v1302_v37 = vadd.f32 %v4912_v56, %v1270_v27  ;;  %v5200_v56 = vpop.f32.mrf.mxu1  ;;  %v2046_v44 = vpack.c.bf16 %v1836_v33, %v1833_v55 }
 0x371   : > { %4000 = vpow2.f32 %v3310_v8  ;;  %v3983_v34 = vpop.eup %3982 }
 0x372   : > { %v3312_v53 = vmul.f32 -1.442695, %v1302_v37  ;;  %v3985_v29 = vpop.eup %3984  ;;  %v1361_v2 = vadd.f32 1.0, %v3983_v34 }
 0x373   : > { %3581 = vmatpush3.bf16.xpose.msra.mxu0 %v2049_v50  ;;  %1570 = vperm.xlu1 %3798, %v3985_v29   ;;  %v851_v50 = vpop.f32.mrf.mxu1 }
 0x374   : > { %4002 = vpow2.f32 %v3312_v53  ;;  %3582 = vmatprep.subr.bf16.mxu0 %v2048_v35 }
 0x375   : > { %v3987_v61 = vpop.eup %3986  ;;  %4004 = vrcp.f32 %v1361_v2  ;;  %v5206_v6 = vpop.f32.mrf.mxu1 }
 0x376   : > { %v3989_v22 = vpop.eup %3988  ;;  %v1362_v59 = vadd.f32 1.0, %v3987_v61  ;;  %v896_v61 = vadd.f32 %v5112_v57, %v5138_v54  ;;  %v901_v54 = vadd.f32 %v5112_v57, %v5196_v4 }
 0x377   : > { %1575 = vperm.xlu0 %3799, %v3989_v22   ;;  %v3991_v18 = vpop.eup %3990  ;;  %v855_v43 = vpop.f32.mrf.mxu1  ;;  %v897_v22 = vadd.f32 %v5112_v57, %v5152_v28  ;;  %v902_v28 = vadd.f32 %v5112_v57, %v851_v50 }
 0x378   : > { %4006 = vrcp.f32 %v1362_v59  ;;  %v1365_v40 = vadd.f32 1.0, %v3991_v18  ;;  %v903_v23 = vadd.f32 %v5112_v57, %v855_v43 }
 0x379   : > { %v3993_v63 = vpop.eup %3992  ;;  %v5210_v27 = vpop.f32.mrf.mxu1  ;;  %v2037_v18 = vpack.c.bf16 %v897_v22, %v896_v61  ;;  %v5858_v22 = vld [vmem:[#allocation23_spill] sm:$0xff] }
 0x37a   : > { %v3995_v58 = vpop.eup %3994  ;;  %v1363_v11 = vadd.f32 1.0, %v3993_v63  ;;  %v900_v63 = vadd.f32 %v5112_v57, %v5186_v39 }
 0x37b   : > { %1580 = vperm.xlu1 %3798, %v3995_v58   ;;  %3583 = vmatpush3.bf16.xpose.msra.mxu0 %v2048_v35  ;;  %v3997_v25 = vpop.eup %3996  ;;  %v861_v37 = vpop.f32.mrf.mxu1 }
 0x37c   : > { %4008 = vrcp.f32 %v1363_v11  ;;  %3584 = vmatprep.subr.bf16.mxu0 %v2047_v41 }
 0x37d   : > { %v3999_v36 = vpop.eup %3998  ;;  %4010 = vrcp.f32 %v1365_v40  ;;  %v5213_v34 = vpop.f32.mrf.mxu1 }
 0x37e   : > { %v4001_v26 = vpop.eup %4000  ;;  %1585 = vperm.xlu0 %3799, %v3999_v36  }
 0x37f   : > { %v1364_v42 = vadd.f32 1.0, %v4001_v26  ;;  %1590 = vperm.xlu1 %3798, %v3997_v25   ;;  %v865_v53 = vpop.f32.mrf.mxu1  ;;  %v904_v25 = vadd.f32 %v5112_v57, %v861_v37 }
 0x380   : > { %v905_v40 = vadd.f32 %v5112_v57, %v865_v53  ;;  %v4185_v53 = vld [vmem:[%s4565_s19 + $0x8] sm:$0xff] }
 0x381   : > { %v4003_v5 = vpop.eup %4002  ;;  %4012 = vrcp.f32 %v1364_v42  ;;  %v5217_v29 = vpop.f32.mrf.mxu1 }
 0x382   : > { %v4005_v24 = vpop.eup %4004  ;;  %v1366_v8 = vadd.f32 1.0, %v4003_v5  ;;  %v2041_v50 = vpack.c.bf16 %v905_v40, %v904_v25 }
 0x383   : > { %1595 = vperm.xlu0 %3799, %v4005_v24   ;;  %3585 = vmatpush3.bf16.xpose.msra.mxu0 %v2047_v41  ;;  %v871_v2 = vpop.f32.mrf.mxu1  ;;  %v2040_v41 = vpack.c.bf16 %v903_v23, %v902_v28  ;;  %v5855_v24 = vld [vmem:[#allocation17_spill] sm:$0xff]  ;;  %v4187_v23 = vld [vmem:[%s4565_s19 + $0x18] sm:$0xff] }
 0x384   : > { %4014 = vrcp.f32 %v1366_v8  ;;  %3586 = vmatprep.subr.bf16.mxu0 %v2046_v44  ;;  %v906_v39 = vadd.f32 %v5112_v57, %v871_v2  ;;  %v5856_v8 = vld [vmem:[#allocation27_spill] sm:$0xff] }
 0x385   : > { %v4007_v48 = vpop.eup %4006  ;;  %v5228_v59 = vpop.f32.mrf.mxu1 }
 0x386   : > { %1600 = vperm.xlu1 %3798, %v4007_v48   ;;  %v5857_v48 = vld [vmem:[#allocation22_spill] sm:$0xff] }
 0x389   : > { %v4009_v52 = vpop.eup %4008 }
 0x38a   : > { %1605 = vperm.xlu0 %3799, %v4009_v52   ;;  %v4011_v38 = vpop.eup %4010 }
 0x38b   : > { %3587 = vmatpush3.bf16.xpose.msra.mxu0 %v2046_v44  ;;  %v5248_v44 = vrot.slane %v5855_v24, %v4884_v10 }
 0x38c   : > { %3588 = vmatprep.subr.bf16.mxu0 %v5130_v30 }
 0x38d   : > { %v665_v43 = vmul.f32 %v5248_v44, %v5856_v8  ;;  %v666_v52 = vmul.f32 %v5248_v44, %v5857_v48  ;;  %v667_v61 = vmul.f32 %v5248_v44, %v4947_v31  ;;  %v669_v40 = vmul.f32 %v5248_v44, %v4955_v32 }
 0x38e   : > { %v4013_v14 = vpop.eup %4012  ;;  %1615 = vperm.xlu0 %3799, %v4011_v38   ;;  %v4184_v38 = vld [vmem:[%s4565_s19] sm:$0xff] }
 0x38f   : > { %1610 = vperm.xlu1 %3798, %v4013_v14   ;;  %v1527_v14 = vsub.f32 %v665_v43, %v4184_v38  ;;  %v5860_v43 = vld [vmem:[#allocation25_spill] sm:$0xff] }
 0x390   : > { %v671_v48 = vmul.f32 %v5248_v44, %v5860_v43  ;;  %v677_v43 = vmul.f32 %v5248_v44, %v4982_v51  ;;  %v4197_v51 = vld [vmem:[%s4565_s19 + $0x68] sm:$0xff] }
 0x391   : > { %v4015_v35 = vpop.eup %4014 }
 0x393   : > { %1620 = vperm.xlu1 %3798, %v4015_v35   ;;  %3589 = vmatpush3.bf16.xpose.msra.mxu0 %v5130_v30  ;;  %v899_v30 = vadd.f32 %v5112_v57, %v5176_v19  ;;  %v2039_v19 = vpack.c.bf16 %v901_v54, %v900_v63 }
 0x394   : > { %3590 = vmatprep.subr.bf16.mxu0 %v5136_v62 }
 0x395   : > { %v2038_v3 = vpack.c.bf16 %v899_v30, %v898_v13  ;;  %v668_v13 = vmul.f32 %v5248_v44, %v5858_v22 }
 0x39b   : > { %3591 = vmatpush3.bf16.xpose.msra.mxu0 %v5136_v62  ;;  %v875_v62 = vpop.f32.mrf.mxu1 }
 0x39c   : > { %v907_v4 = vadd.f32 %v5112_v57, %v875_v62  ;;  %v4186_v62 = vld [vmem:[%s4565_s19 + $0x10] sm:$0xff] }
 0x39d   : > { %v5236_v58 = vpop.f32.mrf.mxu1  ;;  %v1529_v63 = vsub.f32 %v667_v61, %v4186_v62  ;;  %v673_v61 = vmul.f32 %v5248_v44, %v4971_v45 }
 0x39e   : > { %v2042_v26 = vpack.c.bf16 %v907_v4, %v906_v39  ;;  %v5859_v4 = vld [vmem:[#allocation24_spill] sm:$0xff] }
 0x39f   : > { %v881_v11 = vpop.f32.mrf.mxu1 }
 0x3a0   : > { %v908_v42 = vadd.f32 %v5112_v57, %v881_v11 }
 0x3a1   : > { %v5242_v36 = vpop.f32.mrf.mxu1 }
 0x3a2   : > { %3593 = vmatmul.mubr.bf16.vlgmr.msra.gmra.mxu0 %v2037_v18 }
 0x3a3   : > { %3596 = vmatprep.mubr.bf16.mxu0 %v2038_v3  ;;  %v885_v33 = vpop.f32.mrf.mxu1 }
 0x3a4   : > { %v909_v55 = vadd.f32 %v5112_v57, %v885_v33  ;;  %v1528_v57 = vsub.f32 %v666_v52, %v4185_v53  ;;  %v4188_v33 = vld [vmem:[%s4565_s19 + $0x20] sm:$0xff] }
 0x3a6   : > { %v2043_v5 = vpack.c.bf16 %v909_v55, %v908_v42  ;;  %v1531_v42 = vsub.f32 %v669_v40, %v4188_v33  ;;  %v676_v40 = vmul.f32 %v5248_v44, %v4979_v20 }
 0x3aa   : > { %3597 = vmatmul.mubr.bf16.gmra.mxu0 %v2039_v19  ;;  %v1530_v19 = vsub.f32 %v668_v13, %v4187_v23  ;;  %v4191_v13 = vld [vmem:[%s4565_s19 + $0x38] sm:$0xff] }
 0x3ab   : > { %3600 = vmatprep.mubr.bf16.mxu0 %v2040_v41 }
 0x3b2   : > { %3601 = vmatmul.mubr.bf16.gmra.mxu0 %v2041_v50  ;;  %v670_v50 = vmul.f32 %v5248_v44, %v5859_v4 }
 0x3b3   : > { %3604 = vmatprep.mubr.bf16.mxu0 %v2042_v26 }
 0x3ba   : > { %3605 = vmatmul.mubr.bf16.gmra.mxu0 %v2043_v5  ;;  %v4189_v5 = vld [vmem:[%s4565_s19 + $0x28] sm:$0xff] }
 0x3bb   : > { %v1532_v24 = vsub.f32 %v670_v50, %v4189_v5  ;;  %v4194_v50 = vld [vmem:[%s4565_s19 + $0x50] sm:$0xff] }
 0x3d9   : > { %v1546_v37 = vpop.permute.xlu1 %1545 }
 0x3da   : > { %v1623_v35 = vmul.f32 %v1546_v37, %v1527_v14  ;;  %v5861_v37 = vld [vmem:[#allocation26_spill] sm:$0xff] }
 0x3db   : > { %v672_v32 = vmul.f32 %v5248_v44, %v5861_v37 }
 0x3dc   : > { %v1639_v30 = vadd.f32 %v4184_v38, %v1623_v35 }
 0x3dd   : > { %v1551_v2 = vpop.permute.xlu0 %1550 }
 0x3de   : > { %v1624_v10 = vmul.f32 %v1551_v2, %v1528_v57 }
 0x3e0   : > { %v1640_v18 = vadd.f32 %v4185_v53, %v1624_v10  ;;  %v4190_v53 = vld [vmem:[%s4565_s19 + $0x30] sm:$0xff]  ;;  %v674_v10 = vmul.f32 %v5248_v44, %v4974_v12  ;;  %v675_v12 = vmul.f32 %v5248_v44, %v4976_v46 }
 0x3e1   : > { %v1556_v3 = vpop.permute.xlu1 %1555  ;;  %v1533_v57 = vsub.f32 %v671_v48, %v4190_v53 }
 0x3e2   : > { %v1879_v54 = vpack.c.bf16 %v1640_v18, %v1639_v30  ;;  %v1625_v28 = vmul.f32 %v1556_v3, %v1529_v63  ;;  %v1534_v30 = vsub.f32 %v672_v32, %v4191_v13 }
 0x3e4   : > { %3560 = vmatprep.mubr.bf16.mxu1 %v1879_v54  ;;  %v1641_v25 = vadd.f32 %v4186_v62, %v1625_v28  ;;  %v4192_v62 = vld [vmem:[%s4565_s19 + $0x40] sm:$0xff] }
 0x3e5   : > { %v1561_v41 = vpop.permute.xlu1 %1560  ;;  %v1535_v63 = vsub.f32 %v673_v61, %v4192_v62 }
 0x3e6   : > { %v1626_v11 = vmul.f32 %v1561_v41, %v1530_v19 }
 0x3e8   : > { %v1642_v31 = vadd.f32 %v4187_v23, %v1626_v11  ;;  %v4193_v23 = vld [vmem:[%s4565_s19 + $0x48] sm:$0xff] }
 0x3e9   : > { %v1536_v19 = vsub.f32 %v674_v10, %v4193_v23 }
 0x3ea   : > { %v1880_v39 = vpack.c.bf16 %v1642_v31, %v1641_v25  ;;  %v1566_v26 = vpop.permute.xlu0 %1565 }
 0x3eb   : > { %v1627_v55 = vmul.f32 %v1566_v26, %v1531_v42  ;;  %v1537_v26 = vsub.f32 %v675_v12, %v4194_v50 }
 0x3ec   : > { %3561 = vmatmul.mubr.bf16.vlgmr.msra.gmra.mxu1 %v1880_v39 }
 0x3ed   : > { %v1643_v38 = vadd.f32 %v4188_v33, %v1627_v55 }
 0x3ee   : > { %v1571_v8 = vpop.permute.xlu1 %1570 }
 0x3ef   : > { %v1628_v52 = vmul.f32 %v1571_v8, %v1532_v24 }
 0x3f1   : > { %v1644_v14 = vadd.f32 %v4189_v5, %v1628_v52  ;;  %v4195_v5 = vld [vmem:[%s4565_s19 + $0x58] sm:$0xff]  ;;  %v678_v52 = vmul.f32 %v5248_v44, %v4984_v17 }
 0x3f2   : > { %v1576_v35 = vpop.permute.xlu0 %1575  ;;  %v1538_v24 = vsub.f32 %v676_v40, %v4195_v5 }
 0x3f3   : > { %v1881_v2 = vpack.c.bf16 %v1644_v14, %v1643_v38  ;;  %v1629_v22 = vmul.f32 %v1576_v35, %v1533_v57  ;;  %v4196_v38 = vld [vmem:[%s4565_s19 + $0x60] sm:$0xff]  ;;  %v679_v35 = vmul.f32 %v5248_v44, %v4992_v9 }
 0x3f4   : > { %v1539_v14 = vsub.f32 %v677_v43, %v4196_v38 }
 0x3f5   : > { %3564 = vmatprep.mubr.bf16.mxu1 %v1881_v2  ;;  %v1645_v54 = vadd.f32 %v4190_v53, %v1629_v22  ;;  %v680_v53 = vmul.f32 %v5248_v44, %v4996_v0  ;;  %v1540_v2 = vsub.f32 %v678_v52, %v4197_v51 }
 0x3f6   : > { %v1581_v18 = vpop.permute.xlu1 %1580 }
 0x3f7   : > { %v1630_v3 = vmul.f32 %v1581_v18, %v1534_v30 }
 0x3f9   : > { %v1646_v28 = vadd.f32 %v4191_v13, %v1630_v3  ;;  %v1586_v41 = vpop.permute.xlu0 %1585  ;;  %v4198_v13 = vld [vmem:[%s4565_s19 + $0x70] sm:$0xff] }
 0x3fa   : > { %v1591_v11 = vpop.permute.xlu1 %1590  ;;  %v1631_v45 = vmul.f32 %v1586_v41, %v1535_v63  ;;  %v1541_v17 = vsub.f32 %v679_v35, %v4198_v13 }
 0x3fb   : > { %v1632_v25 = vmul.f32 %v1591_v11, %v1536_v19  ;;  %v1882_v31 = vpack.c.bf16 %v1646_v28, %v1645_v54 }
 0x3fc   : > { %v1647_v39 = vadd.f32 %v4192_v62, %v1631_v45  ;;  %v4199_v62 = vld [vmem:[%s4565_s19 + $0x78] sm:$0xff] }
 0x3fd   : > { %v1648_v4 = vadd.f32 %v4193_v23, %v1632_v25  ;;  %3565 = vmatmul.mubr.bf16.gmra.mxu1 %v1882_v31  ;;  %v1542_v63 = vsub.f32 %v680_v53, %v4199_v62 }
 0x3fe   : > { %v1596_v33 = vpop.permute.xlu0 %1595 }
 0x3ff   : > { %v1883_v42 = vpack.c.bf16 %v1648_v4, %v1647_v39  ;;  %v1633_v55 = vmul.f32 %v1596_v33, %v1537_v26 }
 0x401   : > { %3568 = vmatprep.mubr.bf16.mxu1 %v1883_v42  ;;  %v1601_v8 = vpop.permute.xlu1 %1600  ;;  %v1649_v48 = vadd.f32 %v4194_v50, %v1633_v55 }
 0x402   : > { %v1634_v46 = vmul.f32 %v1601_v8, %v1538_v24 }
 0x404   : > { %v1650_v20 = vadd.f32 %v4195_v5, %v1634_v46 }
 0x405   : > { %v1606_v37 = vpop.permute.xlu0 %1605 }
 0x406   : > { %v1884_v32 = vpack.c.bf16 %v1650_v20, %v1649_v48  ;;  %v1635_v57 = vmul.f32 %v1606_v37, %v1539_v14 }
 0x408   : > { %3569 = vmatmul.mubr.bf16.gmra.mxu1 %v1884_v32  ;;  %v1651_v30 = vadd.f32 %v4196_v38, %v1635_v57 }
 0x409   : > { %v1616_v10 = vpop.permute.xlu0 %1615 }
 0x40a   : > { %v1611_v61 = vpop.permute.xlu1 %1610  ;;  %v1637_v3 = vmul.f32 %v1616_v10, %v1541_v17 }
 0x40b   : > { %v1636_v22 = vmul.f32 %v1611_v61, %v1540_v2  ;;  %v5346_v61 = vpop.f32.mrf.mxu1 }
 0x40c   : > { %v1653_v23 = vadd.f32 %v4198_v13, %v1637_v3 }
 0x40d   : > { %v1652_v18 = vadd.f32 %v4197_v51, %v1636_v22 }
 0x40e   : > { %v1621_v54 = vpop.permute.xlu1 %1620 }
 0x40f   : > { %v1638_v28 = vmul.f32 %v1621_v54, %v1542_v63  ;;  %v1885_v9 = vpack.c.bf16 %v1652_v18, %v1651_v30 }
 0x411   : > { %v1654_v19 = vadd.f32 %v4199_v62, %v1638_v28  ;;  %3572 = vmatprep.mubr.bf16.mxu1 %v1885_v9 }
 0x413   : > { %v1886_v0 = vpack.c.bf16 %v1654_v19, %v1653_v23  ;;  %v1889_v23 = vsub.s32 2, %v5853_v21 }
 0x415   : > { %3573 = vmatmul.mubr.bf16.gmra.mxu1 %v1886_v0 }
 0x462   : > { %v3594_v44 = vpop.f32.mrf.mxu0 }
 0x463   : > { %v5301_v25 = vmul.f32 0.088388346, %v3594_v44  ;;  %v5352_v44 = vld [vmem:[%s5781_s7] sm:$0xff] }
 0x464   : > { %v2086_v41 = vpop.f32.mrf.mxu0 }
 0x465   : > { %v5298_v11 = vmul.f32 0.088388346, %v2086_v41  ;;  %v1890_v41 = vrot.slane %v5352_v44, %v1889_v23 }
 0x466   : > { %v3595_v45 = vpop.f32.mrf.mxu0 }
 0x467   : > { %2165 = vmax.xlane.f32.xlu0 %v5298_v11  ;;  %v5307_v4 = vmul.f32 0.088388346, %v3595_v45 }
 0x468   : > { %v2089_v12 = vpop.f32.mrf.mxu0 }
 0x469   : > { %v5303_v31 = vmul.f32 0.088388346, %v2089_v12 }
 0x46a   : > { %v3598_v40 = vpop.f32.mrf.mxu0 }
 0x46b   : > { %2169 = vmax.xlane.f32.xlu0 %v5301_v25  ;;  %2167 = vmax.xlane.f32.xlu1 %v5303_v31  ;;  %v5313_v42 = vmul.f32 0.088388346, %v3598_v40 }
 0x46c   : > { %v2102_v39 = vpop.f32.mrf.mxu0 }
 0x46d   : > { %v5309_v50 = vmul.f32 0.088388346, %v2102_v39 }
 0x46e   : > { %v3599_v26 = vpop.f32.mrf.mxu0 }
 0x46f   : > { %2171 = vmax.xlane.f32.xlu0 %v5307_v4  ;;  %2173 = vmax.xlane.f32.xlu1 %v5309_v50  ;;  %v5319_v8 = vmul.f32 0.088388346, %v3599_v26 }
 0x470   : > { %v2105_v33 = vpop.f32.mrf.mxu0 }
 0x471   : > { %v5315_v55 = vmul.f32 0.088388346, %v2105_v33 }
 0x472   : > { %v3602_v5 = vpop.f32.mrf.mxu0 }
 0x473   : > { %2177 = vmax.xlane.f32.xlu1 %v5313_v42  ;;  %2175 = vmax.xlane.f32.xlu0 %v5315_v55  ;;  %v5325_v20 = vmul.f32 0.088388346, %v3602_v5 }
 0x474   : > { %v2118_v24 = vpop.f32.mrf.mxu0 }
 0x475   : > { %v5321_v46 = vmul.f32 0.088388346, %v2118_v24 }
 0x476   : > { %v3603_v43 = vpop.f32.mrf.mxu0 }
 0x477   : > { %2179 = vmax.xlane.f32.xlu0 %v5319_v8  ;;  %2181 = vmax.xlane.f32.xlu1 %v5321_v46  ;;  %v5331_v38 = vmul.f32 0.088388346, %v3603_v43 }
 0x478   : > { %v2121_v48 = vpop.f32.mrf.mxu0 }
 0x479   : > { %v5327_v52 = vmul.f32 0.088388346, %v2121_v48 }
 0x47a   : > { %v3606_v37 = vpop.f32.mrf.mxu0 }
 0x47b   : > { %2185 = vmax.xlane.f32.xlu1 %v5325_v20  ;;  %2183 = vmax.xlane.f32.xlu0 %v5327_v52  ;;  %v5337_v57 = vmul.f32 0.088388346, %v3606_v37 }
 0x47c   : > { %v2134_v32 = vpop.f32.mrf.mxu0 }
 0x47d   : > { %v5333_v14 = vmul.f32 0.088388346, %v2134_v32 }
 0x47e   : > { %v3607_v35 = vpop.f32.mrf.mxu0 }
 0x47f   : > { %2187 = vmax.xlane.f32.xlu0 %v5331_v38  ;;  %2189 = vmax.xlane.f32.xlu1 %v5333_v14  ;;  %v5343_v2 = vmul.f32 0.088388346, %v3607_v35 }
 0x480   : > { %v2137_v53 = vpop.f32.mrf.mxu0 }
 0x481   : > { %v5339_v51 = vmul.f32 0.088388346, %v2137_v53 }
 0x483   : > { %2193 = vmax.xlane.f32.xlu1 %v5337_v57  ;;  %2191 = vmax.xlane.f32.xlu0 %v5339_v51 }
 0x487   : > { %2195 = vmax.xlane.f32.xlu0 %v5343_v2 }
 0x4ac   : > { %v3562_v10 = vpop.f32.mrf.mxu1 }
 0x4ae   : > { %v1973_v22 = vpop.f32.mrf.mxu1 }
 0x4b0   : > { %v3563_v13 = vpop.f32.mrf.mxu1 }
 0x4b2   : > { %v1976_v17 = vpop.f32.mrf.mxu1 }
 0x4bd   : > { %v3566_v30 = vpop.f32.mrf.mxu1 }
 0x4bf   : > { %v1989_v18 = vpop.f32.mrf.mxu1 }
 0x4c1   : > { %v3567_v3 = vpop.f32.mrf.mxu1 }
 0x4c2   : > { %v2001_v53 = vadd.f32 %v3567_v3, %v1890_v41 }
 0x4c3   : > { %v1992_v62 = vpop.f32.mrf.mxu1 }
 0x4c8   : > { %v3570_v63 = vpop.f32.mrf.mxu1 }
 0x4c9   : > { %v2014_v48 = vadd.f32 %v3570_v63, %v1890_v41  ;;  %v1982_v63 = vadd.f32 %v3562_v10, %v1890_v41 }
 0x4ca   : > { %v2005_v54 = vpop.f32.mrf.mxu1 }
 0x4cb   : > { %v2006_v35 = vadd.f32 %v2005_v54, %v1890_v41 }
 0x4cc   : > { %v3571_v28 = vpop.f32.mrf.mxu1 }
 0x4cd   : > { %v2017_v24 = vadd.f32 %v3571_v28, %v1890_v41  ;;  %v1985_v28 = vadd.f32 %v3563_v13, %v1890_v41 }
 0x4ce   : > { %v2008_v9 = vpop.f32.mrf.mxu1 }
 0x4cf   : > { %v2290_v37 = vpack.c.bf16 %v2017_v24, %v2014_v48  ;;  %v2009_v32 = vadd.f32 %v2008_v9, %v1890_v41  ;;  %v2286_v54 = vpack.c.bf16 %v1985_v28, %v1982_v63 }
 0x4d1   : > { %v2289_v23 = vpack.c.bf16 %v2009_v32, %v2006_v35 }
 0x4d5   : > { %v3574_v19 = vpop.f32.mrf.mxu1 }
 0x4d6   : > { %v2030_v12 = vadd.f32 %v3574_v19, %v1890_v41  ;;  %v1998_v19 = vadd.f32 %v3566_v30, %v1890_v41 }
 0x4d7   : > { %v2021_v0 = vpop.f32.mrf.mxu1 }
 0x4d8   : > { %v2022_v26 = vadd.f32 %v2021_v0, %v1890_v41  ;;  %v1993_v0 = vadd.f32 %v1992_v62, %v1890_v41 }
 0x4d9   : > { %v3575_v45 = vpop.f32.mrf.mxu1 }
 0x4da   : > { %v2033_v40 = vadd.f32 %v3575_v45, %v1890_v41  ;;  %v2288_v45 = vpack.c.bf16 %v2001_v53, %v1998_v19 }
 0x4db   : > { %v2024_v39 = vpop.f32.mrf.mxu1 }
 0x4dc   : > { %v2292_v33 = vpack.c.bf16 %v2033_v40, %v2030_v12  ;;  %v2025_v5 = vadd.f32 %v2024_v39, %v1890_v41  ;;  %v1990_v12 = vadd.f32 %v1989_v18, %v1890_v41 }
 0x4de   : > { %v2291_v43 = vpack.c.bf16 %v2025_v5, %v2022_v26  ;;  %3608 = vmatprep.subr.bf16.mxu1 %v2292_v33  ;;  %v2287_v40 = vpack.c.bf16 %v1993_v0, %v1990_v12  ;;  %v1977_v26 = vadd.f32 %v1976_v17, %v1890_v41 }
 0x4df   : > { %3609 = vmatpush3.bf16.msra.mxu1 %v2292_v33  ;;  %v1974_v33 = vadd.f32 %v1973_v22, %v1890_v41 }
 0x4e0   : > { %3610 = vmatprep.subr.bf16.mxu1 %v2291_v43 }
 0x4e1   : > { %v2285_v62 = vpack.c.bf16 %v1977_v26, %v1974_v33 }
 0x4e3   : > { %3611 = vmatpush3.bf16.msra.mxu1 %v2291_v43 }
 0x4e4   : > { %3612 = vmatprep.subr.bf16.mxu1 %v2290_v37 }
 0x4e7   : > { %3613 = vmatpush3.bf16.msra.mxu1 %v2290_v37 }
 0x4e8   : > { %3614 = vmatprep.subr.bf16.mxu1 %v2289_v23 }
 0x4eb   : > { %3615 = vmatpush3.bf16.msra.mxu1 %v2289_v23 }
 0x4ec   : > { %3616 = vmatprep.subr.bf16.mxu1 %v2288_v45 }
 0x4ef   : > { %3617 = vmatpush3.bf16.msra.mxu1 %v2288_v45 }
 0x4f0   : > { %3618 = vmatprep.subr.bf16.mxu1 %v2287_v40  ;;  %v2166_v39 = vpop.xlane.xlu0 %2165 }
 0x4f1   : > { %v2197_v9 = vsub.f32 %v5298_v11, %v2166_v39 }
 0x4f3   : > { %v2213_v3 = vmul.f32 1.442695, %v2197_v9  ;;  %3619 = vmatpush3.bf16.msra.mxu1 %v2287_v40 }
 0x4f4   : > { %3620 = vmatprep.subr.bf16.mxu1 %v2286_v54  ;;  %v2170_v30 = vpop.xlane.xlu0 %2169  ;;  %v2168_v5 = vpop.xlane.xlu1 %2167 }
 0x4f5   : > { %4016 = vpow2.f32 %v2213_v3  ;;  %v2199_v18 = vsub.f32 %v5301_v25, %v2170_v30  ;;  %v2198_v13 = vsub.f32 %v5303_v31, %v2168_v5 }
 0x4f7   : > { %v2217_v24 = vmul.f32 1.442695, %v2199_v18  ;;  %v2215_v10 = vmul.f32 1.442695, %v2198_v13  ;;  %3621 = vmatpush3.bf16.msra.mxu1 %v2286_v54 }
 0x4f8   : > { %3622 = vmatprep.subr.bf16.mxu1 %v2285_v62  ;;  %v2172_v43 = vpop.xlane.xlu0 %2171  ;;  %v2174_v11 = vpop.xlane.xlu1 %2173 }
 0x4f9   : > { %4018 = vpow2.f32 %v2217_v24  ;;  %v2200_v17 = vsub.f32 %v5307_v4, %v2172_v43  ;;  %v2201_v22 = vsub.f32 %v5309_v50, %v2174_v11 }
 0x4fa   : > { %4020 = vpow2.f32 %v2215_v10 }
 0x4fb   : > { %v2219_v41 = vmul.f32 1.442695, %v2200_v17  ;;  %v2221_v48 = vmul.f32 1.442695, %v2201_v22  ;;  %3623 = vmatpush3.bf16.msra.mxu1 %v2285_v62 }
 0x4fc   : > { %v2178_v37 = vpop.xlane.xlu1 %2177  ;;  %v2176_v25 = vpop.xlane.xlu0 %2175 }
 0x4fd   : > { %4022 = vpow2.f32 %v2219_v41  ;;  %v2203_v31 = vsub.f32 %v5313_v42, %v2178_v37  ;;  %v2202_v32 = vsub.f32 %v5315_v55, %v2176_v25 }
 0x4fe   : > { %4024 = vpow2.f32 %v2221_v48 }
 0x4ff   : > { %v2225_v35 = vmul.f32 1.442695, %v2203_v31  ;;  %v2223_v53 = vmul.f32 1.442695, %v2202_v32 }
 0x500   : > { %v2180_v23 = vpop.xlane.xlu0 %2179  ;;  %v2182_v19 = vpop.xlane.xlu1 %2181 }
 0x501   : > { %4026 = vpow2.f32 %v2225_v35  ;;  %v2204_v4 = vsub.f32 %v5319_v8, %v2180_v23  ;;  %v2205_v50 = vsub.f32 %v5321_v46, %v2182_v19 }
 0x502   : > { %v4017_v45 = vpop.eup %4016  ;;  %4028 = vpow2.f32 %v2223_v53 }
 0x503   : > { %v2227_v0 = vmul.f32 1.442695, %v2204_v4  ;;  %v2229_v12 = vmul.f32 1.442695, %v2205_v50  ;;  %2245 = vadd.xlane.f32.xlu1 %v4017_v45 }
 0x504   : > { %v2186_v28 = vpop.xlane.xlu1 %2185  ;;  %v2184_v40 = vpop.xlane.xlu0 %2183 }
 0x505   : > { %4030 = vpow2.f32 %v2227_v0  ;;  %v2207_v42 = vsub.f32 %v5325_v20, %v2186_v28  ;;  %v2206_v55 = vsub.f32 %v5327_v52, %v2184_v40  ;;  %v3872_v0 = vld [vmem:[#allocation7 + $0xb8] sm:$0xff]   ;;  %v3874_v28 = vld [vmem:[#allocation7 + $0xa8] sm:$0xff]   ;;  %v3875_v40 = vld [vmem:[#allocation7 + $0xa0] sm:$0xff]  }
 0x506   : > { %v4019_v63 = vpop.eup %4018  ;;  %4032 = vpow2.f32 %v2229_v12  ;;  %v3873_v12 = vld [vmem:[#allocation7 + $0xb0] sm:$0xff]   ;;  %3640 = vmatprep.subr.bf16.mxu1 %v3872_v0 }
 0x507   : > { %v4021_v39 = vpop.eup %4020  ;;  %v2233_v9 = vmul.f32 1.442695, %v2207_v42  ;;  %v2231_v54 = vmul.f32 1.442695, %v2206_v55  ;;  %2249 = vadd.xlane.f32.xlu1 %v4019_v63  ;;  %v3876_v42 = vld [vmem:[#allocation7 + $0x98] sm:$0xff]   ;;  %v3877_v55 = vld [vmem:[#allocation7 + $0x90] sm:$0xff]  }
 0x508   : > { %2247 = vadd.xlane.f32.xlu0 %v4021_v39  ;;  %v2188_v8 = vpop.xlane.xlu0 %2187  ;;  %v2190_v46 = vpop.xlane.xlu1 %2189  ;;  %v2277_v26 = vpack.c.bf16 %v4021_v39, %v4017_v45  ;;  %v3879_v39 = vld [vmem:[#allocation7 + $0x80] sm:$0xff]  }
 0x509   : > { %4034 = vpow2.f32 %v2233_v9  ;;  %v2208_v3 = vsub.f32 %v5331_v38, %v2188_v8  ;;  %v2209_v33 = vsub.f32 %v5333_v14, %v2190_v46  ;;  %v5371_v9 = vld [vmem:[#allocation7 + $0xf8] sm:$0xff]   ;;  %v5379_v8 = vld [vmem:[#allocation7 + $0xe8] sm:$0xff]   ;;  %v5383_v46 = vld [vmem:[#allocation7 + $0xe0] sm:$0xff]  }
 0x50a   : > { %v4023_v30 = vpop.eup %4022  ;;  %4036 = vpow2.f32 %v2231_v54  ;;  %3624 = vmatprep.mubr.bf16.mxu1 %v2277_v26  ;;  %v5373_v54 = vld [vmem:[#allocation7 + $0xf0] sm:$0xff]   ;;  %3672 = vmatprep.subr.bf16.mxu0 %v5371_v9  ;;  %v5387_v26 = vld [vmem:[#allocation7 + $0xd8] sm:$0xff]  }
 0x50b   : > { %v4025_v20 = vpop.eup %4024  ;;  %v2235_v52 = vmul.f32 1.442695, %v2208_v3  ;;  %v2237_v5 = vmul.f32 1.442695, %v2209_v33  ;;  %v2278_v18 = vpack.c.bf16 %v4023_v30, %v4019_v63  ;;  %v3878_v63 = vld [vmem:[#allocation7 + $0x88] sm:$0xff]   ;;  %3673 = vmatpush3.bf16.msra.mxu0 %v5371_v9 }
 0x50c   : > { %2253 = vadd.xlane.f32.xlu1 %v4025_v20  ;;  %2251 = vadd.xlane.f32.xlu0 %v4023_v30  ;;  %v2194_v13 = vpop.xlane.xlu1 %2193  ;;  %v2192_v62 = vpop.xlane.xlu0 %2191 }
 0x50d   : > { %4038 = vpow2.f32 %v2235_v52  ;;  %v2211_v24 = vsub.f32 %v5337_v57, %v2194_v13  ;;  %v2210_v10 = vsub.f32 %v5339_v51, %v2192_v62  ;;  %3625 = vmatmul.mubr.bf16.vlgmr.msra.gmra.mxu1 %v2278_v18  ;;  %3674 = vmatprep.subr.bf16.mxu0 %v5373_v54 }
 0x50e   : > { %v4027_v38 = vpop.eup %4026  ;;  %4040 = vpow2.f32 %v2237_v5  ;;  %3641 = vmatpush3.bf16.msra.mxu1 %v3872_v0 }
 0x50f   : > { %v4029_v14 = vpop.eup %4028  ;;  %v2241_v43 = vmul.f32 1.442695, %v2211_v24  ;;  %v2239_v11 = vmul.f32 1.442695, %v2210_v10  ;;  %3642 = vmatprep.subr.bf16.mxu1 %v3873_v12  ;;  %3675 = vmatpush3.bf16.msra.mxu0 %v5373_v54 }
 0x510   : > { %2257 = vadd.xlane.f32.xlu1 %v4027_v38  ;;  %2255 = vadd.xlane.f32.xlu0 %v4029_v14  ;;  %v2196_v17 = vpop.xlane.xlu0 %2195  ;;  %v2279_v22 = vpack.c.bf16 %v4029_v14, %v4025_v20 }
 0x511   : > { %4042 = vpow2.f32 %v2241_v43  ;;  %v2212_v41 = vsub.f32 %v5343_v2, %v2196_v17  ;;  %3676 = vmatprep.subr.bf16.mxu0 %v5379_v8 }
 0x512   : > { %v4031_v48 = vpop.eup %4030  ;;  %4044 = vpow2.f32 %v2239_v11  ;;  %3628 = vmatprep.mubr.bf16.mxu1 %v2279_v22  ;;  %3643 = vmatpush3.bf16.msra.mxu1 %v3873_v12 }
 0x513   : > { %v4033_v37 = vpop.eup %4032  ;;  %v2243_v57 = vmul.f32 1.442695, %v2212_v41  ;;  %v2280_v25 = vpack.c.bf16 %v4031_v48, %v4027_v38  ;;  %3644 = vmatprep.subr.bf16.mxu1 %v3874_v28  ;;  %3677 = vmatpush3.bf16.msra.mxu0 %v5379_v8 }
 0x514   : > { %2261 = vadd.xlane.f32.xlu1 %v4033_v37  ;;  %2259 = vadd.xlane.f32.xlu0 %v4031_v48 }
 0x515   : > { %4046 = vpow2.f32 %v2243_v57  ;;  %3629 = vmatmul.mubr.bf16.gmra.mxu1 %v2280_v25  ;;  %3678 = vmatprep.subr.bf16.mxu0 %v5383_v46 }
 0x516   : > { %v4035_v51 = vpop.eup %4034  ;;  %3645 = vmatpush3.bf16.msra.mxu1 %v3874_v28 }
 0x517   : > { %v4037_v31 = vpop.eup %4036  ;;  %3646 = vmatprep.subr.bf16.mxu1 %v3875_v40  ;;  %3679 = vmatpush3.bf16.msra.mxu0 %v5383_v46 }
 0x518   : > { %2265 = vadd.xlane.f32.xlu1 %v4035_v51  ;;  %2263 = vadd.xlane.f32.xlu0 %v4037_v31  ;;  %v2281_v32 = vpack.c.bf16 %v4037_v31, %v4033_v37 }
 0x519   : > { %3680 = vmatprep.subr.bf16.mxu0 %v5387_v26 }
 0x51a   : > { %v4039_v35 = vpop.eup %4038  ;;  %3632 = vmatprep.mubr.bf16.mxu1 %v2281_v32  ;;  %3647 = vmatpush3.bf16.msra.mxu1 %v3875_v40 }
 0x51b   : > { %v4041_v53 = vpop.eup %4040  ;;  %v2282_v23 = vpack.c.bf16 %v4039_v35, %v4035_v51  ;;  %3648 = vmatprep.subr.bf16.mxu1 %v3876_v42  ;;  %3681 = vmatpush3.bf16.msra.mxu0 %v5387_v26 }
 0x51c   : > { %2269 = vadd.xlane.f32.xlu1 %v4041_v53  ;;  %2267 = vadd.xlane.f32.xlu0 %v4039_v35 }
 0x51d   : > { %3633 = vmatmul.mubr.bf16.gmra.mxu1 %v2282_v23 }
 0x51e   : > { %v4043_v2 = vpop.eup %4042  ;;  %3649 = vmatpush3.bf16.msra.mxu1 %v3876_v42 }
 0x51f   : > { %v4045_v19 = vpop.eup %4044  ;;  %3650 = vmatprep.subr.bf16.mxu1 %v3877_v55 }
 0x520   : > { %2273 = vadd.xlane.f32.xlu1 %v4043_v2  ;;  %2271 = vadd.xlane.f32.xlu0 %v4045_v19  ;;  %v2283_v4 = vpack.c.bf16 %v4045_v19, %v4041_v53 }
 0x522   : > { %v4047_v50 = vpop.eup %4046  ;;  %3636 = vmatprep.mubr.bf16.mxu1 %v2283_v4  ;;  %3651 = vmatpush3.bf16.msra.mxu1 %v3877_v55 }
 0x523   : > { %v2284_v45 = vpack.c.bf16 %v4047_v50, %v4043_v2  ;;  %3652 = vmatprep.subr.bf16.mxu1 %v3878_v63 }
 0x524   : > { %2275 = vadd.xlane.f32.xlu0 %v4047_v50 }
 0x525   : > { %3637 = vmatmul.mubr.bf16.gmra.mxu1 %v2284_v45 }
 0x526   : > { %3653 = vmatpush3.bf16.msra.mxu1 %v3878_v63 }
 0x527   : > { %3654 = vmatprep.subr.bf16.mxu1 %v3879_v39 }
 0x52a   : > { %3655 = vmatpush3.bf16.msra.mxu1 %v3879_v39 }
 0x52b   : > { %3704 = vmatprep.subr.bf16.mxu1 %v5371_v9 }
 0x58c   : > { %v2246_v33 = vpop.xlane.xlu1 %2245 }
 0x58d   : > { %4048 = vrcp.f32 %v2246_v33 }
 0x590   : > { %v2250_v20 = vpop.xlane.xlu1 %2249 }
 0x591   : > { %v2248_v3 = vpop.xlane.xlu0 %2247 }
 0x595   : > { %v2252_v30 = vpop.xlane.xlu0 %2251  ;;  %v2254_v5 = vpop.xlane.xlu1 %2253 }
 0x596   : > { %4050 = vrcp.f32 %v2252_v30 }
 0x597   : > { %4052 = vrcp.f32 %v2248_v3 }
 0x598   : > { %4054 = vrcp.f32 %v2250_v20 }
 0x599   : > { %v2256_v52 = vpop.xlane.xlu0 %2255  ;;  %v2258_v13 = vpop.xlane.xlu1 %2257  ;;  %4056 = vrcp.f32 %v2254_v5 }
 0x59a   : > { %v4049_v11 = vpop.eup %4048 }
 0x59d   : > { %v2260_v18 = vpop.xlane.xlu0 %2259  ;;  %v2262_v24 = vpop.xlane.xlu1 %2261 }
 0x59e   : > { %4058 = vrcp.f32 %v2260_v18 }
 0x59f   : > { %4060 = vrcp.f32 %v2256_v52 }
 0x5a0   : > { %4062 = vrcp.f32 %v2258_v13 }
 0x5a1   : > { %v2264_v62 = vpop.xlane.xlu0 %2263  ;;  %v2266_v43 = vpop.xlane.xlu1 %2265  ;;  %4064 = vrcp.f32 %v2262_v24 }
 0x5a3   : > { %v4051_v22 = vpop.eup %4050 }
 0x5a4   : > { %v4053_v41 = vpop.eup %4052 }
 0x5a5   : > { %v2268_v38 = vpop.xlane.xlu0 %2267  ;;  %v4055_v57 = vpop.eup %4054 }
 0x5a6   : > { %4066 = vrcp.f32 %v2268_v38  ;;  %v2270_v53 = vpop.xlane.xlu1 %2269  ;;  %v4057_v4 = vpop.eup %4056 }
 0x5a7   : > { %4068 = vrcp.f32 %v2264_v62 }
 0x5a8   : > { %4070 = vrcp.f32 %v2266_v43 }
 0x5a9   : > { %v2272_v25 = vpop.xlane.xlu0 %2271  ;;  %4072 = vrcp.f32 %v2270_v53 }
 0x5aa   : > { %v2274_v55 = vpop.xlane.xlu1 %2273 }
 0x5ab   : > { %v4059_v45 = vpop.eup %4058 }
 0x5ac   : > { %v4061_v12 = vpop.eup %4060 }
 0x5ad   : > { %v2276_v0 = vpop.xlane.xlu0 %2275  ;;  %v4063_v42 = vpop.eup %4062 }
 0x5ae   : > { %4074 = vrcp.f32 %v2276_v0  ;;  %v4065_v52 = vpop.eup %4064 }
 0x5af   : > { %4076 = vrcp.f32 %v2272_v25 }
 0x5b0   : > { %4078 = vrcp.f32 %v2274_v55 }
 0x5b3   : > { %v4067_v18 = vpop.eup %4066 }
 0x5b4   : > { %v4069_v13 = vpop.eup %4068 }
 0x5cd   : > { %v3626_v10 = vpop.f32.mrf.mxu1 }
 0x5ce   : > { %v2408_v32 = vmul.f32 %v4055_v57, %v3626_v10  ;;  %v4071_v10 = vpop.eup %4070 }
 0x5cf   : > { %v2327_v14 = vpop.f32.mrf.mxu1 }
 0x5d0   : > { %v2406_v51 = vmul.f32 %v4049_v11, %v2327_v14 }
 0x5d1   : > { %v3627_v17 = vpop.f32.mrf.mxu1 }
 0x5d2   : > { %v2409_v48 = vmul.f32 %v4051_v22, %v3627_v17 }
 0x5d3   : > { %v2330_v37 = vpop.f32.mrf.mxu1 }
 0x5d4   : > { %v2407_v31 = vmul.f32 %v4053_v41, %v2330_v37  ;;  %v2423_v2 = vpack.c.bf16 %v2409_v48, %v2408_v32  ;;  %v4073_v41 = vpop.eup %4072 }
 0x5d5   : > { %v3630_v35 = vpop.f32.mrf.mxu1  ;;  %v4075_v48 = vpop.eup %4074 }
 0x5d6   : > { %v2422_v23 = vpack.c.bf16 %v2407_v31, %v2406_v51  ;;  %v2412_v3 = vmul.f32 %v4063_v42, %v3630_v35  ;;  %v4077_v37 = vpop.eup %4076 }
 0x5d7   : > { %v2343_v19 = vpop.f32.mrf.mxu1  ;;  %v4079_v51 = vpop.eup %4078 }
 0x5d8   : > { %3656 = vmatprep.mubr.bf16.mxu1 %v2422_v23  ;;  %v2410_v63 = vmul.f32 %v4057_v4, %v2343_v19  ;;  %v3885_v23 = vld [vmem:[#allocation7 + $0xd0] sm:$0xff]   ;;  %v3887_v19 = vld [vmem:[#allocation7 + $0xc0] sm:$0xff]  }
 0x5d9   : > { %v3631_v50 = vpop.f32.mrf.mxu1  ;;  %3657 = vmatmul.mubr.bf16.vlgmr.msra.gmra.mxu1 %v2423_v2  ;;  %3682 = vmatprep.subr.bf16.mxu0 %v3885_v23  ;;  %v3886_v2 = vld [vmem:[#allocation7 + $0xc8] sm:$0xff]  }
 0x5da   : > { %3712 = vmatpush3.bf16.msra.mxu1 %v5371_v9  ;;  %v2413_v28 = vmul.f32 %v4059_v45, %v3631_v50  ;;  %3683 = vmatpush3.bf16.msra.mxu0 %v3885_v23 }
 0x5db   : > { %v2346_v40 = vpop.f32.mrf.mxu1  ;;  %3705 = vmatprep.subr.bf16.mxu1 %v5373_v54  ;;  %3684 = vmatprep.subr.bf16.mxu0 %v3886_v2 }
 0x5dc   : > { %v2411_v39 = vmul.f32 %v4061_v12, %v2346_v40  ;;  %v2425_v20 = vpack.c.bf16 %v2413_v28, %v2412_v3 }
 0x5dd   : > { %v3634_v33 = vpop.f32.mrf.mxu1 }
 0x5de   : > { %v2424_v30 = vpack.c.bf16 %v2411_v39, %v2410_v63  ;;  %3713 = vmatpush3.bf16.msra.mxu1 %v5373_v54  ;;  %v2416_v14 = vmul.f32 %v4071_v10, %v3634_v33  ;;  %3685 = vmatpush3.bf16.msra.mxu0 %v3886_v2 }
 0x5df   : > { %v2359_v9 = vpop.f32.mrf.mxu1  ;;  %3706 = vmatprep.subr.bf16.mxu1 %v5379_v8  ;;  %3686 = vmatprep.subr.bf16.mxu0 %v3887_v19 }
 0x5e0   : > { %3660 = vmatprep.mubr.bf16.mxu1 %v2424_v30  ;;  %v2414_v38 = vmul.f32 %v4065_v52, %v2359_v9 }
 0x5e1   : > { %v3635_v5 = vpop.f32.mrf.mxu1  ;;  %3661 = vmatmul.mubr.bf16.gmra.mxu1 %v2425_v20 }
 0x5e2   : > { %3714 = vmatpush3.bf16.msra.mxu1 %v5379_v8  ;;  %v2417_v62 = vmul.f32 %v4067_v18, %v3635_v5  ;;  %3687 = vmatpush3.bf16.msra.mxu0 %v3887_v19 }
 0x5e3   : > { %v2362_v24 = vpop.f32.mrf.mxu1  ;;  %3707 = vmatprep.subr.bf16.mxu1 %v5383_v46 }
 0x5e4   : > { %v2415_v54 = vmul.f32 %v4069_v13, %v2362_v24  ;;  %v2427_v17 = vpack.c.bf16 %v2417_v62, %v2416_v14 }
 0x5e5   : > { %v3638_v43 = vpop.f32.mrf.mxu1 }
 0x5e6   : > { %v2426_v11 = vpack.c.bf16 %v2415_v54, %v2414_v38  ;;  %3715 = vmatpush3.bf16.msra.mxu1 %v5383_v46  ;;  %v2420_v35 = vmul.f32 %v4079_v51, %v3638_v43 }
 0x5e7   : > { %v2375_v22 = vpop.f32.mrf.mxu1  ;;  %3708 = vmatprep.subr.bf16.mxu1 %v5387_v26 }
 0x5e8   : > { %3664 = vmatprep.mubr.bf16.mxu1 %v2426_v11  ;;  %v2418_v31 = vmul.f32 %v4073_v41, %v2375_v22 }
 0x5e9   : > { %v3639_v8 = vpop.f32.mrf.mxu1  ;;  %3665 = vmatmul.mubr.bf16.gmra.mxu1 %v2427_v17 }
 0x5ea   : > { %3716 = vmatpush3.bf16.msra.mxu1 %v5387_v26  ;;  %v2421_v57 = vmul.f32 %v4075_v48, %v3639_v8  ;;  %v2432_v26 = vsub.s32 3, %v5853_v21 }
 0x5eb   : > { %v2378_v25 = vpop.f32.mrf.mxu1  ;;  %3709 = vmatprep.subr.bf16.mxu1 %v3885_v23 }
 0x5ec   : > { %v2419_v32 = vmul.f32 %v4077_v37, %v2378_v25  ;;  %v2429_v46 = vpack.c.bf16 %v2421_v57, %v2420_v35  ;;  %v2433_v45 = vrot.slane %v5352_v44, %v2432_v26 }
 0x5ee   : > { %v2428_v53 = vpack.c.bf16 %v2419_v32, %v2418_v31  ;;  %3717 = vmatpush3.bf16.msra.mxu1 %v3885_v23 }
 0x5ef   : > { %3710 = vmatprep.subr.bf16.mxu1 %v3886_v2 }
 0x5f0   : > { %3668 = vmatprep.mubr.bf16.mxu1 %v2428_v53 }
 0x5f1   : > { %3669 = vmatmul.mubr.bf16.gmra.mxu1 %v2429_v46  ;;  %v2734_v46 = vsub.s32 4, %v5853_v21 }
 0x5f2   : > { %3718 = vmatpush3.bf16.msra.mxu1 %v3886_v2 }
 0x5f3   : > { %3711 = vmatprep.subr.bf16.mxu1 %v3887_v19  ;;  %v5453_v23 = vrot.slane %v5352_v44, %v2734_v46 }
 0x5f6   : > { %3719 = vmatpush3.bf16.msra.mxu1 %v3887_v19 }
 0x699   : > { %v3658_v4 = vpop.f32.mrf.mxu1 }
 0x69a   : > { %v5409_v55 = vadd.f32 %v3658_v4, %v2433_v45 }
 0x69b   : > { %v2516_v50 = vpop.f32.mrf.mxu1 }
 0x69c   : > { %v5405_v40 = vadd.f32 %v2516_v50, %v2433_v45 }
 0x69d   : > { %v3659_v0 = vpop.f32.mrf.mxu1 }
 0x69e   : > { %v5403_v12 = vadd.f32 %v3659_v0, %v2433_v45 }
 0x69f   : > { %v2519_v28 = vpop.f32.mrf.mxu1 }
 0x6a0   : > { %v5407_v42 = vadd.f32 %v2519_v28, %v2433_v45  ;;  %v2580_v3 = vpack.c.bf16 %v5403_v12, %v5409_v55 }
 0x6a1   : > { %v3662_v63 = vpop.f32.mrf.mxu1 }
 0x6a2   : > { %v2579_v39 = vpack.c.bf16 %v5407_v42, %v5405_v40  ;;  %v5421_v18 = vadd.f32 %v3662_v63, %v2433_v45 }
 0x6a3   : > { %v2532_v33 = vpop.f32.mrf.mxu1 }
 0x6a4   : > { %3688 = vmatprep.mubr.bf16.mxu0 %v2579_v39  ;;  %v5417_v52 = vadd.f32 %v2532_v33, %v2433_v45 }
 0x6a5   : > { %v3663_v30 = vpop.f32.mrf.mxu1  ;;  %3689 = vmatmul.mubr.bf16.vlgmr.msra.gmra.mxu0 %v2580_v3 }
 0x6a6   : > { %v5415_v20 = vadd.f32 %v3663_v30, %v2433_v45 }
 0x6a7   : > { %v2535_v9 = vpop.f32.mrf.mxu1 }
 0x6a8   : > { %v5419_v5 = vadd.f32 %v2535_v9, %v2433_v45  ;;  %v2582_v24 = vpack.c.bf16 %v5415_v20, %v5421_v18 }
 0x6a9   : > { %v3666_v13 = vpop.f32.mrf.mxu1 }
 0x6aa   : > { %v2581_v62 = vpack.c.bf16 %v5419_v5, %v5417_v52  ;;  %v5433_v17 = vadd.f32 %v3666_v13, %v2433_v45 }
 0x6ab   : > { %v2548_v10 = vpop.f32.mrf.mxu1 }
 0x6ac   : > { %3692 = vmatprep.mubr.bf16.mxu0 %v2581_v62  ;;  %v5429_v43 = vadd.f32 %v2548_v10, %v2433_v45 }
 0x6ad   : > { %v3667_v38 = vpop.f32.mrf.mxu1  ;;  %3693 = vmatmul.mubr.bf16.gmra.mxu0 %v2582_v24 }
 0x6ae   : > { %v5427_v54 = vadd.f32 %v3667_v38, %v2433_v45 }
 0x6af   : > { %v2551_v14 = vpop.f32.mrf.mxu1 }
 0x6b0   : > { %v5431_v11 = vadd.f32 %v2551_v14, %v2433_v45  ;;  %v2584_v8 = vpack.c.bf16 %v5427_v54, %v5433_v17 }
 0x6b1   : > { %v3670_v22 = vpop.f32.mrf.mxu1 }
 0x6b2   : > { %v2583_v41 = vpack.c.bf16 %v5431_v11, %v5429_v43  ;;  %v5445_v32 = vadd.f32 %v3670_v22, %v2433_v45 }
 0x6b3   : > { %v2564_v48 = vpop.f32.mrf.mxu1 }
 0x6b4   : > { %3696 = vmatprep.mubr.bf16.mxu1 %v2583_v41  ;;  %v5441_v51 = vadd.f32 %v2564_v48, %v2433_v45 }
 0x6b5   : > { %v3671_v37 = vpop.f32.mrf.mxu1  ;;  %3697 = vmatmul.mubr.bf16.vlgmr.msra.gmra.mxu1 %v2584_v8 }
 0x6b6   : > { %v5439_v57 = vadd.f32 %v3671_v37, %v2433_v45 }
 0x6b7   : > { %v2567_v25 = vpop.f32.mrf.mxu1 }
 0x6b8   : > { %v5443_v31 = vadd.f32 %v2567_v25, %v2433_v45  ;;  %v2586_v53 = vpack.c.bf16 %v5439_v57, %v5445_v32 }
 0x6ba   : > { %v2585_v35 = vpack.c.bf16 %v5443_v31, %v5441_v51 }
 0x6bc   : > { %3700 = vmatprep.mubr.bf16.mxu1 %v2585_v35 }
 0x6bd   : > { %3701 = vmatmul.mubr.bf16.gmra.mxu1 %v2586_v53 }
 0x765   : > { %v3690_v2 = vpop.f32.mrf.mxu0 }
 0x766   : > { %v2678_v19 = vadd.f32 %v3690_v2, %v5145_v16 }
 0x767   : > { %v2669_v26 = vpop.f32.mrf.mxu0 }
 0x768   : > { %v2738_v4 = vadd.f32 %v5453_v23, %v2678_v19  ;;  %v2670_v50 = vadd.f32 %v2669_v26, %v5114_v15 }
 0x769   : > { %v3691_v45 = vpop.f32.mrf.mxu0 }
 0x76a   : > { %v3347_v0 = vmul.f32 -1.442695, %v2738_v4  ;;  %v2736_v28 = vadd.f32 %v5453_v23, %v2670_v50  ;;  %v2681_v63 = vadd.f32 %v3691_v45, %v5160_v49 }
 0x76b   : > { %v2672_v39 = vpop.f32.mrf.mxu0 }
 0x76c   : > { %4080 = vpow2.f32 %v3347_v0  ;;  %v3345_v3 = vmul.f32 -1.442695, %v2736_v28  ;;  %v2739_v44 = vadd.f32 %v5453_v23, %v2681_v63  ;;  %v2673_v33 = vadd.f32 %v2672_v39, %v5127_v60 }
 0x76d   : > { %v3694_v30 = vpop.f32.mrf.mxu0 }
 0x76e   : > { %4082 = vpow2.f32 %v3345_v3  ;;  %v3348_v16 = vmul.f32 -1.442695, %v2739_v44  ;;  %v2737_v9 = vadd.f32 %v5453_v23, %v2673_v33  ;;  %v2694_v15 = vadd.f32 %v3694_v30, %v5191_v7 }
 0x76f   : > { %v2685_v13 = vpop.f32.mrf.mxu0 }
 0x770   : > { %4084 = vpow2.f32 %v3348_v16  ;;  %v3346_v62 = vmul.f32 -1.442695, %v2737_v9  ;;  %v2742_v24 = vadd.f32 %v5453_v23, %v2694_v15  ;;  %v2686_v49 = vadd.f32 %v2685_v13, %v5170_v1 }
 0x771   : > { %v3695_v10 = vpop.f32.mrf.mxu0 }
 0x772   : > { %4086 = vpow2.f32 %v3346_v62  ;;  %v3351_v38 = vmul.f32 -1.442695, %v2742_v24  ;;  %v2740_v14 = vadd.f32 %v5453_v23, %v2686_v49  ;;  %v2697_v60 = vadd.f32 %v3695_v10, %v5200_v56 }
 0x773   : > { %v2688_v22 = vpop.f32.mrf.mxu0 }
 0x774   : > { %4088 = vpow2.f32 %v3351_v38  ;;  %v3349_v41 = vmul.f32 -1.442695, %v2740_v14  ;;  %v2743_v8 = vadd.f32 %v5453_v23, %v2697_v60  ;;  %v2689_v7 = vadd.f32 %v2688_v22, %v5181_v47 }
 0x775   : > { %v3698_v48 = vpop.f32.mrf.mxu1 }
 0x776   : > { %4090 = vpow2.f32 %v3349_v41  ;;  %v3352_v37 = vmul.f32 -1.442695, %v2743_v8  ;;  %v2741_v25 = vadd.f32 %v5453_v23, %v2689_v7  ;;  %v2710_v1 = vadd.f32 %v3698_v48, %v5213_v34 }
 0x777   : > { %v2701_v35 = vpop.f32.mrf.mxu1 }
 0x778   : > { %4092 = vpow2.f32 %v3352_v37  ;;  %v3350_v53 = vmul.f32 -1.442695, %v2741_v25  ;;  %v2746_v46 = vadd.f32 %v5453_v23, %v2710_v1  ;;  %v2702_v56 = vadd.f32 %v2701_v35, %v5206_v6 }
 0x779   : > { %v4081_v2 = vpop.eup %4080  ;;  %v3699_v19 = vpop.f32.mrf.mxu1 }
 0x77a   : > { %v2802_v26 = vadd.f32 1.0, %v4081_v2  ;;  %4094 = vpow2.f32 %v3350_v53  ;;  %v3355_v4 = vmul.f32 -1.442695, %v2746_v46  ;;  %v2744_v47 = vadd.f32 %v5453_v23, %v2702_v56 }
 0x77b   : > { %v4083_v50 = vpop.eup %4082  ;;  %v2713_v45 = vadd.f32 %v3699_v19, %v5217_v29  ;;  %v2704_v0 = vpop.f32.mrf.mxu1 }
 0x77c   : > { %4096 = vrcp.f32 %v2802_v26  ;;  %v2800_v34 = vadd.f32 1.0, %v4083_v50  ;;  %v3353_v28 = vmul.f32 -1.442695, %v2744_v47  ;;  %v2705_v63 = vadd.f32 %v2704_v0, %v5210_v27 }
 0x77d   : > { %v4085_v39 = vpop.eup %4084  ;;  %4098 = vpow2.f32 %v3355_v4  ;;  %v2747_v6 = vadd.f32 %v5453_v23, %v2713_v45  ;;  %v3702_v3 = vpop.f32.mrf.mxu1  ;;  %v4201_v4 = vld [vmem:[%s4565_s19 + $0x10] sm:$0xff] }
 0x77e   : > { %4100 = vrcp.f32 %v2800_v34  ;;  %v2803_v44 = vadd.f32 1.0, %v4085_v39  ;;  %v2745_v33 = vadd.f32 %v5453_v23, %v2705_v63  ;;  %v2726_v30 = vadd.f32 %v3702_v3, %v5242_v36  ;;  %v4202_v39 = vld [vmem:[%s4565_s19 + $0x18] sm:$0xff]  ;;  %v4203_v3 = vld [vmem:[%s4565_s19] sm:$0xff] }
 0x77f   : > { %v4087_v16 = vpop.eup %4086  ;;  %4102 = vpow2.f32 %v3353_v28  ;;  %v3356_v29 = vmul.f32 -1.442695, %v2747_v6  ;;  %v2717_v9 = vpop.f32.mrf.mxu1 }
 0x780   : > { %4104 = vrcp.f32 %v2803_v44  ;;  %v2801_v15 = vadd.f32 1.0, %v4087_v16  ;;  %v3354_v13 = vmul.f32 -1.442695, %v2745_v33  ;;  %v2750_v27 = vadd.f32 %v5453_v23, %v2726_v30 }
 0x781   : > { %v4089_v62 = vpop.eup %4088  ;;  %4106 = vpow2.f32 %v3356_v29  ;;  %v2718_v24 = vadd.f32 %v2717_v9, %v5228_v59  ;;  %v3703_v49 = vpop.f32.mrf.mxu1 }
 0x782   : > { %4108 = vrcp.f32 %v2801_v15  ;;  %v2806_v10 = vadd.f32 1.0, %v4089_v62  ;;  %v3359_v38 = vmul.f32 -1.442695, %v2750_v27  ;;  %v2729_v14 = vadd.f32 %v3703_v49, %v5346_v61  ;;  %v4205_v62 = vld [vmem:[%s4565_s19 + $0x30] sm:$0xff] }
 0x783   : > { %v4091_v36 = vpop.eup %4090  ;;  %4110 = vpow2.f32 %v3354_v13  ;;  %v2748_v60 = vadd.f32 %v5453_v23, %v2718_v24  ;;  %v2720_v22 = vpop.f32.mrf.mxu1  ;;  %v4204_v13 = vld [vmem:[%s4565_s19 + $0x8] sm:$0xff] }
 0x784   : > { %4112 = vrcp.f32 %v2806_v10  ;;  %v2804_v41 = vadd.f32 1.0, %v4091_v36  ;;  %v2751_v8 = vadd.f32 %v5453_v23, %v2729_v14  ;;  %v2721_v7 = vadd.f32 %v2720_v22, %v5236_v58  ;;  %v4206_v22 = vld [vmem:[%s4565_s19 + $0x38] sm:$0xff] }
 0x785   : > { %v4093_v48 = vpop.eup %4092  ;;  %4114 = vpow2.f32 %v3359_v38  ;;  %v3357_v59 = vmul.f32 -1.442695, %v2748_v60 }
 0x786   : > { %4116 = vrcp.f32 %v2804_v41  ;;  %v2807_v37 = vadd.f32 1.0, %v4093_v48  ;;  %v3360_v25 = vmul.f32 -1.442695, %v2751_v8  ;;  %v2749_v61 = vadd.f32 %v5453_v23, %v2721_v7 }
 0x787   : > { %v4095_v1 = vpop.eup %4094  ;;  %4118 = vpow2.f32 %v3357_v59 }
 0x788   : > { %4120 = vrcp.f32 %v2807_v37  ;;  %v2805_v35 = vadd.f32 1.0, %v4095_v1  ;;  %v3358_v53 = vmul.f32 -1.442695, %v2749_v61  ;;  %v4209_v1 = vld [vmem:[%s4565_s19 + $0x50] sm:$0xff] }
 0x789   : > { %v4097_v46 = vpop.eup %4096  ;;  %4122 = vpow2.f32 %v3360_v25  ;;  %v4208_v25 = vld [vmem:[%s4565_s19 + $0x28] sm:$0xff] }
 0x78a   : > { %v4099_v56 = vpop.eup %4098  ;;  %4124 = vrcp.f32 %v2805_v35  ;;  %v2850_v58 = vmul.f32 %v4097_v46, %v5409_v55 }
 0x78b   : > { %v4101_v2 = vpop.eup %4100  ;;  %v2810_v19 = vadd.f32 1.0, %v4099_v56  ;;  %4126 = vpow2.f32 %v3358_v53 }
 0x78c   : > { %v4103_v26 = vpop.eup %4102  ;;  %v5489_v47 = vadd.f32 %v4201_v4, %v2850_v58  ;;  %v2848_v23 = vmul.f32 %v4101_v2, %v5405_v40  ;;  %v4211_v2 = vld [vmem:[%s4565_s19 + $0x40] sm:$0xff] }
 0x78d   : > { %v4105_v50 = vpop.eup %4104  ;;  %4128 = vrcp.f32 %v2810_v19  ;;  %v2808_v45 = vadd.f32 1.0, %v4103_v26 }
 0x78e   : > { %v4107_v0 = vpop.eup %4106  ;;  %2884 = vadd.xlane.f32.xlu1 %v5489_v47  ;;  %v2851_v34 = vmul.f32 %v4105_v50, %v5403_v12  ;;  %v5498_v44 = vadd.f32 %v4203_v3, %v2848_v23  ;;  %v4212_v23 = vld [vmem:[%s4565_s19 + $0x48] sm:$0xff]  ;;  %v4215_v3 = vld [vmem:[%s4565_s19 + $0x70] sm:$0xff] }
 0x78f   : > { %v4109_v55 = vpop.eup %4108  ;;  %4130 = vrcp.f32 %v2808_v45  ;;  %v2811_v28 = vadd.f32 1.0, %v4107_v0  ;;  %v4213_v0 = vld [vmem:[%s4565_s19 + $0x60] sm:$0xff] }
 0x790   : > { %v4111_v63 = vpop.eup %4110  ;;  %v5495_v6 = vadd.f32 %v4202_v39, %v2851_v34  ;;  %v2849_v40 = vmul.f32 %v4109_v55, %v5407_v42 }
 0x791   : > { %v4113_v33 = vpop.eup %4112  ;;  %4132 = vrcp.f32 %v2811_v28  ;;  %v2809_v30 = vadd.f32 1.0, %v4111_v63  ;;  %v4214_v63 = vld [vmem:[%s4565_s19 + $0x68] sm:$0xff] }
 0x792   : > { %v4115_v16 = vpop.eup %4114  ;;  %2886 = vadd.xlane.f32.xlu0 %v5495_v6  ;;  %2880 = vadd.xlane.f32.xlu1 %v5498_v44  ;;  %v2854_v12 = vmul.f32 %v4113_v33, %v5421_v18  ;;  %v5505_v27 = vadd.f32 %v4204_v13, %v2849_v40  ;;  %v4216_v33 = vld [vmem:[%s4565_s19 + $0x78] sm:$0xff] }
 0x793   : > { %v4117_v29 = vpop.eup %4116  ;;  %4134 = vrcp.f32 %v2809_v30  ;;  %v2814_v9 = vadd.f32 1.0, %v4115_v16 }
 0x794   : > { %v4119_v15 = vpop.eup %4118  ;;  %v5508_v42 = vadd.f32 %v4205_v62, %v2854_v12  ;;  %v2852_v24 = vmul.f32 %v4117_v29, %v5417_v52  ;;  %v4207_v52 = vld [vmem:[%s4565_s19 + $0x20] sm:$0xff] }
 0x795   : > { %v4121_v49 = vpop.eup %4120  ;;  %v2812_v10 = vadd.f32 1.0, %v4119_v15  ;;  %4136 = vrcp.f32 %v2814_v9 }
 0x796   : > { %v4123_v38 = vpop.eup %4122  ;;  %2882 = vadd.xlane.f32.xlu0 %v5505_v27  ;;  %2892 = vadd.xlane.f32.xlu1 %v5508_v42  ;;  %v2855_v18 = vmul.f32 %v4121_v49, %v5415_v20  ;;  %v5518_v8 = vadd.f32 %v4207_v52, %v2852_v24 }
 0x797   : > { %v4125_v14 = vpop.eup %4124  ;;  %4138 = vrcp.f32 %v2812_v10  ;;  %v2815_v36 = vadd.f32 1.0, %v4123_v38 }
 0x798   : > { %v4127_v60 = vpop.eup %4126  ;;  %v5515_v41 = vadd.f32 %v4206_v22, %v2855_v18  ;;  %v2853_v7 = vmul.f32 %v4125_v14, %v5419_v5 }
 0x799   : > { %v2813_v48 = vadd.f32 1.0, %v4127_v60  ;;  %4140 = vrcp.f32 %v2815_v36 }
 0x79a   : > { %v4129_v59 = vpop.eup %4128  ;;  %2894 = vadd.xlane.f32.xlu0 %v5515_v41  ;;  %2888 = vadd.xlane.f32.xlu1 %v5518_v8  ;;  %v5525_v61 = vadd.f32 %v4208_v25, %v2853_v7 }
 0x79b   : > { %4142 = vrcp.f32 %v2813_v48  ;;  %v2858_v20 = vmul.f32 %v4129_v59, %v5433_v17  ;;  %v4210_v17 = vld [vmem:[%s4565_s19 + $0x58] sm:$0xff] }
 0x79c   : > { %v4131_v37 = vpop.eup %4130 }
 0x79d   : > { %v5528_v35 = vadd.f32 %v4209_v1, %v2858_v20  ;;  %v2856_v5 = vmul.f32 %v4131_v37, %v5429_v43 }
 0x79e   : > { %v4133_v53 = vpop.eup %4132  ;;  %2890 = vadd.xlane.f32.xlu0 %v5525_v61 }
 0x79f   : > { %2900 = vadd.xlane.f32.xlu1 %v5528_v35  ;;  %v2859_v46 = vmul.f32 %v4133_v53, %v5427_v54  ;;  %v5538_v19 = vadd.f32 %v4211_v2, %v2856_v5 }
 0x7a0   : > { %v4135_v56 = vpop.eup %4134 }
 0x7a1   : > { %v5535_v58 = vadd.f32 %v4210_v17, %v2859_v46  ;;  %v2857_v26 = vmul.f32 %v4135_v56, %v5431_v11 }
 0x7a2   : > { %v4137_v4 = vpop.eup %4136 }
 0x7a3   : > { %2902 = vadd.xlane.f32.xlu0 %v5535_v58  ;;  %2896 = vadd.xlane.f32.xlu1 %v5538_v19  ;;  %v5544_v54 = vadd.f32 %v4212_v23, %v2857_v26  ;;  %v2862_v11 = vmul.f32 %v4137_v4, %v5445_v32 }
 0x7a4   : > { %v4139_v43 = vpop.eup %4138 }
 0x7a5   : > { %v2860_v50 = vmul.f32 %v4139_v43, %v5441_v51  ;;  %v5558_v40 = vadd.f32 %v4215_v3, %v2862_v11 }
 0x7a6   : > { %v4141_v45 = vpop.eup %4140 }
 0x7a7   : > { %2898 = vadd.xlane.f32.xlu0 %v5544_v54  ;;  %v5549_v34 = vadd.f32 %v4213_v0, %v2860_v50  ;;  %v2863_v51 = vmul.f32 %v4141_v45, %v5439_v57 }
 0x7a8   : > { %v4143_v55 = vpop.eup %4142 }
 0x7a9   : > { %2904 = vadd.xlane.f32.xlu1 %v5549_v34  ;;  %v2861_v28 = vmul.f32 %v4143_v55, %v5443_v31  ;;  %v5564_v30 = vadd.f32 %v4216_v33, %v2863_v51 }
 0x7ab   : > { %v5555_v39 = vadd.f32 %v4214_v63, %v2861_v28 }
 0x7ad   : > { %2906 = vadd.xlane.f32.xlu0 %v5555_v39  ;;  %2908 = vadd.xlane.f32.xlu1 %v5558_v40 }
 0x7b1   : > { %2910 = vadd.xlane.f32.xlu0 %v5564_v30 }
 0x817   : > { %v2885_v32 = vpop.xlane.xlu1 %2884 }
 0x818   : > { %v2915_v16 = vmul.f32 0.0078125, %v2885_v32 }
 0x81a   : > { %v5568_v31 = vsub.f32 %v5489_v47, %v2915_v16 }
 0x81b   : > { %v2887_v12 = vpop.xlane.xlu0 %2886  ;;  %v2881_v29 = vpop.xlane.xlu1 %2880 }
 0x81c   : > { %v2916_v9 = vmul.f32 0.0078125, %v2887_v12  ;;  %v2913_v15 = vmul.f32 0.0078125, %v2881_v29  ;;  %v2947_v57 = vmul.f32 %v5568_v31, %v5568_v31 }
 0x81e   : > { %v5573_v13 = vsub.f32 %v5495_v6, %v2916_v9  ;;  %v5576_v62 = vsub.f32 %v5498_v44, %v2913_v15  ;;  %2965 = vadd.xlane.f32.xlu1 %v2947_v57 }
 0x81f   : > { %v2883_v24 = vpop.xlane.xlu0 %2882  ;;  %v2893_v49 = vpop.xlane.xlu1 %2892 }
 0x820   : > { %v2914_v10 = vmul.f32 0.0078125, %v2883_v24  ;;  %v2919_v38 = vmul.f32 0.0078125, %v2893_v49  ;;  %v2948_v47 = vmul.f32 %v5573_v13, %v5573_v13  ;;  %v2945_v18 = vmul.f32 %v5576_v62, %v5576_v62 }
 0x822   : > { %v5583_v14 = vsub.f32 %v5505_v27, %v2914_v10  ;;  %v5586_v6 = vsub.f32 %v5508_v42, %v2919_v38  ;;  %2967 = vadd.xlane.f32.xlu0 %v2948_v47  ;;  %2961 = vadd.xlane.f32.xlu1 %v2945_v18 }
 0x823   : > { %v2895_v44 = vpop.xlane.xlu0 %2894  ;;  %v2889_v36 = vpop.xlane.xlu1 %2888 }
 0x824   : > { %v2920_v60 = vmul.f32 0.0078125, %v2895_v44  ;;  %v2917_v22 = vmul.f32 0.0078125, %v2889_v36  ;;  %v2946_v52 = vmul.f32 %v5583_v14, %v5583_v14  ;;  %v2951_v7 = vmul.f32 %v5586_v6, %v5586_v6 }
 0x826   : > { %v5593_v48 = vsub.f32 %v5515_v41, %v2920_v60  ;;  %v5596_v27 = vsub.f32 %v5518_v8, %v2917_v22  ;;  %2963 = vadd.xlane.f32.xlu0 %v2946_v52  ;;  %2973 = vadd.xlane.f32.xlu1 %v2951_v7  ;;  %v3059_v7 = vsub.s32 5, %v5853_v21 }
 0x827   : > { %v2891_v42 = vpop.xlane.xlu0 %2890 }
 0x828   : > { %v2918_v59 = vmul.f32 0.0078125, %v2891_v42  ;;  %v2901_v20 = vpop.xlane.xlu1 %2900  ;;  %v2952_v37 = vmul.f32 %v5593_v48, %v5593_v48  ;;  %v2949_v25 = vmul.f32 %v5596_v27, %v5596_v27 }
 0x829   : > { %v2923_v1 = vmul.f32 0.0078125, %v2901_v20  ;;  %v3079_v20 = vsub.s32 6, %v5853_v21 }
 0x82a   : > { %v5603_v5 = vsub.f32 %v5525_v61, %v2918_v59  ;;  %2975 = vadd.xlane.f32.xlu0 %v2952_v37  ;;  %2969 = vadd.xlane.f32.xlu1 %v2949_v25 }
 0x82b   : > { %v5606_v41 = vsub.f32 %v5528_v35, %v2923_v1 }
 0x82c   : > { %v2903_v8 = vpop.xlane.xlu0 %2902  ;;  %v2897_v53 = vpop.xlane.xlu1 %2896  ;;  %v2950_v46 = vmul.f32 %v5603_v5, %v5603_v5 }
 0x82d   : > { %v2924_v56 = vmul.f32 0.0078125, %v2903_v8  ;;  %v2921_v17 = vmul.f32 0.0078125, %v2897_v53  ;;  %v2955_v2 = vmul.f32 %v5606_v41, %v5606_v41  ;;  %v4217_v8 = vld [vmem:[%s5781_s7] sm:$0xff] }
 0x82e   : > { %2971 = vadd.xlane.f32.xlu0 %v2950_v46  ;;  %v5652_v53 = vrot.slane %v4217_v8, %v3059_v7 }
 0x82f   : > { %v5613_v26 = vsub.f32 %v5535_v58, %v2924_v56  ;;  %v5616_v61 = vsub.f32 %v5538_v19, %v2921_v17  ;;  %2981 = vadd.xlane.f32.xlu1 %v2955_v2 }
 0x830   : > { %v2899_v35 = vpop.xlane.xlu0 %2898 }
 0x831   : > { %v2922_v4 = vmul.f32 0.0078125, %v2899_v35  ;;  %v2956_v43 = vmul.f32 %v5613_v26, %v5613_v26  ;;  %v2953_v23 = vmul.f32 %v5616_v61, %v5616_v61  ;;  %v5654_v35 = vrot.slane %v4217_v8, %v3079_v20 }
 0x832   : > { %v2905_v50 = vpop.xlane.xlu1 %2904 }
 0x833   : > { %v5623_v45 = vsub.f32 %v5544_v54, %v2922_v4  ;;  %v2925_v0 = vmul.f32 0.0078125, %v2905_v50  ;;  %2983 = vadd.xlane.f32.xlu0 %v2956_v43  ;;  %2977 = vadd.xlane.f32.xlu1 %v2953_v23 }
 0x835   : > { %v5626_v58 = vsub.f32 %v5549_v34, %v2925_v0  ;;  %v2954_v19 = vmul.f32 %v5623_v45, %v5623_v45 }
 0x836   : > { %v2907_v11 = vpop.xlane.xlu0 %2906  ;;  %v2909_v55 = vpop.xlane.xlu1 %2908 }
 0x837   : > { %v2926_v28 = vmul.f32 0.0078125, %v2907_v11  ;;  %v2927_v63 = vmul.f32 0.0078125, %v2909_v55  ;;  %2979 = vadd.xlane.f32.xlu0 %v2954_v19  ;;  %v2957_v3 = vmul.f32 %v5626_v58, %v5626_v58 }
 0x839   : > { %v5633_v54 = vsub.f32 %v5555_v39, %v2926_v28  ;;  %v5636_v51 = vsub.f32 %v5558_v40, %v2927_v63  ;;  %2985 = vadd.xlane.f32.xlu1 %v2957_v3 }
 0x83a   : > { %v2911_v34 = vpop.xlane.xlu0 %2910 }
 0x83b   : > { %v2928_v33 = vmul.f32 0.0078125, %v2911_v34  ;;  %v2958_v32 = vmul.f32 %v5633_v54, %v5633_v54  ;;  %v2959_v16 = vmul.f32 %v5636_v51, %v5636_v51 }
 0x83d   : > { %v5643_v12 = vsub.f32 %v5564_v30, %v2928_v33  ;;  %2987 = vadd.xlane.f32.xlu0 %v2958_v32  ;;  %2989 = vadd.xlane.f32.xlu1 %v2959_v16 }
 0x83f   : > { %v2960_v39 = vmul.f32 %v5643_v12, %v5643_v12 }
 0x841   : > { %2991 = vadd.xlane.f32.xlu0 %v2960_v39 }
 0x8a7   : > { %v2966_v40 = vpop.xlane.xlu1 %2965 }
 0x8a8   : > { %v2995_v29 = vmul.f32 0.0078125, %v2966_v40 }
 0x8aa   : > { %v3011_v9 = vadd.f32 1e-05, %v2995_v29 }
 0x8ab   : > { %v2968_v15 = vpop.xlane.xlu0 %2967  ;;  %v2962_v57 = vpop.xlane.xlu1 %2961 }
 0x8ac   : > { %4144 = vrsqrt.f32 %v3011_v9  ;;  %v2996_v24 = vmul.f32 0.0078125, %v2968_v15  ;;  %v2993_v49 = vmul.f32 0.0078125, %v2962_v57 }
 0x8ae   : > { %v3012_v10 = vadd.f32 1e-05, %v2996_v24  ;;  %v3009_v38 = vadd.f32 1e-05, %v2993_v49 }
 0x8af   : > { %v2964_v47 = vpop.xlane.xlu0 %2963  ;;  %v2974_v18 = vpop.xlane.xlu1 %2973 }
 0x8b0   : > { %4146 = vrsqrt.f32 %v3012_v10  ;;  %v2994_v30 = vmul.f32 0.0078125, %v2964_v47  ;;  %v2999_v44 = vmul.f32 0.0078125, %v2974_v18 }
 0x8b1   : > { %4148 = vrsqrt.f32 %v3009_v38 }
 0x8b2   : > { %v3010_v36 = vadd.f32 1e-05, %v2994_v30  ;;  %v3015_v60 = vadd.f32 1e-05, %v2999_v44 }
 0x8b3   : > { %v2976_v22 = vpop.xlane.xlu0 %2975  ;;  %v2970_v52 = vpop.xlane.xlu1 %2969 }
 0x8b4   : > { %4150 = vrsqrt.f32 %v3010_v36  ;;  %v3000_v42 = vmul.f32 0.0078125, %v2976_v22  ;;  %v2997_v59 = vmul.f32 0.0078125, %v2970_v52 }
 0x8b5   : > { %4152 = vrsqrt.f32 %v3015_v60 }
 0x8b6   : > { %v3016_v37 = vadd.f32 1e-05, %v3000_v42  ;;  %v3013_v25 = vadd.f32 1e-05, %v2997_v59 }
 0x8b7   : > { %v2972_v1 = vpop.xlane.xlu0 %2971 }
 0x8b8   : > { %4154 = vrsqrt.f32 %v3016_v37  ;;  %v2998_v46 = vmul.f32 0.0078125, %v2972_v1  ;;  %v2982_v56 = vpop.xlane.xlu1 %2981 }
 0x8b9   : > { %v4145_v17 = vpop.eup %4144  ;;  %4156 = vrsqrt.f32 %v3013_v25  ;;  %v3003_v2 = vmul.f32 0.0078125, %v2982_v56 }
 0x8ba   : > { %v3043_v4 = vmul.f32 %v4145_v17, %v5568_v31  ;;  %v3014_v21 = vadd.f32 1e-05, %v2998_v46 }
 0x8bb   : > { %v3019_v43 = vadd.f32 1e-05, %v3003_v2 }
 0x8bc   : > { %v3063_v23 = vmul.f32 %v5652_v53, %v3043_v4  ;;  %4158 = vrsqrt.f32 %v3014_v21  ;;  %v2984_v50 = vpop.xlane.xlu0 %2983  ;;  %v2978_v0 = vpop.xlane.xlu1 %2977 }
 0x8bd   : > { %v4147_v19 = vpop.eup %4146  ;;  %4160 = vrsqrt.f32 %v3019_v43  ;;  %v3004_v11 = vmul.f32 0.0078125, %v2984_v50  ;;  %v3001_v55 = vmul.f32 0.0078125, %v2978_v0 }
 0x8be   : > { %v4149_v28 = vpop.eup %4148  ;;  %v3083_v63 = vadd.f32 %v5654_v35, %v3063_v23  ;;  %v3044_v3 = vmul.f32 %v4147_v19, %v5573_v13 }
 0x8bf   : > { %v3041_v34 = vmul.f32 %v4149_v28, %v5576_v62  ;;  %v3020_v31 = vadd.f32 1e-05, %v3004_v11  ;;  %v3017_v33 = vadd.f32 1e-05, %v3001_v55 }
 0x8c0   : > { %3099 = vst [vmem:[%s5663_s13 + $0x10] sm:$0xff] %v3083_v63  ;;  %v3064_v32 = vmul.f32 %v5652_v53, %v3044_v3  ;;  %v2980_v16 = vpop.xlane.xlu0 %2979 }
 0x8c1   : > { %v4151_v39 = vpop.eup %4150  ;;  %v3061_v40 = vmul.f32 %v5652_v53, %v3041_v34  ;;  %4162 = vrsqrt.f32 %v3020_v31  ;;  %v3002_v29 = vmul.f32 0.0078125, %v2980_v16 }
 0x8c2   : > { %v4153_v13 = vpop.eup %4152  ;;  %v3084_v62 = vadd.f32 %v5654_v35, %v3064_v32  ;;  %v3042_v9 = vmul.f32 %v4151_v39, %v5583_v14  ;;  %4164 = vrsqrt.f32 %v3017_v33  ;;  %v2986_v15 = vpop.xlane.xlu1 %2985 }
 0x8c3   : > { %v3081_v57 = vadd.f32 %v5654_v35, %v3061_v40  ;;  %v3047_v24 = vmul.f32 %v4153_v13, %v5586_v6  ;;  %v3018_v49 = vadd.f32 1e-05, %v3002_v29  ;;  %v3005_v10 = vmul.f32 0.0078125, %v2986_v15 }
 0x8c4   : > { %3100 = vst [vmem:[%s5663_s13 + $0x18] sm:$0xff] %v3084_v62  ;;  %v3062_v38 = vmul.f32 %v5652_v53, %v3042_v9 }
 0x8c5   : > { %v4155_v47 = vpop.eup %4154  ;;  %3097 = vst [vmem:[%s5663_s13] sm:$0xff] %v3081_v57  ;;  %v3067_v18 = vmul.f32 %v5652_v53, %v3047_v24  ;;  %4166 = vrsqrt.f32 %v3018_v49  ;;  %v3021_v30 = vadd.f32 1e-05, %v3005_v10 }
 0x8c6   : > { %v4157_v14 = vpop.eup %4156  ;;  %v3082_v44 = vadd.f32 %v5654_v35, %v3062_v38  ;;  %v3048_v36 = vmul.f32 %v4155_v47, %v5593_v48  ;;  %v2988_v60 = vpop.xlane.xlu0 %2987 }
 0x8c7   : > { %v2990_v6 = vpop.xlane.xlu1 %2989  ;;  %v3087_v22 = vadd.f32 %v5654_v35, %v3067_v18  ;;  %v3045_v52 = vmul.f32 %v4157_v14, %v5596_v27  ;;  %4168 = vrsqrt.f32 %v3021_v30  ;;  %v3006_v7 = vmul.f32 0.0078125, %v2988_v60 }
 0x8c8   : > { %3098 = vst [vmem:[%s5663_s13 + $0x8] sm:$0xff] %v3082_v44  ;;  %v3068_v42 = vmul.f32 %v5652_v53, %v3048_v36  ;;  %v3007_v59 = vmul.f32 0.0078125, %v2990_v6 }
 0x8c9   : > { %v4159_v20 = vpop.eup %4158  ;;  %3103 = vst [vmem:[%s5663_s13 + $0x30] sm:$0xff] %v3087_v22  ;;  %v3065_v37 = vmul.f32 %v5652_v53, %v3045_v52  ;;  %v3022_v25 = vadd.f32 1e-05, %v3006_v7 }
 0x8ca   : > { %v4161_v48 = vpop.eup %4160  ;;  %v3088_v1 = vadd.f32 %v5654_v35, %v3068_v42  ;;  %v3046_v8 = vmul.f32 %v4159_v20, %v5603_v5  ;;  %v3023_v46 = vadd.f32 1e-05, %v3007_v59  ;;  %v2992_v27 = vpop.xlane.xlu0 %2991 }
 0x8cb   : > { %v3085_v56 = vadd.f32 %v5654_v35, %v3065_v37  ;;  %v3051_v17 = vmul.f32 %v4161_v48, %v5606_v41  ;;  %4170 = vrsqrt.f32 %v3022_v25  ;;  %v3008_v2 = vmul.f32 0.0078125, %v2992_v27 }
 0x8cc   : > { %3104 = vst [vmem:[%s5663_s13 + $0x38] sm:$0xff] %v3088_v1  ;;  %v3066_v4 = vmul.f32 %v5652_v53, %v3046_v8  ;;  %4172 = vrsqrt.f32 %v3023_v46 }
 0x8cd   : > { %3101 = vst [vmem:[%s5663_s13 + $0x20] sm:$0xff] %v3085_v56  ;;  %v3071_v21 = vmul.f32 %v5652_v53, %v3051_v17  ;;  %v3024_v43 = vadd.f32 1e-05, %v3008_v2 }
 0x8ce   : > { %v4163_v23 = vpop.eup %4162  ;;  %v3086_v5 = vadd.f32 %v5654_v35, %v3066_v4 }
 0x8cf   : > { %v4165_v50 = vpop.eup %4164  ;;  %v3091_v0 = vadd.f32 %v5654_v35, %v3071_v21  ;;  %v3052_v41 = vmul.f32 %v4163_v23, %v5613_v26  ;;  %4174 = vrsqrt.f32 %v3024_v43 }
 0x8d0   : > { %3102 = vst [vmem:[%s5663_s13 + $0x28] sm:$0xff] %v3086_v5  ;;  %v3049_v19 = vmul.f32 %v4165_v50, %v5616_v61 }
 0x8d1   : > { %3107 = vst [vmem:[%s5663_s13 + $0x50] sm:$0xff] %v3091_v0  ;;  %v3072_v11 = vmul.f32 %v5652_v53, %v3052_v41 }
 0x8d2   : > { %v4167_v55 = vpop.eup %4166  ;;  %v3069_v28 = vmul.f32 %v5652_v53, %v3049_v19 }
 0x8d3   : > { %v3092_v63 = vadd.f32 %v5654_v35, %v3072_v11  ;;  %v3050_v3 = vmul.f32 %v4167_v55, %v5623_v45 }
 0x8d4   : > { %v4169_v34 = vpop.eup %4168  ;;  %v3089_v31 = vadd.f32 %v5654_v35, %v3069_v28 }
 0x8d5   : > { %3108 = vst [vmem:[%s5663_s13 + $0x58] sm:$0xff] %v3092_v63  ;;  %v3070_v26 = vmul.f32 %v5652_v53, %v3050_v3  ;;  %v3053_v61 = vmul.f32 %v4169_v34, %v5626_v58 }
 0x8d6   : > { %3105 = vst [vmem:[%s5663_s13 + $0x40] sm:$0xff] %v3089_v31 }
 0x8d7   : > { %v3090_v33 = vadd.f32 %v5654_v35, %v3070_v26  ;;  %v3073_v32 = vmul.f32 %v5652_v53, %v3053_v61 }
 0x8d8   : > { %v4171_v16 = vpop.eup %4170 }
 0x8d9   : > { %v4173_v39 = vpop.eup %4172  ;;  %3106 = vst [vmem:[%s5663_s13 + $0x48] sm:$0xff] %v3090_v33  ;;  %v3093_v45 = vadd.f32 %v5654_v35, %v3073_v32  ;;  %v3054_v40 = vmul.f32 %v4171_v16, %v5633_v54 }
 0x8da   : > { %v3055_v29 = vmul.f32 %v4173_v39, %v5636_v51 }
 0x8db   : > { %3109 = vst [vmem:[%s5663_s13 + $0x60] sm:$0xff] %v3093_v45  ;;  %v3074_v58 = vmul.f32 %v5652_v53, %v3054_v40 }
 0x8dc   : > { %v4175_v13 = vpop.eup %4174  ;;  %v3075_v62 = vmul.f32 %v5652_v53, %v3055_v29 }
 0x8dd   : > { %v3094_v9 = vadd.f32 %v5654_v35, %v3074_v58  ;;  %v3056_v15 = vmul.f32 %v4175_v13, %v5643_v12 }
 0x8de   : > { %v3095_v57 = vadd.f32 %v5654_v35, %v3075_v62 }
 0x8df   : > { %3110 = vst [vmem:[%s5663_s13 + $0x68] sm:$0xff] %v3094_v9  ;;  %v3076_v54 = vmul.f32 %v5652_v53, %v3056_v15 }
 0x8e0   : > { %3111 = vst [vmem:[%s5663_s13 + $0x70] sm:$0xff] %v3095_v57 }
 0x8e1   : > { %v3096_v51 = vadd.f32 %v5654_v35, %v3076_v54 }
 0x8e3   : > { %3112 = vst [vmem:[%s5663_s13 + $0x78] sm:$0xff] %v3096_v51 }
 0x8e4   : > { %4311 = shalt.err (!%p4308_p11)
}
 0x8e5   : > { %s4312_s26 = scalar_lea.hbm %s5727_s14, 2048  ;;  %s4316_s17 = scalar_lea.hbm %s5782_s8, 4096 }
 0x8e6   : > { %p4313_p9 = scmp.ne.s32.totalorder %s5727_s14, %s4312_s26  ;;  %p4317_p6 = scmp.lt.s32.totalorder %s5727_s14, %s5782_s8 }
 0x8e7   : > { %p4318_p8 = scmp.lt.s32.totalorder %s4316_s17, %s4312_s26 }
 0x8e8   : > { %p4314_p1 = pnand %p4313_p9, %p5862_p7 }
 0x8e9   : > { %p4319_p10 = por %p4318_p8, %p4317_p6 }
 0x8ea   : > { %p4315_p4 = pneg %p4314_p1 }
 0x8ec   : > { %p4320_p2 = pnand %p4319_p10, %p4315_p4 }
 0x8ee   : > { %4323 = shalt.err (!%p4320_p2)
}
 0x8ef   : > { %s4379_s11 = smov 128   ;;  %s4380_s10 = smov 8  }
 0x8f0   : > { %3730 = dma.vmem_to_hbm [thread:$0]  (%p5862_p7), %s5729_s20, 2048, %s5727_s14, %s3114_s9, %s4379_s11, %s4379_s11, %s4380_s10  }
 0x8f1 PF: > { %s3142_s16 = sand.u32 1, %s4354_s27   ;;  %p5863_p12 = scmp.ne.s32.totalorder %s5816_s12, 0 }
 0x8f2   : > { %p5864_p13 = scmp.ge.s32.totalorder %s4366_s30, 2  ;;  %s3143_s18 = scalar_lea.sflag [#allocation4], %s3142_s16 }
 0x8f4   : > { %p3744_p0 = pnand %p5864_p13, %p5863_p12 }
 0x8f6   : > { %p3745_p5 = pneg %p3744_p0 }
 0x8f8   : > { %4349 = dma.done.wait (%p3745_p5), %s3143_s18, 2048  }
 0x8f9   : > { %4351 = vsyncadd (%p3745_p5), %s3143_s18, 4294965248  ;;  %p22_p3 = scmp.ge.s32.totalorder %s4501_s15, 4   ;;  %s5865_s27 = smov %s4358_s28 }
 0x8fa   : > { %s5866_s28 = smov %s4362_s29  ;;  %s5867_s29 = smov %s4510_s22 }
 0x8fb   : > { %s5868_s30 = smov %s4501_s15  ;;  %24 = sbr.rel (!%p22_p3) target bundleno = 9 (0x9), region = 111 }
 0x900   :  { %3148 = vsyncpa [#allocation3], 1 }
 0x901   :  { %3150 = vsyncpa [#allocation3 + $0x1], 1 }
 0x902   :  { %3151 = vsyncpa [#allocation6], 1 }
 0x903   :  { %3152 = vsyncpa [#allocation4], 1 }
 0x904   :  { %3154 = vsyncpa [#allocation4 + $0x1], 1 }

</bundles_post_ra>
